<compile_context>
chip_gen: v5e
topology: v5e:2x2
jax: 0.10.0
libtpu: 0.0.40
codegen_flags: <defaults>
</compile_context>

<pallas_src>
import functools

import jax
import jax.numpy as jnp
from jax.experimental import pallas as pl
from jax.experimental.pallas import tpu as pltpu


def _round_up(x, m):
    return ((x + m - 1) // m) * m


# ----------------------------------------------------------------------------
# Fused forward kernel (one grid step = TB images, everything VMEM-resident)
# ----------------------------------------------------------------------------
def _cnn_cifar_kernel(x_ref, w1_ref, b1_ref, s1e_ref, s1o_ref,
                      w2_ref, b2_ref, s2e_ref, s2o_ref,
                      wf1_ref, bf1_ref, wf2_ref, bf2_ref, wf3_ref, bf3_ref,
                      out_ref, *, tb):
    def mm(a, b):
        return jnp.dot(a, b, preferred_element_type=jnp.float32)

    # ---- conv1 (5x5, 3->6) + ReLU --------------------------------------
    # x_ref: [32, TB, 96]   (96 = 32*Cin, w-major / c-minor lanes)
    # w1_ref[kh]: [96, 168] banded weights (168 = 28*Cout1)
    x = x_ref[...]                                             # [32, TB, 96]
    acc = mm(x[0:28].reshape(28 * tb, 96), w1_ref[0])
    for kh in range(1, 5):
        acc = acc + mm(x[kh:kh + 28].reshape(28 * tb, 96), w1_ref[kh])
    y1 = jnp.maximum(acc + b1_ref[...], 0.0)                   # [28*TB, 168]

    # ---- maxpool 2x2 ----------------------------------------------------
    y1 = y1.reshape(14, 2 * tb, 168)                           # row pairs
    y1 = jnp.maximum(y1[:, :tb, :], y1[:, tb:, :])             # max over dh
    y1 = y1.reshape(14 * tb, 168)
    p1 = jnp.maximum(mm(y1, s1e_ref[...]), mm(y1, s1o_ref[...]))  # [14*TB, 84]

    # ---- conv2 (5x5, 6->16) + ReLU --------------------------------------
    acc = mm(p1[0:10 * tb], w2_ref[0])
    for kh in range(1, 5):
        acc = acc + mm(p1[kh * tb:(kh + 10) * tb], w2_ref[kh])
    y2 = jnp.maximum(acc + b2_ref[...], 0.0)                   # [10*TB, 160]

    # ---- maxpool 2x2 ----------------------------------------------------
    y2 = y2.reshape(5, 2 * tb, 160)
    y2 = jnp.maximum(y2[:, :tb, :], y2[:, tb:, :])
    y2 = y2.reshape(5 * tb, 160)
    p2 = jnp.maximum(mm(y2, s2e_ref[...]), mm(y2, s2o_ref[...]))  # [5*TB, 80]

    # ---- fc1 (torch NCHW flatten folded into per-row weight slabs) ------
    z = mm(p2[0:tb], wf1_ref[0])
    for h in range(1, 5):
        z = z + mm(p2[h * tb:(h + 1) * tb], wf1_ref[h])
    z = jnp.maximum(z + bf1_ref[...], 0.0)                     # [TB, 120]

    # ---- fc2 + ReLU, fc3 (output padded to 128 lanes for dense stores) --
    z = jnp.maximum(mm(z, wf2_ref[...]) + bf2_ref[...], 0.0)   # [TB, 84]
    out_ref[...] = (mm(z, wf3_ref[...]) + bf3_ref[...]).astype(out_ref.dtype)


# ----------------------------------------------------------------------------
# Wrapper-side (pure layout) weight preparation
# ----------------------------------------------------------------------------
def _banded_conv_weight(w, w_in):
    """w: [Cout, Cin, KH, KW] (torch conv layout) -> [KH, w_in*Cin, w_out*Cout].

    out[kh, w*Cin+c, ow*Cout+co] = w[co, c, kh, w-ow]  (0 <= w-ow < KW, else 0),
    so (x_row @ out[kh]) performs the width part of a valid conv for one kh tap.
    """
    cout, cin, kh_, kw_ = w.shape
    w_out = w_in - kw_ + 1
    ww = jnp.arange(w_in)
    ow = jnp.arange(w_out)
    kk = jnp.arange(kw_)
    sel = (ww[None, :, None] == (ow[None, None, :] + kk[:, None, None]))
    sel = sel.astype(w.dtype)                                   # [KW, w_in, w_out]
    out = jnp.einsum("kwp,oihk->hwipo", sel, w)                 # [KH, w_in, Cin, w_out, Cout]
    return out.reshape(kh_, w_in * cin, w_out * cout)


def _pool_select(w_in, c, parity, dtype=jnp.float32):
    """[w_in*c, (w_in//2)*c] 0/1 matrix gathering column (2*ow2+parity)*c + ch."""
    w_out = w_in // 2
    n = jnp.arange(w_out * c)
    src = (2 * (n // c) + parity) * c + (n % c)
    return (jnp.arange(w_in * c)[:, None] == src[None, :]).astype(dtype)


def _full_spec(arr):
    rank = arr.ndim
    return pl.BlockSpec(arr.shape, lambda i, _r=rank: (0,) * _r)


# ----------------------------------------------------------------------------
# CNNCifar forward
# ----------------------------------------------------------------------------
def cnn_cifar_forward(params, x_nchw):
    assert x_nchw.shape[1:] == (3, 32, 32), x_nchw.shape
    f32 = jnp.float32
    B = x_nchw.shape[0]
    num_classes = params["fc3_b"].shape[0]

    # Batch tiling: TB multiple of 8 (sublane alignment), capped at 64/step
    # (bigger steps amortize the ~0.35us per-grid-step overhead; VMEM usage at
    # TB=64 is still only a few MiB).
    tb = min(64, _round_up(max(B, 1), 8))
    bp = _round_up(B, tb)

    # Input layout: NCHW -> [H, Bp, W*Cin] (w-major / c-minor lanes).
    x = jnp.transpose(x_nchw.astype(f32), (0, 2, 3, 1)).reshape(B, 32, 32 * 3)
    if bp != B:
        x = jnp.pad(x, ((0, bp - B), (0, 0), (0, 0)))
    x = jnp.transpose(x, (1, 0, 2))                            # [32, Bp, 96]

    # Conv weights as banded matrices, biases tiled over the width dimension.
    w1b = _banded_conv_weight(params["conv1_w"].astype(f32), 32)   # [5, 96, 168]
    b1r = jnp.tile(params["conv1_b"].astype(f32), 28)[None, :]     # [1, 168]
    s1e = _pool_select(28, 6, 0)
    s1o = _pool_select(28, 6, 1)

    w2b = _banded_conv_weight(params["conv2_w"].astype(f32), 14)   # [5, 84, 160]
    b2r = jnp.tile(params["conv2_b"].astype(f32), 10)[None, :]     # [1, 160]
    s2e = _pool_select(10, 16, 0)
    s2o = _pool_select(10, 16, 1)

    # fc1: fold torch's view(-1, 16*5*5) (c*25 + h*5 + w) into per-h slabs
    # indexed [w*16 + c, n] to match the pooled-activation lane layout.
    wf1 = params["fc1_w"].astype(f32).reshape(120, 16, 5, 5)
    wf1 = jnp.transpose(wf1, (2, 3, 1, 0)).reshape(5, 5 * 16, 120)  # [5, 80, 120]
    bf1 = params["fc1_b"].astype(f32)[None, :]                       # [1, 120]

    wf2 = params["fc2_w"].astype(f32).T                              # [120, 84]
    bf2 = params["fc2_b"].astype(f32)[None, :]                       # [1, 84]

    # fc3: pad N up to a multiple of 128 for lane-dense output stores.
    npad = _round_up(num_classes, 128)
    wf3 = jnp.zeros((84, npad), f32).at[:, :num_classes].set(
        params["fc3_w"].astype(f32).T)
    bf3 = jnp.zeros((1, npad), f32).at[:, :num_classes].set(
        params["fc3_b"].astype(f32)[None, :])

    weight_ops = (w1b, b1r, s1e, s1o, w2b, b2r, s2e, s2o,
                  wf1, bf1, wf2, bf2, wf3, bf3)

    out = pl.pallas_call(
        functools.partial(_cnn_cifar_kernel, tb=tb),
        out_shape=jax.ShapeDtypeStruct((bp, npad), f32),
        grid=(bp // tb,),
        in_specs=[pl.BlockSpec((32, tb, 96), lambda i: (0, i, 0))]
                 + [_full_spec(a) for a in weight_ops],
        out_specs=pl.BlockSpec((tb, npad), lambda i: (i, 0)),
        compiler_params=pltpu.CompilerParams(
            dimension_semantics=("parallel",)),
    )(x, *weight_ops)

    return out[:B, :num_classes]


# ----------------------------------------------------------------------------
# Plain-JAX reference (for correctness check) and parameter init
# ----------------------------------------------------------------------------
def _reference_forward(params, x):
    prec = jax.lax.Precision.HIGHEST

    def conv_relu(x, w, b):
        y = jax.lax.conv_general_dilated(
            x, w, window_strides=(1, 1), padding="VALID",
            dimension_numbers=("NCHW", "OIHW", "NCHW"), precision=prec)
        return jax.nn.relu(y + b[None, :, None, None])

    def pool(x):
        return jax.lax.reduce_window(x, -jnp.inf, jax.lax.max,
                                     (1, 1, 2, 2), (1, 1, 2, 2), "VALID")

    y = pool(conv_relu(x, params["conv1_w"], params["conv1_b"]))
    y = pool(conv_relu(y, params["conv2_w"], params["conv2_b"]))
    y = y.reshape(y.shape[0], -1)                                   # NCHW flatten
    y = jax.nn.relu(jnp.dot(y, params["fc1_w"].T, precision=prec) + params["fc1_b"])
    y = jax.nn.relu(jnp.dot(y, params["fc2_w"].T, precision=prec) + params["fc2_b"])
    return jnp.dot(y, params["fc3_w"].T, precision=prec) + params["fc3_b"]


def init_params(key, num_classes=10):
    ks = jax.random.split(key, 10)

    def normal(k, shape, scale=0.05):
        return (scale * jax.random.normal(k, shape)).astype(jnp.float32)

    return {
        "conv1_w": normal(ks[0], (6, 3, 5, 5)),
        "conv1_b": normal(ks[1], (6,)),
        "conv2_w": normal(ks[2], (16, 6, 5, 5)),
        "conv2_b": normal(ks[3], (16,)),
        "fc1_w": normal(ks[4], (120, 16 * 5 * 5)),
        "fc1_b": normal(ks[5], (120,)),
        "fc2_w": normal(ks[6], (84, 120)),
        "fc2_b": normal(ks[7], (84,)),
        "fc3_w": normal(ks[8], (num_classes, 84)),
        "fc3_b": normal(ks[9], (num_classes,)),
    }


if __name__ == "__main__":
    key = jax.random.PRNGKey(0)
    k_params, k_x = jax.random.split(key)

    num_classes = 10
    params = init_params(k_params, num_classes=num_classes)

    # CIFAR-shaped input (the module's fc1 requires 32x32 spatial); batch=2.
    x = jax.random.normal(k_x, (2, 3, 32, 32), dtype=jnp.float32)

    fwd = jax.jit(cnn_cifar_forward)
    out = jax.block_until_ready(fwd(params, x))

    assert out.shape == (2, num_classes), out.shape
    assert out.dtype == jnp.float32

    ref = jax.block_until_ready(jax.jit(_reference_forward)(params, x))
    if not bool(jnp.allclose(out, ref, atol=1e-3, rtol=1e-2)):
        raise AssertionError(
            f"mismatch vs reference, max abs err = {float(jnp.max(jnp.abs(out - ref)))}")

    print("KERNEL_OK")
</pallas_src>

<mosaic_0001>
module attributes {stable_mosaic.version = 11 : i64} {
  func.func @_cnn_cifar_kernel(%arg0: i32, %arg1: memref<32x8x96xf32, #tpu.memory_space<vmem>>, %arg2: memref<5x96x168xf32, #tpu.memory_space<vmem>>, %arg3: memref<1x168xf32, #tpu.memory_space<vmem>>, %arg4: memref<168x84xf32, #tpu.memory_space<vmem>>, %arg5: memref<168x84xf32, #tpu.memory_space<vmem>>, %arg6: memref<5x84x160xf32, #tpu.memory_space<vmem>>, %arg7: memref<1x160xf32, #tpu.memory_space<vmem>>, %arg8: memref<160x80xf32, #tpu.memory_space<vmem>>, %arg9: memref<160x80xf32, #tpu.memory_space<vmem>>, %arg10: memref<5x80x120xf32, #tpu.memory_space<vmem>>, %arg11: memref<1x120xf32, #tpu.memory_space<vmem>>, %arg12: memref<120x84xf32, #tpu.memory_space<vmem>>, %arg13: memref<1x84xf32, #tpu.memory_space<vmem>>, %arg14: memref<84x128xf32, #tpu.memory_space<vmem>>, %arg15: memref<1x128xf32, #tpu.memory_space<vmem>>, %arg16: memref<8x128xf32, #tpu.memory_space<vmem>>) attributes {dimension_semantics = [#tpu.dimension_semantics<parallel>], iteration_bounds = array<i64: 1>, scalar_prefetch = 0 : i64, scratch_operands = 0 : i64, tpu.core_type = #tpu.core_type<tc>, window_params = [{transform_indices = @transform_0, window_bounds = array<i64: 32, 8, 96>}, {pipeline_mode = #tpu.pipeline_mode<synchronous>, transform_indices = @transform_1, window_bounds = array<i64: 5, 96, 168>}, {pipeline_mode = #tpu.pipeline_mode<synchronous>, transform_indices = @transform_2, window_bounds = array<i64: 1, 168>}, {pipeline_mode = #tpu.pipeline_mode<synchronous>, transform_indices = @transform_3, window_bounds = array<i64: 168, 84>}, {pipeline_mode = #tpu.pipeline_mode<synchronous>, transform_indices = @transform_4, window_bounds = array<i64: 168, 84>}, {pipeline_mode = #tpu.pipeline_mode<synchronous>, transform_indices = @transform_5, window_bounds = array<i64: 5, 84, 160>}, {pipeline_mode = #tpu.pipeline_mode<synchronous>, transform_indices = @transform_6, window_bounds = array<i64: 1, 160>}, {pipeline_mode = #tpu.pipeline_mode<synchronous>, transform_indices = @transform_7, window_bounds = array<i64: 160, 80>}, {pipeline_mode = #tpu.pipeline_mode<synchronous>, transform_indices = @transform_8, window_bounds = array<i64: 160, 80>}, {pipeline_mode = #tpu.pipeline_mode<synchronous>, transform_indices = @transform_9, window_bounds = array<i64: 5, 80, 120>}, {pipeline_mode = #tpu.pipeline_mode<synchronous>, transform_indices = @transform_10, window_bounds = array<i64: 1, 120>}, {pipeline_mode = #tpu.pipeline_mode<synchronous>, transform_indices = @transform_11, window_bounds = array<i64: 120, 84>}, {pipeline_mode = #tpu.pipeline_mode<synchronous>, transform_indices = @transform_12, window_bounds = array<i64: 1, 84>}, {pipeline_mode = #tpu.pipeline_mode<synchronous>, transform_indices = @transform_13, window_bounds = array<i64: 84, 128>}, {pipeline_mode = #tpu.pipeline_mode<synchronous>, transform_indices = @transform_14, window_bounds = array<i64: 1, 128>}, {transform_indices = @transform_15, window_bounds = array<i64: 8, 128>}]} {
    %c0 = arith.constant 0 : index
    %c0_0 = arith.constant 0 : index
    %c0_1 = arith.constant 0 : index
    %0 = vector.load %arg1[%c0, %c0_0, %c0_1] : memref<32x8x96xf32, #tpu.memory_space<vmem>>, vector<32x8x96xf32>
    %1 = vector.extract_strided_slice %0 {offsets = [0, 0, 0], sizes = [28, 8, 96], strides = [1, 1, 1]} : vector<32x8x96xf32> to vector<28x8x96xf32>
    %2 = vector.shape_cast %1 : vector<28x8x96xf32> to vector<224x96xf32>
    %c0_2 = arith.constant 0 : index
    %c0_3 = arith.constant 0 : index
    %c0_4 = arith.constant 0 : index
    %3 = vector.load %arg2[%c0_2, %c0_3, %c0_4] : memref<5x96x168xf32, #tpu.memory_space<vmem>>, vector<1x96x168xf32>
    %4 = vector.shape_cast %3 : vector<1x96x168xf32> to vector<96x168xf32>
    %cst = arith.constant dense<0.000000e+00> : vector<224x168xf32>
    %5 = tpu.matmul %2, %4, %cst {dimension_numbers = #tpu.dot_dimension_numbers<[1], [0], [0], [1], [0, 0, 1, 1], [], []>} : vector<224x96xf32>, vector<96x168xf32>, vector<224x168xf32> -> vector<224x168xf32>
    %6 = vector.extract_strided_slice %0 {offsets = [1, 0, 0], sizes = [28, 8, 96], strides = [1, 1, 1]} : vector<32x8x96xf32> to vector<28x8x96xf32>
    %7 = vector.shape_cast %6 : vector<28x8x96xf32> to vector<224x96xf32>
    %c1 = arith.constant 1 : index
    %c0_5 = arith.constant 0 : index
    %c0_6 = arith.constant 0 : index
    %8 = vector.load %arg2[%c1, %c0_5, %c0_6] : memref<5x96x168xf32, #tpu.memory_space<vmem>>, vector<1x96x168xf32>
    %9 = vector.shape_cast %8 : vector<1x96x168xf32> to vector<96x168xf32>
    %cst_7 = arith.constant dense<0.000000e+00> : vector<224x168xf32>
    %10 = tpu.matmul %7, %9, %cst_7 {dimension_numbers = #tpu.dot_dimension_numbers<[1], [0], [0], [1], [0, 0, 1, 1], [], []>} : vector<224x96xf32>, vector<96x168xf32>, vector<224x168xf32> -> vector<224x168xf32>
    %11 = arith.addf %5, %10 : vector<224x168xf32>
    %12 = vector.extract_strided_slice %0 {offsets = [2, 0, 0], sizes = [28, 8, 96], strides = [1, 1, 1]} : vector<32x8x96xf32> to vector<28x8x96xf32>
    %13 = vector.shape_cast %12 : vector<28x8x96xf32> to vector<224x96xf32>
    %c2 = arith.constant 2 : index
    %c0_8 = arith.constant 0 : index
    %c0_9 = arith.constant 0 : index
    %14 = vector.load %arg2[%c2, %c0_8, %c0_9] : memref<5x96x168xf32, #tpu.memory_space<vmem>>, vector<1x96x168xf32>
    %15 = vector.shape_cast %14 : vector<1x96x168xf32> to vector<96x168xf32>
    %cst_10 = arith.constant dense<0.000000e+00> : vector<224x168xf32>
    %16 = tpu.matmul %13, %15, %cst_10 {dimension_numbers = #tpu.dot_dimension_numbers<[1], [0], [0], [1], [0, 0, 1, 1], [], []>} : vector<224x96xf32>, vector<96x168xf32>, vector<224x168xf32> -> vector<224x168xf32>
    %17 = arith.addf %11, %16 : vector<224x168xf32>
    %18 = vector.extract_strided_slice %0 {offsets = [3, 0, 0], sizes = [28, 8, 96], strides = [1, 1, 1]} : vector<32x8x96xf32> to vector<28x8x96xf32>
    %19 = vector.shape_cast %18 : vector<28x8x96xf32> to vector<224x96xf32>
    %c3 = arith.constant 3 : index
    %c0_11 = arith.constant 0 : index
    %c0_12 = arith.constant 0 : index
    %20 = vector.load %arg2[%c3, %c0_11, %c0_12] : memref<5x96x168xf32, #tpu.memory_space<vmem>>, vector<1x96x168xf32>
    %21 = vector.shape_cast %20 : vector<1x96x168xf32> to vector<96x168xf32>
    %cst_13 = arith.constant dense<0.000000e+00> : vector<224x168xf32>
    %22 = tpu.matmul %19, %21, %cst_13 {dimension_numbers = #tpu.dot_dimension_numbers<[1], [0], [0], [1], [0, 0, 1, 1], [], []>} : vector<224x96xf32>, vector<96x168xf32>, vector<224x168xf32> -> vector<224x168xf32>
    %23 = arith.addf %17, %22 : vector<224x168xf32>
    %24 = vector.extract_strided_slice %0 {offsets = [4, 0, 0], sizes = [28, 8, 96], strides = [1, 1, 1]} : vector<32x8x96xf32> to vector<28x8x96xf32>
    %25 = vector.shape_cast %24 : vector<28x8x96xf32> to vector<224x96xf32>
    %c4 = arith.constant 4 : index
    %c0_14 = arith.constant 0 : index
    %c0_15 = arith.constant 0 : index
    %26 = vector.load %arg2[%c4, %c0_14, %c0_15] : memref<5x96x168xf32, #tpu.memory_space<vmem>>, vector<1x96x168xf32>
    %27 = vector.shape_cast %26 : vector<1x96x168xf32> to vector<96x168xf32>
    %cst_16 = arith.constant dense<0.000000e+00> : vector<224x168xf32>
    %28 = tpu.matmul %25, %27, %cst_16 {dimension_numbers = #tpu.dot_dimension_numbers<[1], [0], [0], [1], [0, 0, 1, 1], [], []>} : vector<224x96xf32>, vector<96x168xf32>, vector<224x168xf32> -> vector<224x168xf32>
    %29 = arith.addf %23, %28 : vector<224x168xf32>
    %c0_17 = arith.constant 0 : index
    %c0_18 = arith.constant 0 : index
    %30 = vector.load %arg3[%c0_17, %c0_18] : memref<1x168xf32, #tpu.memory_space<vmem>>, vector<1x168xf32>
    %31 = vector.broadcast %30 : vector<1x168xf32> to vector<224x168xf32>
    %32 = arith.addf %29, %31 : vector<224x168xf32>
    %cst_19 = arith.constant 0.000000e+00 : f32
    %33 = vector.broadcast %cst_19 : f32 to vector<224x168xf32>
    %34 = arith.maximumf %32, %33 : vector<224x168xf32>
    %35 = vector.shape_cast %34 : vector<224x168xf32> to vector<14x16x168xf32>
    %36 = vector.extract_strided_slice %35 {offsets = [0, 0, 0], sizes = [14, 8, 168], strides = [1, 1, 1]} : vector<14x16x168xf32> to vector<14x8x168xf32>
    %37 = vector.extract_strided_slice %35 {offsets = [0, 8, 0], sizes = [14, 8, 168], strides = [1, 1, 1]} : vector<14x16x168xf32> to vector<14x8x168xf32>
    %38 = arith.maximumf %36, %37 : vector<14x8x168xf32>
    %39 = vector.shape_cast %38 : vector<14x8x168xf32> to vector<112x168xf32>
    %c0_20 = arith.constant 0 : index
    %c0_21 = arith.constant 0 : index
    %40 = vector.load %arg4[%c0_20, %c0_21] : memref<168x84xf32, #tpu.memory_space<vmem>>, vector<168x84xf32>
    %cst_22 = arith.constant dense<0.000000e+00> : vector<112x84xf32>
    %41 = tpu.matmul %39, %40, %cst_22 {dimension_numbers = #tpu.dot_dimension_numbers<[1], [0], [0], [1], [0, 0, 1, 1], [], []>} : vector<112x168xf32>, vector<168x84xf32>, vector<112x84xf32> -> vector<112x84xf32>
    %c0_23 = arith.constant 0 : index
    %c0_24 = arith.constant 0 : index
    %42 = vector.load %arg5[%c0_23, %c0_24] : memref<168x84xf32, #tpu.memory_space<vmem>>, vector<168x84xf32>
    %cst_25 = arith.constant dense<0.000000e+00> : vector<112x84xf32>
    %43 = tpu.matmul %39, %42, %cst_25 {dimension_numbers = #tpu.dot_dimension_numbers<[1], [0], [0], [1], [0, 0, 1, 1], [], []>} : vector<112x168xf32>, vector<168x84xf32>, vector<112x84xf32> -> vector<112x84xf32>
    %44 = arith.maximumf %41, %43 : vector<112x84xf32>
    %45 = vector.extract_strided_slice %44 {offsets = [0, 0], sizes = [80, 84], strides = [1, 1]} : vector<112x84xf32> to vector<80x84xf32>
    %c0_26 = arith.constant 0 : index
    %c0_27 = arith.constant 0 : index
    %c0_28 = arith.constant 0 : index
    %46 = vector.load %arg6[%c0_26, %c0_27, %c0_28] : memref<5x84x160xf32, #tpu.memory_space<vmem>>, vector<1x84x160xf32>
    %47 = vector.shape_cast %46 : vector<1x84x160xf32> to vector<84x160xf32>
    %cst_29 = arith.constant dense<0.000000e+00> : vector<80x160xf32>
    %48 = tpu.matmul %45, %47, %cst_29 {dimension_numbers = #tpu.dot_dimension_numbers<[1], [0], [0], [1], [0, 0, 1, 1], [], []>} : vector<80x84xf32>, vector<84x160xf32>, vector<80x160xf32> -> vector<80x160xf32>
    %49 = vector.extract_strided_slice %44 {offsets = [8, 0], sizes = [80, 84], strides = [1, 1]} : vector<112x84xf32> to vector<80x84xf32>
    %c1_30 = arith.constant 1 : index
    %c0_31 = arith.constant 0 : index
    %c0_32 = arith.constant 0 : index
    %50 = vector.load %arg6[%c1_30, %c0_31, %c0_32] : memref<5x84x160xf32, #tpu.memory_space<vmem>>, vector<1x84x160xf32>
    %51 = vector.shape_cast %50 : vector<1x84x160xf32> to vector<84x160xf32>
    %cst_33 = arith.constant dense<0.000000e+00> : vector<80x160xf32>
    %52 = tpu.matmul %49, %51, %cst_33 {dimension_numbers = #tpu.dot_dimension_numbers<[1], [0], [0], [1], [0, 0, 1, 1], [], []>} : vector<80x84xf32>, vector<84x160xf32>, vector<80x160xf32> -> vector<80x160xf32>
    %53 = arith.addf %48, %52 : vector<80x160xf32>
    %54 = vector.extract_strided_slice %44 {offsets = [16, 0], sizes = [80, 84], strides = [1, 1]} : vector<112x84xf32> to vector<80x84xf32>
    %c2_34 = arith.constant 2 : index
    %c0_35 = arith.constant 0 : index
    %c0_36 = arith.constant 0 : index
    %55 = vector.load %arg6[%c2_34, %c0_35, %c0_36] : memref<5x84x160xf32, #tpu.memory_space<vmem>>, vector<1x84x160xf32>
    %56 = vector.shape_cast %55 : vector<1x84x160xf32> to vector<84x160xf32>
    %cst_37 = arith.constant dense<0.000000e+00> : vector<80x160xf32>
    %57 = tpu.matmul %54, %56, %cst_37 {dimension_numbers = #tpu.dot_dimension_numbers<[1], [0], [0], [1], [0, 0, 1, 1], [], []>} : vector<80x84xf32>, vector<84x160xf32>, vector<80x160xf32> -> vector<80x160xf32>
    %58 = arith.addf %53, %57 : vector<80x160xf32>
    %59 = vector.extract_strided_slice %44 {offsets = [24, 0], sizes = [80, 84], strides = [1, 1]} : vector<112x84xf32> to vector<80x84xf32>
    %c3_38 = arith.constant 3 : index
    %c0_39 = arith.constant 0 : index
    %c0_40 = arith.constant 0 : index
    %60 = vector.load %arg6[%c3_38, %c0_39, %c0_40] : memref<5x84x160xf32, #tpu.memory_space<vmem>>, vector<1x84x160xf32>
    %61 = vector.shape_cast %60 : vector<1x84x160xf32> to vector<84x160xf32>
    %cst_41 = arith.constant dense<0.000000e+00> : vector<80x160xf32>
    %62 = tpu.matmul %59, %61, %cst_41 {dimension_numbers = #tpu.dot_dimension_numbers<[1], [0], [0], [1], [0, 0, 1, 1], [], []>} : vector<80x84xf32>, vector<84x160xf32>, vector<80x160xf32> -> vector<80x160xf32>
    %63 = arith.addf %58, %62 : vector<80x160xf32>
    %64 = vector.extract_strided_slice %44 {offsets = [32, 0], sizes = [80, 84], strides = [1, 1]} : vector<112x84xf32> to vector<80x84xf32>
    %c4_42 = arith.constant 4 : index
    %c0_43 = arith.constant 0 : index
    %c0_44 = arith.constant 0 : index
    %65 = vector.load %arg6[%c4_42, %c0_43, %c0_44] : memref<5x84x160xf32, #tpu.memory_space<vmem>>, vector<1x84x160xf32>
    %66 = vector.shape_cast %65 : vector<1x84x160xf32> to vector<84x160xf32>
    %cst_45 = arith.constant dense<0.000000e+00> : vector<80x160xf32>
    %67 = tpu.matmul %64, %66, %cst_45 {dimension_numbers = #tpu.dot_dimension_numbers<[1], [0], [0], [1], [0, 0, 1, 1], [], []>} : vector<80x84xf32>, vector<84x160xf32>, vector<80x160xf32> -> vector<80x160xf32>
    %68 = arith.addf %63, %67 : vector<80x160xf32>
    %c0_46 = arith.constant 0 : index
    %c0_47 = arith.constant 0 : index
    %69 = vector.load %arg7[%c0_46, %c0_47] : memref<1x160xf32, #tpu.memory_space<vmem>>, vector<1x160xf32>
    %70 = vector.broadcast %69 : vector<1x160xf32> to vector<80x160xf32>
    %71 = arith.addf %68, %70 : vector<80x160xf32>
    %cst_48 = arith.constant 0.000000e+00 : f32
    %72 = vector.broadcast %cst_48 : f32 to vector<80x160xf32>
    %73 = arith.maximumf %71, %72 : vector<80x160xf32>
    %74 = vector.shape_cast %73 : vector<80x160xf32> to vector<5x16x160xf32>
    %75 = vector.extract_strided_slice %74 {offsets = [0, 0, 0], sizes = [5, 8, 160], strides = [1, 1, 1]} : vector<5x16x160xf32> to vector<5x8x160xf32>
    %76 = vector.extract_strided_slice %74 {offsets = [0, 8, 0], sizes = [5, 8, 160], strides = [1, 1, 1]} : vector<5x16x160xf32> to vector<5x8x160xf32>
    %77 = arith.maximumf %75, %76 : vector<5x8x160xf32>
    %78 = vector.shape_cast %77 : vector<5x8x160xf32> to vector<40x160xf32>
    %c0_49 = arith.constant 0 : index
    %c0_50 = arith.constant 0 : index
    %79 = vector.load %arg8[%c0_49, %c0_50] : memref<160x80xf32, #tpu.memory_space<vmem>>, vector<160x80xf32>
    %cst_51 = arith.constant dense<0.000000e+00> : vector<40x80xf32>
    %80 = tpu.matmul %78, %79, %cst_51 {dimension_numbers = #tpu.dot_dimension_numbers<[1], [0], [0], [1], [0, 0, 1, 1], [], []>} : vector<40x160xf32>, vector<160x80xf32>, vector<40x80xf32> -> vector<40x80xf32>
    %c0_52 = arith.constant 0 : index
    %c0_53 = arith.constant 0 : index
    %81 = vector.load %arg9[%c0_52, %c0_53] : memref<160x80xf32, #tpu.memory_space<vmem>>, vector<160x80xf32>
    %cst_54 = arith.constant dense<0.000000e+00> : vector<40x80xf32>
    %82 = tpu.matmul %78, %81, %cst_54 {dimension_numbers = #tpu.dot_dimension_numbers<[1], [0], [0], [1], [0, 0, 1, 1], [], []>} : vector<40x160xf32>, vector<160x80xf32>, vector<40x80xf32> -> vector<40x80xf32>
    %83 = arith.maximumf %80, %82 : vector<40x80xf32>
    %84 = vector.extract_strided_slice %83 {offsets = [0, 0], sizes = [8, 80], strides = [1, 1]} : vector<40x80xf32> to vector<8x80xf32>
    %c0_55 = arith.constant 0 : index
    %c0_56 = arith.constant 0 : index
    %c0_57 = arith.constant 0 : index
    %85 = vector.load %arg10[%c0_55, %c0_56, %c0_57] : memref<5x80x120xf32, #tpu.memory_space<vmem>>, vector<1x80x120xf32>
    %86 = vector.shape_cast %85 : vector<1x80x120xf32> to vector<80x120xf32>
    %cst_58 = arith.constant dense<0.000000e+00> : vector<8x120xf32>
    %87 = tpu.matmul %84, %86, %cst_58 {dimension_numbers = #tpu.dot_dimension_numbers<[1], [0], [0], [1], [0, 0, 1, 1], [], []>} : vector<8x80xf32>, vector<80x120xf32>, vector<8x120xf32> -> vector<8x120xf32>
    %88 = vector.extract_strided_slice %83 {offsets = [8, 0], sizes = [8, 80], strides = [1, 1]} : vector<40x80xf32> to vector<8x80xf32>
    %c1_59 = arith.constant 1 : index
    %c0_60 = arith.constant 0 : index
    %c0_61 = arith.constant 0 : index
    %89 = vector.load %arg10[%c1_59, %c0_60, %c0_61] : memref<5x80x120xf32, #tpu.memory_space<vmem>>, vector<1x80x120xf32>
    %90 = vector.shape_cast %89 : vector<1x80x120xf32> to vector<80x120xf32>
    %cst_62 = arith.constant dense<0.000000e+00> : vector<8x120xf32>
    %91 = tpu.matmul %88, %90, %cst_62 {dimension_numbers = #tpu.dot_dimension_numbers<[1], [0], [0], [1], [0, 0, 1, 1], [], []>} : vector<8x80xf32>, vector<80x120xf32>, vector<8x120xf32> -> vector<8x120xf32>
    %92 = arith.addf %87, %91 : vector<8x120xf32>
    %93 = vector.extract_strided_slice %83 {offsets = [16, 0], sizes = [8, 80], strides = [1, 1]} : vector<40x80xf32> to vector<8x80xf32>
    %c2_63 = arith.constant 2 : index
    %c0_64 = arith.constant 0 : index
    %c0_65 = arith.constant 0 : index
    %94 = vector.load %arg10[%c2_63, %c0_64, %c0_65] : memref<5x80x120xf32, #tpu.memory_space<vmem>>, vector<1x80x120xf32>
    %95 = vector.shape_cast %94 : vector<1x80x120xf32> to vector<80x120xf32>
    %cst_66 = arith.constant dense<0.000000e+00> : vector<8x120xf32>
    %96 = tpu.matmul %93, %95, %cst_66 {dimension_numbers = #tpu.dot_dimension_numbers<[1], [0], [0], [1], [0, 0, 1, 1], [], []>} : vector<8x80xf32>, vector<80x120xf32>, vector<8x120xf32> -> vector<8x120xf32>
    %97 = arith.addf %92, %96 : vector<8x120xf32>
    %98 = vector.extract_strided_slice %83 {offsets = [24, 0], sizes = [8, 80], strides = [1, 1]} : vector<40x80xf32> to vector<8x80xf32>
    %c3_67 = arith.constant 3 : index
    %c0_68 = arith.constant 0 : index
    %c0_69 = arith.constant 0 : index
    %99 = vector.load %arg10[%c3_67, %c0_68, %c0_69] : memref<5x80x120xf32, #tpu.memory_space<vmem>>, vector<1x80x120xf32>
    %100 = vector.shape_cast %99 : vector<1x80x120xf32> to vector<80x120xf32>
    %cst_70 = arith.constant dense<0.000000e+00> : vector<8x120xf32>
    %101 = tpu.matmul %98, %100, %cst_70 {dimension_numbers = #tpu.dot_dimension_numbers<[1], [0], [0], [1], [0, 0, 1, 1], [], []>} : vector<8x80xf32>, vector<80x120xf32>, vector<8x120xf32> -> vector<8x120xf32>
    %102 = arith.addf %97, %101 : vector<8x120xf32>
    %103 = vector.extract_strided_slice %83 {offsets = [32, 0], sizes = [8, 80], strides = [1, 1]} : vector<40x80xf32> to vector<8x80xf32>
    %c4_71 = arith.constant 4 : index
    %c0_72 = arith.constant 0 : index
    %c0_73 = arith.constant 0 : index
    %104 = vector.load %arg10[%c4_71, %c0_72, %c0_73] : memref<5x80x120xf32, #tpu.memory_space<vmem>>, vector<1x80x120xf32>
    %105 = vector.shape_cast %104 : vector<1x80x120xf32> to vector<80x120xf32>
    %cst_74 = arith.constant dense<0.000000e+00> : vector<8x120xf32>
    %106 = tpu.matmul %103, %105, %cst_74 {dimension_numbers = #tpu.dot_dimension_numbers<[1], [0], [0], [1], [0, 0, 1, 1], [], []>} : vector<8x80xf32>, vector<80x120xf32>, vector<8x120xf32> -> vector<8x120xf32>
    %107 = arith.addf %102, %106 : vector<8x120xf32>
    %c0_75 = arith.constant 0 : index
    %c0_76 = arith.constant 0 : index
    %108 = vector.load %arg11[%c0_75, %c0_76] : memref<1x120xf32, #tpu.memory_space<vmem>>, vector<1x120xf32>
    %109 = vector.broadcast %108 : vector<1x120xf32> to vector<8x120xf32>
    %110 = arith.addf %107, %109 : vector<8x120xf32>
    %cst_77 = arith.constant 0.000000e+00 : f32
    %111 = vector.broadcast %cst_77 : f32 to vector<8x120xf32>
    %112 = arith.maximumf %110, %111 : vector<8x120xf32>
    %c0_78 = arith.constant 0 : index
    %c0_79 = arith.constant 0 : index
    %113 = vector.load %arg12[%c0_78, %c0_79] : memref<120x84xf32, #tpu.memory_space<vmem>>, vector<120x84xf32>
    %cst_80 = arith.constant dense<0.000000e+00> : vector<8x84xf32>
    %114 = tpu.matmul %112, %113, %cst_80 {dimension_numbers = #tpu.dot_dimension_numbers<[1], [0], [0], [1], [0, 0, 1, 1], [], []>} : vector<8x120xf32>, vector<120x84xf32>, vector<8x84xf32> -> vector<8x84xf32>
    %c0_81 = arith.constant 0 : index
    %c0_82 = arith.constant 0 : index
    %115 = vector.load %arg13[%c0_81, %c0_82] : memref<1x84xf32, #tpu.memory_space<vmem>>, vector<1x84xf32>
    %116 = vector.broadcast %115 : vector<1x84xf32> to vector<8x84xf32>
    %117 = arith.addf %114, %116 : vector<8x84xf32>
    %cst_83 = arith.constant 0.000000e+00 : f32
    %118 = vector.broadcast %cst_83 : f32 to vector<8x84xf32>
    %119 = arith.maximumf %117, %118 : vector<8x84xf32>
    %c0_84 = arith.constant 0 : index
    %c0_85 = arith.constant 0 : index
    %120 = vector.load %arg14[%c0_84, %c0_85] : memref<84x128xf32, #tpu.memory_space<vmem>>, vector<84x128xf32>
    %cst_86 = arith.constant dense<0.000000e+00> : vector<8x128xf32>
    %121 = tpu.matmul %119, %120, %cst_86 {dimension_numbers = #tpu.dot_dimension_numbers<[1], [0], [0], [1], [0, 0, 1, 1], [], []>} : vector<8x84xf32>, vector<84x128xf32>, vector<8x128xf32> -> vector<8x128xf32>
    %c0_87 = arith.constant 0 : index
    %c0_88 = arith.constant 0 : index
    %122 = vector.load %arg15[%c0_87, %c0_88] : memref<1x128xf32, #tpu.memory_space<vmem>>, vector<1x128xf32>
    %123 = vector.broadcast %122 : vector<1x128xf32> to vector<8x128xf32>
    %124 = arith.addf %121, %123 : vector<8x128xf32>
    %c0_89 = arith.constant 0 : index
    %c0_90 = arith.constant 0 : index
    %125 = vector.load %arg16[%c0_89, %c0_90] : memref<8x128xf32, #tpu.memory_space<vmem>>, vector<8x128xf32>
    tpu.vector_store %arg16[%c0_89, %c0_90], %124 {strides = array<i32>} : memref<8x128xf32, #tpu.memory_space<vmem>>, vector<8x128xf32>,
    return
  }
  func.func @transform_0(%arg0: i32) -> (i32, i32, i32) {
    %c0_i32 = arith.constant 0 : i32
    %c0_i32_0 = arith.constant 0 : i32
    %c0_i32_1 = arith.constant 0 : i32
    return %c0_i32, %arg0, %c0_i32_0 : i32, i32, i32
  }
  func.func @transform_1(%arg0: i32) -> (i32, i32, i32) {
    %c0_i32 = arith.constant 0 : i32
    %c0_i32_0 = arith.constant 0 : i32
    %c0_i32_1 = arith.constant 0 : i32
    %c0_i32_2 = arith.constant 0 : i32
    return %c0_i32, %c0_i32_0, %c0_i32_1 : i32, i32, i32
  }
  func.func @transform_2(%arg0: i32) -> (i32, i32) {
    %c0_i32 = arith.constant 0 : i32
    %c0_i32_0 = arith.constant 0 : i32
    %c0_i32_1 = arith.constant 0 : i32
    return %c0_i32, %c0_i32_0 : i32, i32
  }
  func.func @transform_3(%arg0: i32) -> (i32, i32) {
    %c0_i32 = arith.constant 0 : i32
    %c0_i32_0 = arith.constant 0 : i32
    %c0_i32_1 = arith.constant 0 : i32
    return %c0_i32, %c0_i32_0 : i32, i32
  }
  func.func @transform_4(%arg0: i32) -> (i32, i32) {
    %c0_i32 = arith.constant 0 : i32
    %c0_i32_0 = arith.constant 0 : i32
    %c0_i32_1 = arith.constant 0 : i32
    return %c0_i32, %c0_i32_0 : i32, i32
  }
  func.func @transform_5(%arg0: i32) -> (i32, i32, i32) {
    %c0_i32 = arith.constant 0 : i32
    %c0_i32_0 = arith.constant 0 : i32
    %c0_i32_1 = arith.constant 0 : i32
    %c0_i32_2 = arith.constant 0 : i32
    return %c0_i32, %c0_i32_0, %c0_i32_1 : i32, i32, i32
  }
  func.func @transform_6(%arg0: i32) -> (i32, i32) {
    %c0_i32 = arith.constant 0 : i32
    %c0_i32_0 = arith.constant 0 : i32
    %c0_i32_1 = arith.constant 0 : i32
    return %c0_i32, %c0_i32_0 : i32, i32
  }
  func.func @transform_7(%arg0: i32) -> (i32, i32) {
    %c0_i32 = arith.constant 0 : i32
    %c0_i32_0 = arith.constant 0 : i32
    %c0_i32_1 = arith.constant 0 : i32
    return %c0_i32, %c0_i32_0 : i32, i32
  }
  func.func @transform_8(%arg0: i32) -> (i32, i32) {
    %c0_i32 = arith.constant 0 : i32
    %c0_i32_0 = arith.constant 0 : i32
    %c0_i32_1 = arith.constant 0 : i32
    return %c0_i32, %c0_i32_0 : i32, i32
  }
  func.func @transform_9(%arg0: i32) -> (i32, i32, i32) {
    %c0_i32 = arith.constant 0 : i32
    %c0_i32_0 = arith.constant 0 : i32
    %c0_i32_1 = arith.constant 0 : i32
    %c0_i32_2 = arith.constant 0 : i32
    return %c0_i32, %c0_i32_0, %c0_i32_1 : i32, i32, i32
  }
  func.func @transform_10(%arg0: i32) -> (i32, i32) {
    %c0_i32 = arith.constant 0 : i32
    %c0_i32_0 = arith.constant 0 : i32
    %c0_i32_1 = arith.constant 0 : i32
    return %c0_i32, %c0_i32_0 : i32, i32
  }
  func.func @transform_11(%arg0: i32) -> (i32, i32) {
    %c0_i32 = arith.constant 0 : i32
    %c0_i32_0 = arith.constant 0 : i32
    %c0_i32_1 = arith.constant 0 : i32
    return %c0_i32, %c0_i32_0 : i32, i32
  }
  func.func @transform_12(%arg0: i32) -> (i32, i32) {
    %c0_i32 = arith.constant 0 : i32
    %c0_i32_0 = arith.constant 0 : i32
    %c0_i32_1 = arith.constant 0 : i32
    return %c0_i32, %c0_i32_0 : i32, i32
  }
  func.func @transform_13(%arg0: i32) -> (i32, i32) {
    %c0_i32 = arith.constant 0 : i32
    %c0_i32_0 = arith.constant 0 : i32
    %c0_i32_1 = arith.constant 0 : i32
    return %c0_i32, %c0_i32_0 : i32, i32
  }
  func.func @transform_14(%arg0: i32) -> (i32, i32) {
    %c0_i32 = arith.constant 0 : i32
    %c0_i32_0 = arith.constant 0 : i32
    %c0_i32_1 = arith.constant 0 : i32
    return %c0_i32, %c0_i32_0 : i32, i32
  }
  func.func @transform_15(%arg0: i32) -> (i32, i32) {
    %c0_i32 = arith.constant 0 : i32
    %c0_i32_0 = arith.constant 0 : i32
    return %arg0, %c0_i32 : i32, i32
  }
}

</mosaic_0001>

<bundles_post_ra>
// kernel: tile.13
= control target key start
LH: loop header
LB: loop body
LE: loop exit
PB: predicated region body
PF: predicated region fallthrough
CT: control target
= control target key end

     0   :  { %s40_s0 = inlined_call_operand.vmem [shape: f32[6], index: 0, kind: input, shape index: {}]   ;;  %s41_s1 = inlined_call_operand.vmem [shape: f32[28,6], index: 1, kind: output, shape index: {}]  }
   0x1   :  { %v4_v0 = vld [vmem:[%s40_s0] ss:$0 sm:$0xff] }
   0x2   :  { %5 = vst [vmem:[%s41_s1] sm:$0xff] %v4_v0 }
   0x3   :  { %12 = vst [vmem:[%s41_s1 + $0x8] sm:$0xff] %v4_v0 }
   0x4   :  { %13 = vst [vmem:[%s41_s1 + $0x10] sm:$0xff] %v4_v0 }
   0x5   :  { %14 = vst [vmem:[%s41_s1 + $0x18] sm:$0xff] %v4_v0 }

// kernel: tile.14
= control target key start
LH: loop header
LB: loop body
LE: loop exit
PB: predicated region body
PF: predicated region fallthrough
CT: control target
= control target key end

     0   :  { %vm9_vm0 = vcmask 15360   ;;  %s248_s12 = smov 126   ;;  %s249_s13 = smov 114   ;;  %vm3_vm1 = vcmask 48128   ;;  %vm13_vm2 = vcmask 31744   ;;  %vm16_vm3 = vcmask 1048560   ;;  %s378_s0 = inlined_call_operand.vmem [shape: f32[28,6], index: 0, kind: input, shape index: {}]   ;;  %s379_s1 = inlined_call_operand.vmem [shape: f32[1,168], index: 1, kind: output, shape index: {}]  }
   0x1   :  { %v192_v0 = vld [vmem:[%s378_s0 + $0x15] sm:$0x1]   ;;  %v195_v3 = vld [vmem:[%s378_s0 + $0x13] sm:$0x1]   ;;  %v197_v4 = vld [vmem:[%s378_s0 + $0x11] sm:$0x1]  }
   0x2   :  { %v193_v1 = vld [vmem:[%s378_s0 + $0x15] sm:$0x1]   ;;  %26 = vrot.lane.b32.xlu1 %v195_v3, %s249_s13  ;;  %s250_s16 = smov 102   ;;  %v194_v5 = vld [vmem:[%s378_s0 + $0x14] sm:$0x1]   ;;  %s251_s21 = smov 120  }
   0x3   :  { %v10_v2 = vsel %vm9_vm0, %v193_v1, %v192_v0  ;;  %38 = vrot.lane.b32.xlu2 %v197_v4, %s250_s16  ;;  %v196_v6 = vld [vmem:[%s378_s0 + $0x12] sm:$0x1]   ;;  %s252_s22 = smov 108   ;;  %v198_v7 = vld [vmem:[%s378_s0 + $0x10] sm:$0x1]   ;;  %s253_s25 = smov 96  }
   0x4   :  { %11 = vrot.lane.b32.xlu0 %v10_v2, %s248_s12  ;;  %v199_v8 = vld [vmem:[%s378_s0 + $0xf] sm:$0x1]   ;;  %v200_v9 = vld [vmem:[%s378_s0 + $0xe] sm:$0x1]   ;;  %s254_s30 = smov 90   ;;  %s255_s2 = smov 84  }
   0x5   :  { %v201_v10 = vld [vmem:[%s378_s0 + $0xd] sm:$0x1]   ;;  %s256_s5 = smov 78   ;;  %v202_v11 = vld [vmem:[%s378_s0 + $0xc] sm:$0x1]   ;;  %s257_s10 = smov 72  }
   0x6   :  { %v203_v12 = vld [vmem:[%s378_s0 + $0xb] sm:$0x1]   ;;  %s258_s11 = smov 66   ;;  %v204_v13 = vld [vmem:[%s378_s0 + $0xa] sm:$0x1]   ;;  %s259_s14 = smov 60  }
   0x7   :  { %v205_v14 = vld [vmem:[%s378_s0 + $0x9] sm:$0x1]   ;;  %v206_v15 = vld [vmem:[%s378_s0 + $0x8] sm:$0x1]   ;;  %s260_s19 = smov 54   ;;  %s261_s20 = smov 48  }
   0x8   :  { %v207_v16 = vld [vmem:[%s378_s0 + $0x7] sm:$0x1]   ;;  %s262_s23 = smov 42   ;;  %v208_v17 = vld [vmem:[%s378_s0 + $0x6] sm:$0x1]   ;;  %s263_s28 = smov 36  }
   0x9   :  { %v209_v18 = vld [vmem:[%s378_s0 + $0x1b] sm:$0x1]   ;;  %s264_s29 = smov 34   ;;  %v210_v19 = vld [vmem:[%s378_s0 + $0x5] sm:$0x1]   ;;  %s265_s3 = smov 30  }
   0xa   :  { %32 = vrot.lane.b32.xlu1 %v196_v6, %s252_s22  ;;  %v211_v20 = vld [vmem:[%s378_s0 + $0x1a] sm:$0x1]   ;;  %v212_v21 = vld [vmem:[%s378_s0 + $0x4] sm:$0x1]   ;;  %s266_s8 = smov 28   ;;  %s267_s9 = smov 24  }
   0xb   :  { %44 = vrot.lane.b32.xlu2 %v198_v7, %s253_s25  ;;  %v213_v22 = vld [vmem:[%s378_s0 + $0x19] sm:$0x1]   ;;  %s268_s12 = smov 22   ;;  %v214_v23 = vld [vmem:[%s378_s0 + $0x3] sm:$0x1]   ;;  %s269_s17 = smov 18  }
   0xc   :  { %20 = vrot.lane.b32.xlu0 %v194_v5, %s251_s21  ;;  %v215_v24 = vld [vmem:[%s378_s0 + $0x18] sm:$0x1]   ;;  %s270_s18 = smov 16   ;;  %v216_v25 = vld [vmem:[%s378_s0 + $0x2] sm:$0x1]   ;;  %s271_s21 = smov 12  }
   0xd   :  { %v217_v26 = vld [vmem:[%s378_s0 + $0x17] sm:$0x1]   ;;  %v218_v27 = vld [vmem:[%s378_s0 + $0x1] sm:$0x1]   ;;  %s272_s26 = smov 10   ;;  %s273_s27 = smov 6  }
   0xe   :  { %v219_v28 = vld [vmem:[%s378_s0 + $0x16] sm:$0x1]   ;;  %v2_v29 = vld [vmem:[%s378_s0] sm:$0x1]   ;;  %vm22_vm4 = vcmask 1032128   ;;  %vm28_vm5 = vcmask 982928  }
   0xf   :  { %4 = vst.msk [vmem:[#allocation0] sm:$0x1] %vm3_vm1, %v2_v29   ;;  %vm34_vm6 = vcmask 933728   ;;  %vm40_vm7 = vcmask 884528   ;;  %vm46_vm8 = vcmask 835328   ;;  %vm52_vm9 = vcmask 786128  }
  0x10   :  { %vm58_vm10 = vcmask 736928   ;;  %vm64_vm11 = vcmask 687728   ;;  %vm70_vm12 = vcmask 638528   ;;  %vm76_vm13 = vcmask 589328  }
  0x11   :  { %vm82_vm14 = vcmask 540128   ;;  %vm88_vm15 = vcmask 490928   ;;  %vm94_vm0 = vcmask 441728   ;;  %vm100_vm1 = vcmask 392528  }
  0x12   :  { %56 = vrot.lane.b32.xlu1 %v200_v9, %s255_s2 }
  0x13   :  { %62 = vrot.lane.b32.xlu2 %v201_v10, %s256_s5 }
  0x14   :  { %50 = vrot.lane.b32.xlu0 %v199_v8, %s254_s30  ;;  %s274_s30 = smov 4  }
  0x1a   :  { %74 = vrot.lane.b32.xlu1 %v203_v12, %s258_s11 }
  0x1b   :  { %80 = vrot.lane.b32.xlu2 %v204_v13, %s259_s14 }
  0x1c   :  { %68 = vrot.lane.b32.xlu0 %v202_v11, %s257_s10 }
  0x22   :  { %92 = vrot.lane.b32.xlu1 %v206_v15, %s261_s20 }
  0x23   :  { %98 = vrot.lane.b32.xlu2 %v207_v16, %s262_s23 }
  0x24   :  { %86 = vrot.lane.b32.xlu0 %v205_v14, %s260_s19 }
  0x2a   :  { %110 = vrot.lane.b32.xlu1 %v209_v18, %s264_s29 }
  0x2b   :  { %117 = vrot.lane.b32.xlu2 %v210_v19, %s265_s3 }
  0x2c   :  { %104 = vrot.lane.b32.xlu0 %v208_v17, %s263_s28 }
  0x32   :  { %130 = vrot.lane.b32.xlu1 %v212_v21, %s267_s9 }
  0x33   :  { %136 = vrot.lane.b32.xlu2 %v213_v22, %s268_s12 }
  0x34   :  { %123 = vrot.lane.b32.xlu0 %v211_v20, %s266_s8 }
  0x3a   :  { %149 = vrot.lane.b32.xlu1 %v215_v24, %s270_s18 }
  0x3b   :  { %156 = vrot.lane.b32.xlu2 %v216_v25, %s271_s21 }
  0x3c   :  { %143 = vrot.lane.b32.xlu0 %v214_v23, %s269_s17 }
  0x42   :  { %169 = vrot.lane.b32.xlu1 %v218_v27, %s273_s27 }
  0x43   :  { %175 = vrot.lane.b32.xlu2 %v219_v28, %s274_s30 }
  0x44   :  { %162 = vrot.lane.b32.xlu0 %v217_v26, %s272_s26 }
  0x5d   :  { %v39_v30 = vpop.permute.xlu2 %38  }
  0x65   :  { %v45_v31 = vpop.permute.xlu2 %44  }
  0x6d   :  { %v63_v32 = vpop.permute.xlu2 %62  }
  0x74   :  { %v27_v34 = vpop.permute.xlu1 %26  }
  0x75   :  { %v81_v35 = vpop.permute.xlu2 %80  }
  0x76   :  { %v12_v33 = vpop.permute.xlu0 %11  }
  0x77   :  { %15 = vst.msk [vmem:[#allocation0 + $0x8] sm:$0x1] %vm13_vm2, %v12_v33   ;;  %vm106_vm2 = vcmask 343328  }
  0x78   :  { %17 = vst.msk [vmem:[#allocation0] sm:$0x1] %vm16_vm3, %v12_v33   ;;  %vm119_vm3 = vcmask 294128  }
  0x7c   :  { %v33_v37 = vpop.permute.xlu1 %32  }
  0x7d   :  { %v99_v38 = vpop.permute.xlu2 %98  }
  0x7e   :  { %v21_v36 = vpop.permute.xlu0 %20  }
  0x7f   :  { %23 = vst.msk [vmem:[#allocation0] sm:$0x1] %vm22_vm4, %v21_v36   ;;  %vm112_vm4 = vcmask 326928  }
  0x80   :  { %29 = vst.msk [vmem:[#allocation0] sm:$0x1] %vm28_vm5, %v27_v34   ;;  %vm125_vm5 = vcmask 277728  }
  0x81   :  { %35 = vst.msk [vmem:[#allocation0] sm:$0x1] %vm34_vm6, %v33_v37   ;;  %vm138_vm6 = vcmask 228528  }
  0x82   :  { %41 = vst.msk [vmem:[#allocation0] sm:$0x1] %vm40_vm7, %v39_v30   ;;  %vm132_vm7 = vcmask 244928  }
  0x83   :  { %47 = vst.msk [vmem:[#allocation0] sm:$0x1] %vm46_vm8, %v45_v31   ;;  %vm145_vm8 = vcmask 195728  }
  0x84   :  { %v57_v40 = vpop.permute.xlu1 %56  }
  0x85   :  { %v118_v41 = vpop.permute.xlu2 %117  }
  0x86   :  { %v51_v39 = vpop.permute.xlu0 %50  }
  0x87   :  { %53 = vst.msk [vmem:[#allocation0] sm:$0x1] %vm52_vm9, %v51_v39   ;;  %vm158_vm9 = vcmask 146528  }
  0x88   :  { %59 = vst.msk [vmem:[#allocation0] sm:$0x1] %vm58_vm10, %v57_v40   ;;  %vm151_vm10 = vcmask 179328  }
  0x89   :  { %65 = vst.msk [vmem:[#allocation0] sm:$0x1] %vm64_vm11, %v63_v32   ;;  %vm164_vm11 = vcmask 130128  }
  0x8c   :  { %v75_v43 = vpop.permute.xlu1 %74  }
  0x8d   :  { %v137_v44 = vpop.permute.xlu2 %136  }
  0x8e   :  { %v69_v42 = vpop.permute.xlu0 %68  }
  0x8f   :  { %71 = vst.msk [vmem:[#allocation0] sm:$0x1] %vm70_vm12, %v69_v42   ;;  %vm177_vm12 = vcmask 80928  }
  0x90   :  { %77 = vst.msk [vmem:[#allocation0] sm:$0x1] %vm76_vm13, %v75_v43   ;;  %vm171_vm13 = vcmask 97328  }
  0x91   :  { %83 = vst.msk [vmem:[#allocation0] sm:$0x1] %vm82_vm14, %v81_v35  }
  0x94   :  { %v93_v46 = vpop.permute.xlu1 %92  }
  0x95   :  { %v157_v47 = vpop.permute.xlu2 %156  }
  0x96   :  { %v87_v45 = vpop.permute.xlu0 %86  }
  0x97   :  { %89 = vst.msk [vmem:[#allocation0] sm:$0x1] %vm88_vm15, %v87_v45  }
  0x98   :  { %95 = vst.msk [vmem:[#allocation0] sm:$0x1] %vm94_vm0, %v93_v46  }
  0x99   :  { %101 = vst.msk [vmem:[#allocation0] sm:$0x1] %vm100_vm1, %v99_v38  }
  0x9c   :  { %v111_v49 = vpop.permute.xlu1 %110  }
  0x9d   :  { %114 = vst.msk [vmem:[#allocation0 + $0x8] sm:$0x1] %vm112_vm4, %v111_v49   ;;  %v176_v50 = vpop.permute.xlu2 %175  }
  0x9e   :  { %v105_v48 = vpop.permute.xlu0 %104  }
  0x9f   :  { %107 = vst.msk [vmem:[#allocation0] sm:$0x1] %vm106_vm2, %v105_v48  }
  0xa0   :  { %120 = vst.msk [vmem:[#allocation0] sm:$0x1] %vm119_vm3, %v118_v41  }
  0xa4   :  { %v131_v52 = vpop.permute.xlu1 %130  }
  0xa5   :  { %133 = vst.msk [vmem:[#allocation0] sm:$0x1] %vm132_vm7, %v131_v52  }
  0xa6   :  { %v124_v51 = vpop.permute.xlu0 %123  }
  0xa7   :  { %127 = vst.msk [vmem:[#allocation0 + $0x8] sm:$0x1] %vm125_vm5, %v124_v51  }
  0xa8   :  { %140 = vst.msk [vmem:[#allocation0 + $0x8] sm:$0x1] %vm138_vm6, %v137_v44  }
  0xac   :  { %v150_v54 = vpop.permute.xlu1 %149  }
  0xad   :  { %153 = vst.msk [vmem:[#allocation0 + $0x8] sm:$0x1] %vm151_vm10, %v150_v54  }
  0xae   :  { %v144_v53 = vpop.permute.xlu0 %143  }
  0xaf   :  { %146 = vst.msk [vmem:[#allocation0] sm:$0x1] %vm145_vm8, %v144_v53  }
  0xb0   :  { %159 = vst.msk [vmem:[#allocation0] sm:$0x1] %vm158_vm9, %v157_v47  }
  0xb4   :  { %v170_v56 = vpop.permute.xlu1 %169  }
  0xb5   :  { %172 = vst.msk [vmem:[#allocation0] sm:$0x1] %vm171_vm13, %v170_v56  }
  0xb6   :  { %v163_v55 = vpop.permute.xlu0 %162  }
  0xb7   :  { %166 = vst.msk [vmem:[#allocation0 + $0x8] sm:$0x1] %vm164_vm11, %v163_v55  }
  0xb8   :  { %179 = vst.msk [vmem:[#allocation0 + $0x8] sm:$0x1] %vm177_vm12, %v176_v50  }
  0xbc   :  { %v182_v58 = vld [vmem:[#allocation0] sm:$0x1] }
  0xbd   :  { %185 = vst [vmem:[%s379_s1] sm:$0x1] %v182_v58 }
  0xbf   :  { %v187_v57 = vld [vmem:[#allocation0 + $0x8] sm:$0x1] }
  0xc0   :  { %220 = vst [vmem:[%s379_s1 + $0x1] sm:$0x1] %v187_v57 }

// kernel: tile.18
= control target key start
LH: loop header
LB: loop body
LE: loop exit
PB: predicated region body
PF: predicated region fallthrough
CT: control target
= control target key end

     0   :  { %s28_s0 = inlined_call_operand.vmem [shape: f32[16], index: 0, kind: input, shape index: {}]   ;;  %s29_s1 = inlined_call_operand.vmem [shape: f32[10,16], index: 1, kind: output, shape index: {}]  }
   0x1   :  { %v4_v0 = vld [vmem:[%s28_s0] ss:$0 sm:$0xff] }
   0x2   :  { %5 = vst [vmem:[%s29_s1] sm:$0xff] %v4_v0 }
   0x3   :  { %8 = vst [vmem:[%s29_s1 + $0x8] sm:$0xff] %v4_v0 }

// kernel: tile.19
= control target key start
LH: loop header
LB: loop body
LE: loop exit
PB: predicated region body
PF: predicated region fallthrough
CT: control target
= control target key end

     0   :  { %s76_s10 = smov 112   ;;  %s77_s11 = smov 80   ;;  %vm4_vm0 = vcmask 130048   ;;  %vm10_vm1 = vcmask 1048448   ;;  %vm16_vm2 = vcmask 917248   ;;  %vm22_vm3 = vcmask 786048   ;;  %s123_s0 = inlined_call_operand.vmem [shape: f32[10,16], index: 0, kind: input, shape index: {}]   ;;  %s124_s1 = inlined_call_operand.vmem [shape: f32[1,160], index: 1, kind: output, shape index: {}]  }
   0x1   :  { %v61_v0 = vld [vmem:[%s123_s0 + $0x7] sm:$0x1]   ;;  %v63_v1 = vld [vmem:[%s123_s0 + $0x5] sm:$0x1]   ;;  %v65_v2 = vld [vmem:[%s123_s0 + $0x3] sm:$0x1]  }
   0x2   :  { %8 = vrot.lane.b32.xlu0 %v61_v0, %s76_s10  ;;  %20 = vrot.lane.b32.xlu1 %v63_v1, %s77_s11  ;;  %s78_s14 = smov 48   ;;  %v62_v3 = vld [vmem:[%s123_s0 + $0x6] sm:$0x1]   ;;  %v64_v4 = vld [vmem:[%s123_s0 + $0x4] sm:$0x1]   ;;  %s79_s19 = smov 96  }
   0x3   :  { %32 = vrot.lane.b32.xlu2 %v65_v2, %s78_s14  ;;  %s80_s20 = smov 64   ;;  %v66_v5 = vld [vmem:[%s123_s0 + $0x2] sm:$0x1]   ;;  %s43_s23 = smov 3  ;;  %vm28_vm4 = vcmask 654848   ;;  %vm34_vm5 = vcmask 523648  }
   0x4   :  { %s81_s24 = smov 32   ;;  %v67_v6 = vld [vmem:[%s123_s0 + $0x1] ss:$8 sm:%s43_s23]   ;;  %s82_s27 = smov 16   ;;  %vm40_vm6 = vcmask 392448   ;;  %vm47_vm7 = vcmask 261248  }
   0x5   :  { %s2_s28 = smov 3 }
   0x6   :  { %v3_v7 = vld [vmem:[%s123_s0] ss:$8 sm:%s2_s28]  }
   0x7   :  { %5 = vst.msk [vmem:[#allocation0] ss:$8 sm:$0x3] %vm4_vm0, %v3_v7  }
   0xa   :  { %14 = vrot.lane.b32.xlu0 %v62_v3, %s79_s19  ;;  %26 = vrot.lane.b32.xlu1 %v64_v4, %s80_s20 }
   0xb   :  { %38 = vrot.lane.b32.xlu2 %v66_v5, %s81_s24 }
  0x12   :  { %45 = vrot.lane.b32.xlu0 %v67_v6, %s82_s27 }
  0x5d   :  { %v33_v8 = vpop.permute.xlu2 %32  }
  0x65   :  { %v39_v9 = vpop.permute.xlu2 %38  }
  0x74   :  { %v9_v10 = vpop.permute.xlu0 %8   ;;  %v21_v11 = vpop.permute.xlu1 %20  }
  0x75   :  { %11 = vst.msk [vmem:[#allocation0] sm:$0x1] %vm10_vm1, %v9_v10  }
  0x7c   :  { %v15_v12 = vpop.permute.xlu0 %14   ;;  %v27_v13 = vpop.permute.xlu1 %26  }
  0x7d   :  { %17 = vst.msk [vmem:[#allocation0] sm:$0x1] %vm16_vm2, %v15_v12  }
  0x7e   :  { %23 = vst.msk [vmem:[#allocation0] sm:$0x1] %vm22_vm3, %v21_v11  }
  0x7f   :  { %29 = vst.msk [vmem:[#allocation0] sm:$0x1] %vm28_vm4, %v27_v13  }
  0x80   :  { %35 = vst.msk [vmem:[#allocation0] sm:$0x1] %vm34_vm5, %v33_v8  }
  0x81   :  { %41 = vst.msk [vmem:[#allocation0] sm:$0x1] %vm40_vm6, %v39_v9  }
  0x84   :  { %v46_v14 = vpop.permute.xlu0 %45  }
  0x85   :  { %48 = vst.msk [vmem:[#allocation0] ss:$8 sm:$0x3] %vm47_vm7, %v46_v14  }
  0x8c   :  { %v51_v15 = vld [vmem:[#allocation0] sm:$0x1]  ;;  %v56_v16 = vld [vmem:[#allocation0 + $0x8] sm:$0x1] }
  0x8d   :  { %54 = vst [vmem:[%s124_s1] sm:$0x1] %v51_v15 }
  0x8e   :  { %68 = vst [vmem:[%s124_s1 + $0x1] sm:$0x1] %v56_v16 }

// kernel: cnn_cifar_forward.1
= control target key start
LH: loop header
LB: loop body
LE: loop exit
PB: predicated region body
PF: predicated region fallthrough
CT: control target
= control target key end

     0   :  { %vm131_vm0 = vcmask 785408   ;;  %vm1648_vm1 = vcmask 326656   ;;  %vm2038_vm2 = vcmask 1043456   ;;  %vm2007_vm3 = vcmask 687104   ;;  %s7078_s1 = inlined_call_operand.vmem [shape: f32[5,96,168], index: 1, kind: input, shape index: {}]   ;;  %s7079_s0 = inlined_call_operand.vmem [shape: f32[32,8,96], index: 0, kind: input, shape index: {}]   ;;  %s7080_s3 = inlined_call_operand.vmem [shape: f32[168,84], index: 3, kind: input, shape index: {}]   ;;  %s7081_s2 = inlined_call_operand.vmem [shape: f32[1,168], index: 2, kind: input, shape index: {}]   ;;  %s7082_s4 = inlined_call_operand.vmem [shape: f32[168,84], index: 4, kind: input, shape index: {}]   ;;  %s7083_s5 = inlined_call_operand.vmem [shape: f32[5,84,160], index: 5, kind: input, shape index: {}]   ;;  %s7084_s7 = inlined_call_operand.vmem [shape: f32[160,80], index: 7, kind: input, shape index: {}]   ;;  %s7085_s6 = inlined_call_operand.vmem [shape: f32[1,160], index: 6, kind: input, shape index: {}]   ;;  %s7086_s8 = inlined_call_operand.vmem [shape: f32[160,80], index: 8, kind: input, shape index: {}]   ;;  %s7087_s9 = inlined_call_operand.vmem [shape: f32[5,80,120], index: 9, kind: input, shape index: {}]   ;;  %s7088_s11 = inlined_call_operand.vmem [shape: f32[120,84], index: 11, kind: input, shape index: {}]   ;;  %s7089_s10 = inlined_call_operand.vmem [shape: f32[1,120], index: 10, kind: input, shape index: {}]   ;;  %s7090_s12 = inlined_call_operand.vmem [shape: f32[1,84], index: 12, kind: input, shape index: {}]   ;;  %s7091_s13 = inlined_call_operand.vmem [shape: f32[84,128], index: 13, kind: input, shape index: {}]   ;;  %s7092_s14 = inlined_call_operand.vmem [shape: f32[1,128], index: 14, kind: input, shape index: {}]   ;;  %s7093_s15 = inlined_call_operand.vmem [shape: f32[8,128], index: 15, kind: output, shape index: {}]  }
   0x1   :  { %v3216_v0 = vld [vmem:[%s7078_s1 + $0x170] sm:$0xff]  ;;  %v3217_v1 = vld [vmem:[%s7078_s1 + $0x178] sm:$0xff]  ;;  %v3214_v4 = vld [vmem:[%s7078_s1 + $0x160] sm:$0xff]  ;;  %vm2756_vm4 = vcmask 261120   ;;  %vm2946_vm5 = vcmask 654336   ;;  %vm3123_vm6 = vcmask 982016  }
   0x2   :  { %v104_v2 = vld [vmem:[%s7078_s1 + $0xb0] sm:$0xff]  ;;  %220 = vmatpush.msra.mxu0 %v3216_v0  ;;  %321 = vmatpush.msra.mxu1 %v3217_v1  ;;  %v105_v3 = vld [vmem:[%s7078_s1 + $0xb8] sm:$0xff]  ;;  %v3215_v5 = vld [vmem:[%s7078_s1 + $0x168] sm:$0xff] }
   0x3   :  { %425 = vmatpush.msra.mxu2 %v104_v2  ;;  %526 = vmatpush.msra.mxu3 %v105_v3  ;;  %v102_v6 = vld [vmem:[%s7078_s1 + $0xa0] sm:$0xff]  ;;  %v103_v7 = vld [vmem:[%s7078_s1 + $0xa8] sm:$0xff]  ;;  %v3212_v8 = vld [vmem:[%s7078_s1 + $0x150] sm:$0xff] }
   0x4   :  { %221 = vmatpush.msra.mxu0 %v3214_v4  ;;  %322 = vmatpush.msra.mxu1 %v3215_v5  ;;  %v3213_v9 = vld [vmem:[%s7078_s1 + $0x158] sm:$0xff]  ;;  %v100_v10 = vld [vmem:[%s7078_s1 + $0x90] sm:$0xff]  ;;  %v3210_v12 = vld [vmem:[%s7078_s1 + $0x140] sm:$0xff] }
   0x5   :  { %v101_v11 = vld [vmem:[%s7078_s1 + $0x98] sm:$0xff]  ;;  %426 = vmatpush.msra.mxu2 %v102_v6  ;;  %527 = vmatpush.msra.mxu3 %v103_v7  ;;  %v3211_v13 = vld [vmem:[%s7078_s1 + $0x148] sm:$0xff]  ;;  %v98_v14 = vld [vmem:[%s7078_s1 + $0x80] sm:$0xff] }
   0x6   :  { %222 = vmatpush.msra.mxu0 %v3212_v8  ;;  %323 = vmatpush.msra.mxu1 %v3213_v9  ;;  %v99_v15 = vld [vmem:[%s7078_s1 + $0x88] sm:$0xff]  ;;  %v3208_v16 = vld [vmem:[%s7078_s1 + $0x130] sm:$0xff]  ;;  %v3209_v17 = vld [vmem:[%s7078_s1 + $0x138] sm:$0xff] }
   0x7   :  { %427 = vmatpush.msra.mxu2 %v100_v10  ;;  %528 = vmatpush.msra.mxu3 %v101_v11  ;;  %v96_v18 = vld [vmem:[%s7078_s1 + $0x70] sm:$0xff]  ;;  %v97_v19 = vld [vmem:[%s7078_s1 + $0x78] sm:$0xff]  ;;  %v3206_v20 = vld [vmem:[%s7078_s1 + $0x120] sm:$0xff] }
   0x8   :  { %223 = vmatpush.msra.mxu0 %v3210_v12  ;;  %324 = vmatpush.msra.mxu1 %v3211_v13  ;;  %v3207_v21 = vld [vmem:[%s7078_s1 + $0x128] sm:$0xff]  ;;  %v94_v22 = vld [vmem:[%s7078_s1 + $0x60] sm:$0xff]  ;;  %v3204_v24 = vld [vmem:[%s7078_s1 + $0x110] sm:$0xff] }
   0x9   :  { %428 = vmatpush.msra.mxu2 %v98_v14  ;;  %529 = vmatpush.msra.mxu3 %v99_v15  ;;  %v95_v23 = vld [vmem:[%s7078_s1 + $0x68] sm:$0xff]  ;;  %v3205_v25 = vld [vmem:[%s7078_s1 + $0x118] sm:$0xff]  ;;  %v92_v26 = vld [vmem:[%s7078_s1 + $0x50] sm:$0xff] }
   0xa   :  { %224 = vmatpush.msra.mxu0 %v3208_v16  ;;  %325 = vmatpush.msra.mxu1 %v3209_v17  ;;  %v93_v27 = vld [vmem:[%s7078_s1 + $0x58] sm:$0xff]  ;;  %v3202_v28 = vld [vmem:[%s7078_s1 + $0x100] sm:$0xff]  ;;  %v3203_v29 = vld [vmem:[%s7078_s1 + $0x108] sm:$0xff] }
   0xb   :  { %429 = vmatpush.msra.mxu2 %v96_v18  ;;  %530 = vmatpush.msra.mxu3 %v97_v19  ;;  %v90_v30 = vld [vmem:[%s7078_s1 + $0x40] sm:$0xff]  ;;  %v91_v31 = vld [vmem:[%s7078_s1 + $0x48] sm:$0xff]  ;;  %v3200_v32 = vld [vmem:[%s7078_s1 + $0xf0] sm:$0xff] }
   0xc   :  { %225 = vmatpush.msra.mxu0 %v3206_v20  ;;  %326 = vmatpush.msra.mxu1 %v3207_v21  ;;  %v3201_v33 = vld [vmem:[%s7078_s1 + $0xf8] sm:$0xff]  ;;  %v88_v34 = vld [vmem:[%s7078_s1 + $0x30] sm:$0xff]  ;;  %v3198_v36 = vld [vmem:[%s7078_s1 + $0xe0] sm:$0xff] }
   0xd   :  { %430 = vmatpush.msra.mxu2 %v94_v22  ;;  %531 = vmatpush.msra.mxu3 %v95_v23  ;;  %v89_v35 = vld [vmem:[%s7078_s1 + $0x38] sm:$0xff]  ;;  %v3199_v37 = vld [vmem:[%s7078_s1 + $0xe8] sm:$0xff]  ;;  %v86_v38 = vld [vmem:[%s7078_s1 + $0x20] sm:$0xff] }
   0xe   :  { %226 = vmatpush.msra.mxu0 %v3204_v24  ;;  %327 = vmatpush.msra.mxu1 %v3205_v25  ;;  %v87_v39 = vld [vmem:[%s7078_s1 + $0x28] sm:$0xff]  ;;  %v3196_v40 = vld [vmem:[%s7078_s1 + $0xd0] sm:$0xff]  ;;  %v3197_v41 = vld [vmem:[%s7078_s1 + $0xd8] sm:$0xff] }
   0xf   :  { %431 = vmatpush.msra.mxu2 %v92_v26  ;;  %532 = vmatpush.msra.mxu3 %v93_v27  ;;  %v84_v42 = vld [vmem:[%s7078_s1 + $0x10] sm:$0xff]  ;;  %v85_v43 = vld [vmem:[%s7078_s1 + $0x18] sm:$0xff]  ;;  %v3194_v44 = vld [vmem:[%s7078_s1 + $0xc0] sm:$0xff] }
  0x10   :  { %227 = vmatpush.msra.mxu0 %v3202_v28  ;;  %328 = vmatpush.msra.mxu1 %v3203_v29  ;;  %v3195_v45 = vld [vmem:[%s7078_s1 + $0xc8] sm:$0xff]  ;;  %v82_v46 = vld [vmem:[%s7078_s1] sm:$0xff]  ;;  %v3352_v50 = vld [vmem:[%s7078_s1 + $0x230] sm:$0xff] }
  0x11   :  { %432 = vmatpush.msra.mxu2 %v90_v30  ;;  %533 = vmatpush.msra.mxu3 %v91_v31  ;;  %v83_v47 = vld [vmem:[%s7078_s1 + $0x8] sm:$0xff]  ;;  %v50_v49 = vld [vmem:[%s7079_s0] sm:$0xff]  ;;  %v3353_v51 = vld [vmem:[%s7078_s1 + $0x238] sm:$0xff] }
  0x12   :  { %228 = vmatpush.msra.mxu0 %v3200_v32  ;;  %329 = vmatpush.msra.mxu1 %v3201_v33  ;;  %v51_v48 = vld [vmem:[%s7079_s0 + $0x8] sm:$0xff]  ;;  %v3350_v52 = vld [vmem:[%s7078_s1 + $0x220] sm:$0xff]  ;;  %v3348_v54 = vld [vmem:[%s7078_s1 + $0x210] sm:$0xff] }
  0x13   :  { %433 = vmatpush.msra.mxu2 %v88_v34  ;;  %534 = vmatpush.msra.mxu3 %v89_v35  ;;  %v3351_v53 = vld [vmem:[%s7078_s1 + $0x228] sm:$0xff]  ;;  %v3349_v55 = vld [vmem:[%s7078_s1 + $0x218] sm:$0xff]  ;;  %v4137_v56 = vld [vmem:[%s7079_s0 + $0x10] sm:$0xff] }
  0x14   :  { %229 = vmatpush.msra.mxu0 %v3198_v36  ;;  %330 = vmatpush.msra.mxu1 %v3199_v37  ;;  %v4148_v57 = vld [vmem:[%s7079_s0 + $0x18] sm:$0xff]  ;;  %v4161_v58 = vld [vmem:[%s7079_s0 + $0x20] sm:$0xff]  ;;  %v3347_v60 = vld [vmem:[%s7078_s1 + $0x208] sm:$0xff] }
  0x15   :  { %434 = vmatpush.msra.mxu2 %v86_v38  ;;  %535 = vmatpush.msra.mxu3 %v87_v39  ;;  %v3346_v59 = vld [vmem:[%s7078_s1 + $0x200] sm:$0xff]  ;;  %v4180_v61 = vld [vmem:[%s7079_s0 + $0x28] sm:$0xff]  ;;  %v4193_v62 = vld [vmem:[%s7079_s0 + $0x30] sm:$0xff] }
  0x16   :  { %230 = vmatpush.msra.mxu0 %v3196_v40  ;;  %331 = vmatpush.msra.mxu1 %v3197_v41  ;;  %v3344_v63 = vld [vmem:[%s7078_s1 + $0x1f0] sm:$0xff]  ;;  %v3345_v0 = vld [vmem:[%s7078_s1 + $0x1f8] sm:$0xff]  ;;  %v4225_v2 = vld [vmem:[%s7079_s0 + $0x40] sm:$0xff] }
  0x17   :  { %435 = vmatpush.msra.mxu2 %v84_v42  ;;  %536 = vmatpush.msra.mxu3 %v85_v43  ;;  %v4212_v1 = vld [vmem:[%s7079_s0 + $0x38] sm:$0xff]  ;;  %v3342_v3 = vld [vmem:[%s7078_s1 + $0x1e0] sm:$0xff]  ;;  %v3343_v4 = vld [vmem:[%s7078_s1 + $0x1e8] sm:$0xff] }
  0x18   :  { %231 = vmatpush.msra.mxu0 %v3194_v44  ;;  %332 = vmatpush.msra.mxu1 %v3195_v45  ;;  %v4244_v5 = vld [vmem:[%s7079_s0 + $0x48] sm:$0xff]  ;;  %v4257_v6 = vld [vmem:[%s7079_s0 + $0x50] sm:$0xff]  ;;  %v4270_v7 = vld [vmem:[%s7079_s0 + $0x58] sm:$0xff] }
  0x19   :  { %436 = vmatpush.msra.mxu2 %v82_v46  ;;  %537 = vmatpush.msra.mxu3 %v83_v47  ;;  %v3340_v8 = vld [vmem:[%s7078_s1 + $0x1d0] sm:$0xff]  ;;  %v3341_v9 = vld [vmem:[%s7078_s1 + $0x1d8] sm:$0xff]  ;;  %v4289_v10 = vld [vmem:[%s7079_s0 + $0x60] sm:$0xff] }
  0x1a   :  { %3218 = vmatmul.msk.f32.vlgmr.msra.gmra.mxu0 %vm131_vm0, %v51_v48  ;;  %3246 = vmatmul.msk.f32.vlgmr.msra.gmra.mxu1 %vm131_vm0, %v51_v48  ;;  %v4302_v11 = vld [vmem:[%s7079_s0 + $0x68] sm:$0xff]  ;;  %v4315_v12 = vld [vmem:[%s7079_s0 + $0x70] sm:$0xff]  ;;  %v3338_v13 = vld [vmem:[%s7078_s1 + $0x1c0] sm:$0xff] }
  0x1b   :  { %3274 = vmatmul.msk.f32.vlgmr.msra.gmra.mxu2 %vm131_vm0, %v50_v49  ;;  %3302 = vmatmul.msk.f32.vlgmr.msra.gmra.mxu3 %vm131_vm0, %v50_v49  ;;  %v3339_v14 = vld [vmem:[%s7078_s1 + $0x1c8] sm:$0xff]  ;;  %v4334_v15 = vld [vmem:[%s7079_s0 + $0x78] sm:$0xff]  ;;  %v4347_v16 = vld [vmem:[%s7079_s0 + $0x80] sm:$0xff] }
  0x1c   :  { %655 = vmatpush.msrb.mxu0 %v3352_v50  ;;  %756 = vmatpush.msrb.mxu1 %v3353_v51  ;;  %v3336_v17 = vld [vmem:[%s7078_s1 + $0x1b0] sm:$0xff]  ;;  %v3337_v18 = vld [vmem:[%s7078_s1 + $0x1b8] sm:$0xff]  ;;  %v4366_v21 = vld [vmem:[%s7079_s0 + $0x88] sm:$0xff] }
  0x1d   :  { %v4383_v28 = vld [vmem:[%s7079_s0 + $0x90] sm:$0xff]  ;;  %v3334_v29 = vld [vmem:[%s7078_s1 + $0x1a0] sm:$0xff]  ;;  %v3335_v30 = vld [vmem:[%s7078_s1 + $0x1a8] sm:$0xff] }
  0x1e   :  { %656 = vmatpush.msrb.mxu0 %v3350_v52  ;;  %757 = vmatpush.msrb.mxu1 %v3351_v53  ;;  %v4406_v37 = vld [vmem:[%s7079_s0 + $0x98] sm:$0xff]  ;;  %v4423_v44 = vld [vmem:[%s7079_s0 + $0xa0] sm:$0xff]  ;;  %v4440_v51 = vld [vmem:[%s7079_s0 + $0xa8] sm:$0xff] }
  0x1f   :  { %v3332_v52 = vld [vmem:[%s7078_s1 + $0x190] sm:$0xff]  ;;  %v3333_v53 = vld [vmem:[%s7078_s1 + $0x198] sm:$0xff] }
  0x20   :  { %657 = vmatpush.msrb.mxu0 %v3348_v54  ;;  %758 = vmatpush.msrb.mxu1 %v3349_v55 }
  0x22   :  { %3219 = vmatmul.msk.f32.gmra.mxu0 %vm131_vm0, %v4137_v56  ;;  %3247 = vmatmul.msk.f32.gmra.mxu1 %vm131_vm0, %v4137_v56 }
  0x23   :  { %3275 = vmatmul.msk.f32.gmra.mxu2 %vm131_vm0, %v51_v48  ;;  %3303 = vmatmul.msk.f32.gmra.mxu3 %vm131_vm0, %v51_v48 }
  0x24   :  { %658 = vmatpush.msrb.mxu0 %v3346_v59  ;;  %759 = vmatpush.msrb.mxu1 %v3347_v60 }
  0x26   :  { %659 = vmatpush.msrb.mxu0 %v3344_v63  ;;  %760 = vmatpush.msrb.mxu1 %v3345_v0 }
  0x28   :  { %660 = vmatpush.msrb.mxu0 %v3342_v3  ;;  %761 = vmatpush.msrb.mxu1 %v3343_v4  ;;  %v4463_v3 = vld [vmem:[%s7079_s0 + $0xb0] sm:$0xff] }
  0x29   :  { %v3432_v4 = vld [vmem:[%s7078_s1 + $0x2f0] sm:$0xff] }
  0x2a   :  { %3220 = vmatmul.msk.f32.gmra.mxu0 %vm131_vm0, %v4148_v57  ;;  %3248 = vmatmul.msk.f32.gmra.mxu1 %vm131_vm0, %v4148_v57 }
  0x2b   :  { %3276 = vmatmul.msk.f32.gmra.mxu2 %vm131_vm0, %v4137_v56  ;;  %3304 = vmatmul.msk.f32.gmra.mxu3 %vm131_vm0, %v4137_v56 }
  0x2c   :  { %661 = vmatpush.msrb.mxu0 %v3340_v8  ;;  %762 = vmatpush.msrb.mxu1 %v3341_v9  ;;  %v3433_v8 = vld [vmem:[%s7078_s1 + $0x2f8] sm:$0xff]  ;;  %v3430_v9 = vld [vmem:[%s7078_s1 + $0x2e0] sm:$0xff] }
  0x2d   :  { %941 = vmatpush.msrb.mxu2 %v3432_v4  ;;  %1042 = vmatpush.msrb.mxu3 %v3433_v8  ;;  %v3417_v4 = vld [vmem:[%s7078_s1 + $0x278] sm:$0xff] }
  0x2e   :  { %662 = vmatpush.msrb.mxu0 %v3338_v13  ;;  %763 = vmatpush.msrb.mxu1 %v3339_v14  ;;  %v3431_v13 = vld [vmem:[%s7078_s1 + $0x2e8] sm:$0xff] }
  0x2f   :  { %942 = vmatpush.msrb.mxu2 %v3430_v9  ;;  %1043 = vmatpush.msrb.mxu3 %v3431_v13 }
  0x30   :  { %663 = vmatpush.msrb.mxu0 %v3336_v17  ;;  %764 = vmatpush.msrb.mxu1 %v3337_v18  ;;  %v4488_v18 = vld [vmem:[%s7079_s0 + $0xb8] sm:$0xff] }
  0x32   :  { %3221 = vmatmul.msk.f32.gmra.mxu0 %vm131_vm0, %v4161_v58  ;;  %3249 = vmatmul.msk.f32.gmra.mxu1 %vm131_vm0, %v4161_v58 }
  0x33   :  { %3277 = vmatmul.msk.f32.gmra.mxu2 %vm131_vm0, %v4148_v57  ;;  %3305 = vmatmul.msk.f32.gmra.mxu3 %vm131_vm0, %v4148_v57 }
  0x34   :  { %664 = vmatpush.msrb.mxu0 %v3334_v29  ;;  %765 = vmatpush.msrb.mxu1 %v3335_v30  ;;  %v3330_v29 = vld [vmem:[%s7078_s1 + $0x180] sm:$0xff]  ;;  %v3331_v30 = vld [vmem:[%s7078_s1 + $0x188] sm:$0xff] }
  0x36   :  { %665 = vmatpush.msrb.mxu0 %v3332_v52  ;;  %766 = vmatpush.msrb.mxu1 %v3333_v53  ;;  %v4539_v52 = vld [vmem:[%s7079_s0 + $0xc0] sm:$0xff]  ;;  %v3420_v53 = vld [vmem:[%s7078_s1 + $0x290] sm:$0xff] }
  0x38   :  { %666 = vmatpush.msrb.mxu0 %v3330_v29  ;;  %767 = vmatpush.msrb.mxu1 %v3331_v30  ;;  %v3412_v29 = vld [vmem:[%s7078_s1 + $0x250] sm:$0xff]  ;;  %v3413_v30 = vld [vmem:[%s7078_s1 + $0x258] sm:$0xff] }
  0x3a   :  { %3222 = vmatmul.msk.f32.gmra.mxu0 %vm131_vm0, %v4180_v61  ;;  %3250 = vmatmul.msk.f32.gmra.mxu1 %vm131_vm0, %v4180_v61 }
  0x3b   :  { %3278 = vmatmul.msk.f32.gmra.mxu2 %vm131_vm0, %v4161_v58  ;;  %3306 = vmatmul.msk.f32.gmra.mxu3 %vm131_vm0, %v4161_v58 }
  0x42   :  { %3223 = vmatmul.msk.f32.gmra.mxu0 %vm131_vm0, %v4193_v62  ;;  %3251 = vmatmul.msk.f32.gmra.mxu1 %vm131_vm0, %v4193_v62 }
  0x43   :  { %3279 = vmatmul.msk.f32.gmra.mxu2 %vm131_vm0, %v4180_v61  ;;  %3307 = vmatmul.msk.f32.gmra.mxu3 %vm131_vm0, %v4180_v61 }
  0x4a   :  { %3224 = vmatmul.msk.f32.gmra.mxu0 %vm131_vm0, %v4212_v1  ;;  %3252 = vmatmul.msk.f32.gmra.mxu1 %vm131_vm0, %v4212_v1 }
  0x4b   :  { %3280 = vmatmul.msk.f32.gmra.mxu2 %vm131_vm0, %v4193_v62  ;;  %3308 = vmatmul.msk.f32.gmra.mxu3 %vm131_vm0, %v4193_v62 }
  0x52   :  { %3225 = vmatmul.msk.f32.gmra.mxu0 %vm131_vm0, %v4225_v2  ;;  %3253 = vmatmul.msk.f32.gmra.mxu1 %vm131_vm0, %v4225_v2 }
  0x53   :  { %3281 = vmatmul.msk.f32.gmra.mxu2 %vm131_vm0, %v4212_v1  ;;  %3309 = vmatmul.msk.f32.gmra.mxu3 %vm131_vm0, %v4212_v1 }
  0x5a   :  { %3226 = vmatmul.msk.f32.gmra.mxu0 %vm131_vm0, %v4244_v5  ;;  %3254 = vmatmul.msk.f32.gmra.mxu1 %vm131_vm0, %v4244_v5 }
  0x5b   :  { %3282 = vmatmul.msk.f32.gmra.mxu2 %vm131_vm0, %v4225_v2  ;;  %3310 = vmatmul.msk.f32.gmra.mxu3 %vm131_vm0, %v4225_v2 }
  0x62   :  { %3227 = vmatmul.msk.f32.gmra.mxu0 %vm131_vm0, %v4257_v6  ;;  %3255 = vmatmul.msk.f32.gmra.mxu1 %vm131_vm0, %v4257_v6 }
  0x63   :  { %3283 = vmatmul.msk.f32.gmra.mxu2 %vm131_vm0, %v4244_v5  ;;  %3311 = vmatmul.msk.f32.gmra.mxu3 %vm131_vm0, %v4244_v5 }
  0x6a   :  { %3228 = vmatmul.msk.f32.gmra.mxu0 %vm131_vm0, %v4270_v7  ;;  %3256 = vmatmul.msk.f32.gmra.mxu1 %vm131_vm0, %v4270_v7 }
  0x6b   :  { %3284 = vmatmul.msk.f32.gmra.mxu2 %vm131_vm0, %v4257_v6  ;;  %3312 = vmatmul.msk.f32.gmra.mxu3 %vm131_vm0, %v4257_v6 }
  0x72   :  { %3229 = vmatmul.msk.f32.gmra.mxu0 %vm131_vm0, %v4289_v10  ;;  %3257 = vmatmul.msk.f32.gmra.mxu1 %vm131_vm0, %v4289_v10 }
  0x73   :  { %3285 = vmatmul.msk.f32.gmra.mxu2 %vm131_vm0, %v4270_v7  ;;  %3313 = vmatmul.msk.f32.gmra.mxu3 %vm131_vm0, %v4270_v7 }
  0x7a   :  { %3230 = vmatmul.msk.f32.gmra.mxu0 %vm131_vm0, %v4302_v11  ;;  %3258 = vmatmul.msk.f32.gmra.mxu1 %vm131_vm0, %v4302_v11 }
  0x7b   :  { %3286 = vmatmul.msk.f32.gmra.mxu2 %vm131_vm0, %v4289_v10  ;;  %3314 = vmatmul.msk.f32.gmra.mxu3 %vm131_vm0, %v4289_v10 }
  0x82   :  { %3231 = vmatmul.msk.f32.gmra.mxu0 %vm131_vm0, %v4315_v12  ;;  %3259 = vmatmul.msk.f32.gmra.mxu1 %vm131_vm0, %v4315_v12 }
  0x83   :  { %3287 = vmatmul.msk.f32.gmra.mxu2 %vm131_vm0, %v4302_v11  ;;  %3315 = vmatmul.msk.f32.gmra.mxu3 %vm131_vm0, %v4302_v11 }
  0x8a   :  { %3232 = vmatmul.msk.f32.gmra.mxu0 %vm131_vm0, %v4334_v15  ;;  %3260 = vmatmul.msk.f32.gmra.mxu1 %vm131_vm0, %v4334_v15 }
  0x8b   :  { %3288 = vmatmul.msk.f32.gmra.mxu2 %vm131_vm0, %v4315_v12  ;;  %3316 = vmatmul.msk.f32.gmra.mxu3 %vm131_vm0, %v4315_v12 }
  0x92   :  { %3233 = vmatmul.msk.f32.gmra.mxu0 %vm131_vm0, %v4347_v16  ;;  %3261 = vmatmul.msk.f32.gmra.mxu1 %vm131_vm0, %v4347_v16 }
  0x93   :  { %3289 = vmatmul.msk.f32.gmra.mxu2 %vm131_vm0, %v4334_v15  ;;  %3317 = vmatmul.msk.f32.gmra.mxu3 %vm131_vm0, %v4334_v15 }
  0x97   :  { %v233_v19 = vpop.f32.mrf.mxu0  ;;  %v334_v20 = vpop.f32.mrf.mxu1 }
  0x9a   :  { %3234 = vmatmul.msk.f32.gmra.mxu0 %vm131_vm0, %v4366_v21  ;;  %3262 = vmatmul.msk.f32.gmra.mxu1 %vm131_vm0, %v4366_v21 }
  0x9b   :  { %3290 = vmatmul.msk.f32.gmra.mxu2 %vm131_vm0, %v4347_v16  ;;  %3318 = vmatmul.msk.f32.gmra.mxu3 %vm131_vm0, %v4347_v16 }
  0x9e   :  { %v438_v22 = vpop.f32.mrf.mxu2  ;;  %v539_v23 = vpop.f32.mrf.mxu3 }
  0x9f   :  { %v4376_v24 = vadd.f32 %v438_v22, %v233_v19  ;;  %v4378_v25 = vadd.f32 %v539_v23, %v334_v20  ;;  %v236_v26 = vpop.f32.mrf.mxu0  ;;  %v337_v27 = vpop.f32.mrf.mxu1 }
  0xa2   :  { %3235 = vmatmul.msk.f32.gmra.mxu0 %vm131_vm0, %v4383_v28  ;;  %3263 = vmatmul.msk.f32.gmra.mxu1 %vm131_vm0, %v4383_v28 }
  0xa3   :  { %3291 = vmatmul.msk.f32.gmra.mxu2 %vm131_vm0, %v4366_v21  ;;  %3319 = vmatmul.msk.f32.gmra.mxu3 %vm131_vm0, %v4366_v21 }
  0xa6   :  { %v441_v31 = vpop.f32.mrf.mxu2  ;;  %v542_v32 = vpop.f32.mrf.mxu3 }
  0xa7   :  { %v4399_v33 = vadd.f32 %v441_v31, %v236_v26  ;;  %v4401_v34 = vadd.f32 %v542_v32, %v337_v27  ;;  %v239_v35 = vpop.f32.mrf.mxu0  ;;  %v340_v36 = vpop.f32.mrf.mxu1  ;;  %v3428_v26 = vld [vmem:[%s7078_s1 + $0x2d0] sm:$0xff]  ;;  %v3429_v27 = vld [vmem:[%s7078_s1 + $0x2d8] sm:$0xff]  ;;  %v3426_v31 = vld [vmem:[%s7078_s1 + $0x2c0] sm:$0xff] }
  0xa8   :  { %943 = vmatpush.msrb.mxu2 %v3428_v26  ;;  %1044 = vmatpush.msrb.mxu3 %v3429_v27  ;;  %v3427_v32 = vld [vmem:[%s7078_s1 + $0x2c8] sm:$0xff]  ;;  %v3414_v26 = vld [vmem:[%s7078_s1 + $0x260] sm:$0xff] }
  0xa9   :  { %v3415_v27 = vld [vmem:[%s7078_s1 + $0x268] sm:$0xff] }
  0xaa   :  { %3236 = vmatmul.msk.f32.gmra.mxu0 %vm131_vm0, %v4406_v37  ;;  %3264 = vmatmul.msk.f32.gmra.mxu1 %vm131_vm0, %v4406_v37 }
  0xab   :  { %3292 = vmatmul.msk.f32.gmra.mxu2 %vm131_vm0, %v4383_v28  ;;  %3320 = vmatmul.msk.f32.gmra.mxu3 %vm131_vm0, %v4383_v28 }
  0xac   :  { %944 = vmatpush.msrb.mxu2 %v3426_v31  ;;  %1045 = vmatpush.msrb.mxu3 %v3427_v32  ;;  %v3512_v31 = vld [vmem:[%s7078_s1 + $0x3b0] sm:$0xff]  ;;  %v3513_v32 = vld [vmem:[%s7078_s1 + $0x3b8] sm:$0xff] }
  0xad   :  { %1227 = vmatpush.msra.mxu0 %v3512_v31  ;;  %1328 = vmatpush.msra.mxu1 %v3513_v32  ;;  %v4649_v31 = vld [vmem:[%s7079_s0 + $0xe0] sm:$0xff] }
  0xae   :  { %v444_v38 = vpop.f32.mrf.mxu2  ;;  %v545_v39 = vpop.f32.mrf.mxu3  ;;  %v3510_v32 = vld [vmem:[%s7078_s1 + $0x3a0] sm:$0xff] }
  0xaf   :  { %v4416_v40 = vadd.f32 %v444_v38, %v239_v35  ;;  %v4418_v41 = vadd.f32 %v545_v39, %v340_v36  ;;  %v242_v42 = vpop.f32.mrf.mxu0  ;;  %v343_v43 = vpop.f32.mrf.mxu1  ;;  %v3424_v35 = vld [vmem:[%s7078_s1 + $0x2b0] sm:$0xff]  ;;  %v3425_v36 = vld [vmem:[%s7078_s1 + $0x2b8] sm:$0xff]  ;;  %v3422_v38 = vld [vmem:[%s7078_s1 + $0x2a0] sm:$0xff]  ;;  %1228 = vmatpush.msra.mxu0 %v3510_v32 }
  0xb0   :  { %v3423_v39 = vld [vmem:[%s7078_s1 + $0x2a8] sm:$0xff]  ;;  %945 = vmatpush.msrb.mxu2 %v3424_v35  ;;  %1046 = vmatpush.msrb.mxu3 %v3425_v36  ;;  %v3410_v35 = vld [vmem:[%s7078_s1 + $0x240] sm:$0xff] }
  0xb1   :  { %v3411_v36 = vld [vmem:[%s7078_s1 + $0x248] sm:$0xff] }
  0xb2   :  { %3237 = vmatmul.msk.f32.gmra.mxu0 %vm131_vm0, %v4423_v44  ;;  %3265 = vmatmul.msk.f32.gmra.mxu1 %vm131_vm0, %v4423_v44 }
  0xb3   :  { %3293 = vmatmul.msk.f32.gmra.mxu2 %vm131_vm0, %v4406_v37  ;;  %3321 = vmatmul.msk.f32.gmra.mxu3 %vm131_vm0, %v4406_v37 }
  0xb4   :  { %946 = vmatpush.msrb.mxu2 %v3422_v38  ;;  %1047 = vmatpush.msrb.mxu3 %v3423_v39 }
  0xb6   :  { %v447_v45 = vpop.f32.mrf.mxu2  ;;  %v548_v46 = vpop.f32.mrf.mxu3  ;;  %947 = vmatpush.msrb.mxu2 %v3420_v53  ;;  %v4615_v53 = vld [vmem:[%s7079_s0 + $0xd0] sm:$0xff] }
  0xb7   :  { %v4433_v47 = vadd.f32 %v447_v45, %v242_v42  ;;  %v4435_v48 = vadd.f32 %v548_v46, %v343_v43  ;;  %v245_v49 = vpop.f32.mrf.mxu0  ;;  %v346_v50 = vpop.f32.mrf.mxu1 }
  0xba   :  { %3238 = vmatmul.msk.f32.gmra.mxu0 %vm131_vm0, %v4440_v51  ;;  %3266 = vmatmul.msk.f32.gmra.mxu1 %vm131_vm0, %v4440_v51 }
  0xbb   :  { %3294 = vmatmul.msk.f32.gmra.mxu2 %vm131_vm0, %v4423_v44  ;;  %3322 = vmatmul.msk.f32.gmra.mxu3 %vm131_vm0, %v4423_v44 }
  0xbe   :  { %v450_v54 = vpop.f32.mrf.mxu2  ;;  %v551_v55 = vpop.f32.mrf.mxu3 }
  0xbf   :  { %v4456_v59 = vadd.f32 %v450_v54, %v245_v49  ;;  %v4458_v60 = vadd.f32 %v551_v55, %v346_v50  ;;  %v248_v63 = vpop.f32.mrf.mxu0  ;;  %v349_v0 = vpop.f32.mrf.mxu1  ;;  %v3421_v54 = vld [vmem:[%s7078_s1 + $0x298] sm:$0xff]  ;;  %v3418_v55 = vld [vmem:[%s7078_s1 + $0x280] sm:$0xff] }
  0xc0   :  { %1048 = vmatpush.msrb.mxu3 %v3421_v54  ;;  %948 = vmatpush.msrb.mxu2 %v3418_v55 }
  0xc2   :  { %3239 = vmatmul.msk.f32.gmra.mxu0 %vm131_vm0, %v4463_v3  ;;  %3267 = vmatmul.msk.f32.gmra.mxu1 %vm131_vm0, %v4463_v3 }
  0xc3   :  { %3295 = vmatmul.msk.f32.gmra.mxu2 %vm131_vm0, %v4440_v51  ;;  %3323 = vmatmul.msk.f32.gmra.mxu3 %vm131_vm0, %v4440_v51 }
  0xc6   :  { %v453_v14 = vpop.f32.mrf.mxu2  ;;  %v554_v17 = vpop.f32.mrf.mxu3 }
  0xc7   :  { %v4490_v19 = vadd.f32 %v453_v14, %v248_v63  ;;  %v4492_v20 = vadd.f32 %v554_v17, %v349_v0  ;;  %v251_v22 = vpop.f32.mrf.mxu0  ;;  %v352_v23 = vpop.f32.mrf.mxu1  ;;  %v3419_v63 = vld [vmem:[%s7078_s1 + $0x288] sm:$0xff]  ;;  %v3416_v0 = vld [vmem:[%s7078_s1 + $0x270] sm:$0xff] }
  0xc8   :  { %1049 = vmatpush.msrb.mxu3 %v3419_v63  ;;  %949 = vmatpush.msrb.mxu2 %v3416_v0 }
  0xca   :  { %3240 = vmatmul.msk.f32.gmra.mxu0 %vm131_vm0, %v4488_v18  ;;  %3268 = vmatmul.msk.f32.gmra.mxu1 %vm131_vm0, %v4488_v18 }
  0xcb   :  { %3296 = vmatmul.msk.f32.gmra.mxu2 %vm131_vm0, %v4463_v3  ;;  %3324 = vmatmul.msk.f32.gmra.mxu3 %vm131_vm0, %v4463_v3 }
  0xcc   :  { %1050 = vmatpush.msrb.mxu3 %v3417_v4  ;;  %950 = vmatpush.msrb.mxu2 %v3414_v26 }
  0xce   :  { %v456_v42 = vpop.f32.mrf.mxu2  ;;  %v557_v43 = vpop.f32.mrf.mxu3  ;;  %1051 = vmatpush.msrb.mxu3 %v3415_v27  ;;  %951 = vmatpush.msrb.mxu2 %v3412_v29 }
  0xcf   :  { %v4532_v45 = vadd.f32 %v456_v42, %v251_v22  ;;  %v4534_v46 = vadd.f32 %v557_v43, %v352_v23  ;;  %v254_v49 = vpop.f32.mrf.mxu0  ;;  %v355_v50 = vpop.f32.mrf.mxu1  ;;  %v4574_v23 = vld [vmem:[%s7079_s0 + $0xc8] sm:$0xff] }
  0xd0   :  { %1052 = vmatpush.msrb.mxu3 %v3413_v30  ;;  %952 = vmatpush.msrb.mxu2 %v3410_v35  ;;  %v3511_v35 = vld [vmem:[%s7078_s1 + $0x3a8] sm:$0xff] }
  0xd1   :  { %1329 = vmatpush.msra.mxu1 %v3511_v35 }
  0xd2   :  { %3241 = vmatmul.msk.f32.gmra.mxu0 %vm131_vm0, %v4539_v52  ;;  %3269 = vmatmul.msk.f32.gmra.mxu1 %vm131_vm0, %v4539_v52 }
  0xd3   :  { %3297 = vmatmul.msk.f32.gmra.mxu2 %vm131_vm0, %v4488_v18  ;;  %3325 = vmatmul.msk.f32.gmra.mxu3 %vm131_vm0, %v4488_v18 }
  0xd4   :  { %1053 = vmatpush.msrb.mxu3 %v3411_v36 }
  0xd6   :  { %v459_v8 = vpop.f32.mrf.mxu2  ;;  %v560_v9 = vpop.f32.mrf.mxu3 }
  0xd7   :  { %v4567_v13 = vadd.f32 %v459_v8, %v254_v49  ;;  %v4569_v14 = vadd.f32 %v560_v9, %v355_v50  ;;  %v257_v17 = vpop.f32.mrf.mxu0  ;;  %v358_v22 = vpop.f32.mrf.mxu1  ;;  %v4632_v9 = vld [vmem:[%s7079_s0 + $0xd8] sm:$0xff] }
  0xda   :  { %3242 = vmatmul.msk.f32.gmra.mxu0 %vm131_vm0, %v4574_v23  ;;  %3270 = vmatmul.msk.f32.gmra.mxu1 %vm131_vm0, %v4574_v23 }
  0xdb   :  { %3298 = vmatmul.msk.f32.gmra.mxu2 %vm131_vm0, %v4539_v52  ;;  %3326 = vmatmul.msk.f32.gmra.mxu3 %vm131_vm0, %v4539_v52 }
  0xde   :  { %v462_v38 = vpop.f32.mrf.mxu2  ;;  %v563_v39 = vpop.f32.mrf.mxu3 }
  0xdf   :  { %v4608_v42 = vadd.f32 %v462_v38, %v257_v17  ;;  %v4610_v43 = vadd.f32 %v563_v39, %v358_v22  ;;  %v260_v49 = vpop.f32.mrf.mxu0  ;;  %v361_v50 = vpop.f32.mrf.mxu1 }
  0xe2   :  { %3243 = vmatmul.msk.f32.gmra.mxu0 %vm131_vm0, %v4615_v53  ;;  %3271 = vmatmul.msk.f32.gmra.mxu1 %vm131_vm0, %v4615_v53 }
  0xe3   :  { %3299 = vmatmul.msk.f32.gmra.mxu2 %vm131_vm0, %v4574_v23  ;;  %3327 = vmatmul.msk.f32.gmra.mxu3 %vm131_vm0, %v4574_v23 }
  0xe6   :  { %v465_v54 = vpop.f32.mrf.mxu2  ;;  %v566_v55 = vpop.f32.mrf.mxu3 }
  0xe7   :  { %v4625_v63 = vadd.f32 %v465_v54, %v260_v49  ;;  %v4627_v0 = vadd.f32 %v566_v55, %v361_v50  ;;  %v263_v4 = vpop.f32.mrf.mxu0  ;;  %v364_v8 = vpop.f32.mrf.mxu1 }
  0xea   :  { %3244 = vmatmul.msk.f32.gmra.mxu0 %vm131_vm0, %v4632_v9  ;;  %3272 = vmatmul.msk.f32.gmra.mxu1 %vm131_vm0, %v4632_v9 }
  0xeb   :  { %3300 = vmatmul.msk.f32.gmra.mxu2 %vm131_vm0, %v4615_v53  ;;  %3328 = vmatmul.msk.f32.gmra.mxu3 %vm131_vm0, %v4615_v53 }
  0xee   :  { %v468_v17 = vpop.f32.mrf.mxu2  ;;  %v569_v22 = vpop.f32.mrf.mxu3 }
  0xef   :  { %v4642_v26 = vadd.f32 %v468_v17, %v263_v4  ;;  %v4644_v27 = vadd.f32 %v569_v22, %v364_v8  ;;  %v266_v29 = vpop.f32.mrf.mxu0  ;;  %v367_v30 = vpop.f32.mrf.mxu1 }
  0xf2   :  { %3245 = vmatmul.msk.f32.gmra.mxu0 %vm131_vm0, %v4649_v31  ;;  %3273 = vmatmul.msk.f32.gmra.mxu1 %vm131_vm0, %v4649_v31 }
  0xf3   :  { %3301 = vmatmul.msk.f32.gmra.mxu2 %vm131_vm0, %v4632_v9  ;;  %3329 = vmatmul.msk.f32.gmra.mxu3 %vm131_vm0, %v4632_v9 }
  0xf6   :  { %v471_v36 = vpop.f32.mrf.mxu2  ;;  %v572_v38 = vpop.f32.mrf.mxu3 }
  0xf7   :  { %v4665_v39 = vadd.f32 %v471_v36, %v266_v29  ;;  %v4667_v49 = vadd.f32 %v572_v38, %v367_v30  ;;  %v269_v50 = vpop.f32.mrf.mxu0  ;;  %v370_v54 = vpop.f32.mrf.mxu1  ;;  %v3508_v30 = vld [vmem:[%s7078_s1 + $0x390] sm:$0xff] }
  0xf8   :  { %1229 = vmatpush.msra.mxu0 %v3508_v30 }
  0xfa   :  { %3354 = vmatmul.msk.f32.vlgmr.msrb.gmra.mxu0 %vm131_vm0, %v4137_v56  ;;  %3382 = vmatmul.msk.f32.vlgmr.msrb.gmra.mxu1 %vm131_vm0, %v4137_v56  ;;  %v3509_v56 = vld [vmem:[%s7078_s1 + $0x398] sm:$0xff] }
  0xfb   :  { %3434 = vmatmul.msk.f32.vlgmr.msrb.gmra.mxu2 %vm131_vm0, %v4148_v57  ;;  %3462 = vmatmul.msk.f32.vlgmr.msrb.gmra.mxu3 %vm131_vm0, %v4148_v57 }
  0xfc   :  { %1330 = vmatpush.msra.mxu1 %v3509_v56  ;;  %v3507_v56 = vld [vmem:[%s7078_s1 + $0x388] sm:$0xff] }
  0xfe   :  { %v474_v55 = vpop.f32.mrf.mxu2  ;;  %v575_v4 = vpop.f32.mrf.mxu3  ;;  %1331 = vmatpush.msra.mxu1 %v3507_v56 }
  0xff   :  { %v4677_v8 = vadd.f32 %v474_v55, %v269_v50  ;;  %v4679_v17 = vadd.f32 %v575_v4, %v370_v54  ;;  %v272_v22 = vpop.f32.mrf.mxu0  ;;  %v373_v29 = vpop.f32.mrf.mxu1 }
 0x101   :  { %7095 = vst [vmem:[#allocation2_spill] sm:$0xff] %v4679_v17 }
 0x102   :  { %3355 = vmatmul.msk.f32.gmra.mxu0 %vm131_vm0, %v4148_v57  ;;  %3383 = vmatmul.msk.f32.gmra.mxu1 %vm131_vm0, %v4148_v57 }
 0x103   :  { %3435 = vmatmul.msk.f32.gmra.mxu2 %vm131_vm0, %v4161_v58  ;;  %3463 = vmatmul.msk.f32.gmra.mxu3 %vm131_vm0, %v4161_v58 }
 0x106   :  { %v477_v32 = vpop.f32.mrf.mxu2  ;;  %v578_v35 = vpop.f32.mrf.mxu3 }
 0x107   :  { %v4695_v36 = vadd.f32 %v477_v32, %v272_v22  ;;  %v4697_v38 = vadd.f32 %v578_v35, %v373_v29  ;;  %v275_v50 = vpop.f32.mrf.mxu0  ;;  %v376_v54 = vpop.f32.mrf.mxu1 }
 0x109   :  { %7096 = vst [vmem:[#allocation3_spill] sm:$0xff] %v4695_v36 }
 0x10a   :  { %7097 = vst [vmem:[#allocation4_spill] sm:$0xff] %v4697_v38  ;;  %3356 = vmatmul.msk.f32.gmra.mxu0 %vm131_vm0, %v4161_v58  ;;  %3384 = vmatmul.msk.f32.gmra.mxu1 %vm131_vm0, %v4161_v58  ;;  %v3506_v58 = vld [vmem:[%s7078_s1 + $0x380] sm:$0xff] }
 0x10b   :  { %3436 = vmatmul.msk.f32.gmra.mxu2 %vm131_vm0, %v4180_v61  ;;  %3464 = vmatmul.msk.f32.gmra.mxu3 %vm131_vm0, %v4180_v61 }
 0x10c   :  { %1230 = vmatpush.msra.mxu0 %v3506_v58 }
 0x10e   :  { %v480_v57 = vpop.f32.mrf.mxu2  ;;  %v581_v55 = vpop.f32.mrf.mxu3 }
 0x10f   :  { %v4707_v4 = vadd.f32 %v480_v57, %v275_v50  ;;  %v4709_v22 = vadd.f32 %v581_v55, %v376_v54  ;;  %v278_v29 = vpop.f32.mrf.mxu0  ;;  %v379_v30 = vpop.f32.mrf.mxu1 }
 0x111   :  { %7098 = vst [vmem:[#allocation5_spill] sm:$0xff] %v4707_v4 }
 0x112   :  { %7099 = vst [vmem:[#allocation6_spill] sm:$0xff] %v4709_v22  ;;  %3357 = vmatmul.msk.f32.gmra.mxu0 %vm131_vm0, %v4180_v61  ;;  %3385 = vmatmul.msk.f32.gmra.mxu1 %vm131_vm0, %v4180_v61 }
 0x113   :  { %3437 = vmatmul.msk.f32.gmra.mxu2 %vm131_vm0, %v4193_v62  ;;  %3465 = vmatmul.msk.f32.gmra.mxu3 %vm131_vm0, %v4193_v62 }
 0x116   :  { %v483_v32 = vpop.f32.mrf.mxu2  ;;  %v584_v35 = vpop.f32.mrf.mxu3 }
 0x117   :  { %v4725_v50 = vadd.f32 %v483_v32, %v278_v29  ;;  %v4727_v61 = vadd.f32 %v584_v35, %v379_v30  ;;  %v281_v54 = vpop.f32.mrf.mxu0  ;;  %v382_v57 = vpop.f32.mrf.mxu1 }
 0x119   :  { %7100 = vst [vmem:[#allocation7_spill] sm:$0xff] %v4725_v50 }
 0x11a   :  { %7101 = vst [vmem:[#allocation8_spill] sm:$0xff] %v4727_v61  ;;  %3358 = vmatmul.msk.f32.gmra.mxu0 %vm131_vm0, %v4193_v62  ;;  %3386 = vmatmul.msk.f32.gmra.mxu1 %vm131_vm0, %v4193_v62  ;;  %v1627_v61 = vld [vmem:[%s7080_s3] sm:$0xff] }
 0x11b   :  { %3438 = vmatmul.msk.f32.gmra.mxu2 %vm131_vm0, %v4212_v1  ;;  %3466 = vmatmul.msk.f32.gmra.mxu3 %vm131_vm0, %v4212_v1 }
 0x11e   :  { %v486_v55 = vpop.f32.mrf.mxu2  ;;  %v587_v58 = vpop.f32.mrf.mxu3 }
 0x11f   :  { %v4737_v29 = vadd.f32 %v486_v55, %v281_v54  ;;  %v4739_v30 = vadd.f32 %v587_v58, %v382_v57  ;;  %v284_v56 = vpop.f32.mrf.mxu0  ;;  %v385_v32 = vpop.f32.mrf.mxu1 }
 0x121   :  { %7102 = vst [vmem:[#allocation9_spill] sm:$0xff] %v4737_v29 }
 0x122   :  { %7103 = vst [vmem:[#allocation10_spill] sm:$0xff] %v4739_v30  ;;  %3359 = vmatmul.msk.f32.gmra.mxu0 %vm131_vm0, %v4212_v1  ;;  %3387 = vmatmul.msk.f32.gmra.mxu1 %vm131_vm0, %v4212_v1  ;;  %v3504_v30 = vld [vmem:[%s7078_s1 + $0x370] sm:$0xff]  ;;  %v3505_v1 = vld [vmem:[%s7078_s1 + $0x378] sm:$0xff] }
 0x123   :  { %3439 = vmatmul.msk.f32.gmra.mxu2 %vm131_vm0, %v4225_v2  ;;  %3467 = vmatmul.msk.f32.gmra.mxu3 %vm131_vm0, %v4225_v2 }
 0x124   :  { %1231 = vmatpush.msra.mxu0 %v3504_v30  ;;  %1332 = vmatpush.msra.mxu1 %v3505_v1 }
 0x126   :  { %v489_v62 = vpop.f32.mrf.mxu2  ;;  %v590_v35 = vpop.f32.mrf.mxu3 }
 0x127   :  { %v4749_v54 = vadd.f32 %v489_v62, %v284_v56  ;;  %v4751_v57 = vadd.f32 %v590_v35, %v385_v32  ;;  %v287_v55 = vpop.f32.mrf.mxu0  ;;  %v388_v58 = vpop.f32.mrf.mxu1 }
 0x129   :  { %7104 = vst [vmem:[#allocation11_spill] sm:$0xff] %v4749_v54  ;;  %v1639_v54 = vld [vmem:[%s7080_s3 + $0x60] sm:$0xff] }
 0x12a   :  { %7105 = vst [vmem:[#allocation12_spill] sm:$0xff] %v4751_v57  ;;  %3360 = vmatmul.msk.f32.gmra.mxu0 %vm131_vm0, %v4225_v2  ;;  %3388 = vmatmul.msk.f32.gmra.mxu1 %vm131_vm0, %v4225_v2 }
 0x12b   :  { %3440 = vmatmul.msk.f32.gmra.mxu2 %vm131_vm0, %v4244_v5  ;;  %3468 = vmatmul.msk.f32.gmra.mxu3 %vm131_vm0, %v4244_v5 }
 0x12e   :  { %v492_v56 = vpop.f32.mrf.mxu2  ;;  %v593_v32 = vpop.f32.mrf.mxu3 }
 0x12f   :  { %v4767_v62 = vadd.f32 %v492_v56, %v287_v55  ;;  %v4769_v35 = vadd.f32 %v593_v32, %v388_v58  ;;  %v290_v30 = vpop.f32.mrf.mxu0  ;;  %v391_v1 = vpop.f32.mrf.mxu1 }
 0x131   :  { %7106 = vst [vmem:[#allocation13_spill] sm:$0xff] %v4767_v62 }
 0x132   :  { %7107 = vst [vmem:[#allocation14_spill] sm:$0xff] %v4769_v35  ;;  %3361 = vmatmul.msk.f32.gmra.mxu0 %vm131_vm0, %v4244_v5  ;;  %3389 = vmatmul.msk.f32.gmra.mxu1 %vm131_vm0, %v4244_v5  ;;  %v3502_v35 = vld [vmem:[%s7078_s1 + $0x360] sm:$0xff]  ;;  %v3503_v5 = vld [vmem:[%s7078_s1 + $0x368] sm:$0xff] }
 0x133   :  { %3441 = vmatmul.msk.f32.gmra.mxu2 %vm131_vm0, %v4257_v6  ;;  %3469 = vmatmul.msk.f32.gmra.mxu3 %vm131_vm0, %v4257_v6 }
 0x134   :  { %1232 = vmatpush.msra.mxu0 %v3502_v35  ;;  %1333 = vmatpush.msra.mxu1 %v3503_v5 }
 0x136   :  { %v495_v2 = vpop.f32.mrf.mxu2  ;;  %v596_v57 = vpop.f32.mrf.mxu3 }
 0x137   :  { %v4779_v55 = vadd.f32 %v495_v2, %v290_v30  ;;  %v4781_v58 = vadd.f32 %v596_v57, %v391_v1  ;;  %v293_v56 = vpop.f32.mrf.mxu0  ;;  %v394_v32 = vpop.f32.mrf.mxu1 }
 0x139   :  { %7108 = vst [vmem:[#allocation15_spill] sm:$0xff] %v4779_v55  ;;  %v3860_v55 = vld [vmem:[%s7079_s0 + $0x38] sm:$0xff] }
 0x13a   :  { %7109 = vst [vmem:[#allocation16_spill] sm:$0xff] %v4781_v58  ;;  %3362 = vmatmul.msk.f32.gmra.mxu0 %vm131_vm0, %v4257_v6  ;;  %3390 = vmatmul.msk.f32.gmra.mxu1 %vm131_vm0, %v4257_v6 }
 0x13b   :  { %3442 = vmatmul.msk.f32.gmra.mxu2 %vm131_vm0, %v4270_v7  ;;  %3470 = vmatmul.msk.f32.gmra.mxu3 %vm131_vm0, %v4270_v7 }
 0x13e   :  { %v498_v57 = vpop.f32.mrf.mxu2  ;;  %v599_v30 = vpop.f32.mrf.mxu3 }
 0x13f   :  { %v4797_v1 = vadd.f32 %v498_v57, %v293_v56  ;;  %v4799_v2 = vadd.f32 %v599_v30, %v394_v32  ;;  %v296_v35 = vpop.f32.mrf.mxu0  ;;  %v397_v5 = vpop.f32.mrf.mxu1 }
 0x141   :  { %7110 = vst [vmem:[#allocation17_spill] sm:$0xff] %v4797_v1 }
 0x142   :  { %7111 = vst [vmem:[#allocation18_spill] sm:$0xff] %v4799_v2  ;;  %3363 = vmatmul.msk.f32.gmra.mxu0 %vm131_vm0, %v4270_v7  ;;  %3391 = vmatmul.msk.f32.gmra.mxu1 %vm131_vm0, %v4270_v7  ;;  %v3500_v7 = vld [vmem:[%s7078_s1 + $0x350] sm:$0xff] }
 0x143   :  { %3443 = vmatmul.msk.f32.gmra.mxu2 %vm131_vm0, %v4289_v10  ;;  %3471 = vmatmul.msk.f32.gmra.mxu3 %vm131_vm0, %v4289_v10  ;;  %v3859_v2 = vld [vmem:[%s7079_s0 + $0x30] sm:$0xff] }
 0x144   :  { %1233 = vmatpush.msra.mxu0 %v3500_v7 }
 0x146   :  { %v501_v6 = vpop.f32.mrf.mxu2  ;;  %v602_v58 = vpop.f32.mrf.mxu3 }
 0x147   :  { %v4809_v56 = vadd.f32 %v501_v6, %v296_v35  ;;  %v4811_v32 = vadd.f32 %v602_v58, %v397_v5  ;;  %v299_v57 = vpop.f32.mrf.mxu0  ;;  %v400_v30 = vpop.f32.mrf.mxu1  ;;  %v3501_v58 = vld [vmem:[%s7078_s1 + $0x358] sm:$0xff] }
 0x148   :  { %1334 = vmatpush.msra.mxu1 %v3501_v58 }
 0x149   :  { %7112 = vst [vmem:[#allocation19_spill] sm:$0xff] %v4809_v56 }
 0x14a   :  { %7113 = vst [vmem:[#allocation20_spill] sm:$0xff] %v4811_v32  ;;  %3364 = vmatmul.msk.f32.gmra.mxu0 %vm131_vm0, %v4289_v10  ;;  %3392 = vmatmul.msk.f32.gmra.mxu1 %vm131_vm0, %v4289_v10 }
 0x14b   :  { %3444 = vmatmul.msk.f32.gmra.mxu2 %vm131_vm0, %v4302_v11  ;;  %3472 = vmatmul.msk.f32.gmra.mxu3 %vm131_vm0, %v4302_v11 }
 0x14e   :  { %v504_v35 = vpop.f32.mrf.mxu2  ;;  %v605_v5 = vpop.f32.mrf.mxu3 }
 0x14f   :  { %v4827_v6 = vadd.f32 %v504_v35, %v299_v57  ;;  %v4829_v10 = vadd.f32 %v605_v5, %v400_v30  ;;  %v302_v32 = vpop.f32.mrf.mxu0  ;;  %v403_v56 = vpop.f32.mrf.mxu1 }
 0x151   :  { %7114 = vst [vmem:[#allocation21_spill] sm:$0xff] %v4827_v6 }
 0x152   :  { %7115 = vst [vmem:[#allocation22_spill] sm:$0xff] %v4829_v10  ;;  %3365 = vmatmul.msk.f32.gmra.mxu0 %vm131_vm0, %v4302_v11  ;;  %3393 = vmatmul.msk.f32.gmra.mxu1 %vm131_vm0, %v4302_v11 }
 0x153   :  { %3445 = vmatmul.msk.f32.gmra.mxu2 %vm131_vm0, %v4315_v12  ;;  %3473 = vmatmul.msk.f32.gmra.mxu3 %vm131_vm0, %v4315_v12 }
 0x156   :  { %v507_v7 = vpop.f32.mrf.mxu2  ;;  %v608_v58 = vpop.f32.mrf.mxu3 }
 0x157   :  { %v4839_v57 = vadd.f32 %v507_v7, %v302_v32  ;;  %v4841_v30 = vadd.f32 %v608_v58, %v403_v56  ;;  %v305_v35 = vpop.f32.mrf.mxu0  ;;  %v406_v5 = vpop.f32.mrf.mxu1 }
 0x159   :  { %7116 = vst [vmem:[#allocation23_spill] sm:$0xff] %v4839_v57  ;;  %v3858_v57 = vld [vmem:[%s7079_s0 + $0x28] sm:$0xff] }
 0x15a   :  { %7117 = vst [vmem:[#allocation24_spill] sm:$0xff] %v4841_v30  ;;  %3366 = vmatmul.msk.f32.gmra.mxu0 %vm131_vm0, %v4315_v12  ;;  %3394 = vmatmul.msk.f32.gmra.mxu1 %vm131_vm0, %v4315_v12  ;;  %v3498_v30 = vld [vmem:[%s7078_s1 + $0x340] sm:$0xff]  ;;  %v3499_v12 = vld [vmem:[%s7078_s1 + $0x348] sm:$0xff] }
 0x15b   :  { %3446 = vmatmul.msk.f32.gmra.mxu2 %vm131_vm0, %v4334_v15  ;;  %3474 = vmatmul.msk.f32.gmra.mxu3 %vm131_vm0, %v4334_v15 }
 0x15c   :  { %1234 = vmatpush.msra.mxu0 %v3498_v30  ;;  %1335 = vmatpush.msra.mxu1 %v3499_v12 }
 0x15e   :  { %v510_v11 = vpop.f32.mrf.mxu2  ;;  %v611_v10 = vpop.f32.mrf.mxu3 }
 0x15f   :  { %v4851_v32 = vadd.f32 %v510_v11, %v305_v35  ;;  %v4853_v56 = vadd.f32 %v611_v10, %v406_v5  ;;  %v308_v7 = vpop.f32.mrf.mxu0  ;;  %v409_v58 = vpop.f32.mrf.mxu1 }
 0x161   :  { %7118 = vst [vmem:[#allocation25_spill] sm:$0xff] %v4851_v32  ;;  %v1641_v32 = vld [vmem:[%s7080_s3 + $0x70] sm:$0xff] }
 0x162   :  { %7119 = vst [vmem:[#allocation26_spill] sm:$0xff] %v4853_v56  ;;  %3367 = vmatmul.msk.f32.gmra.mxu0 %vm131_vm0, %v4334_v15  ;;  %3395 = vmatmul.msk.f32.gmra.mxu1 %vm131_vm0, %v4334_v15 }
 0x163   :  { %3447 = vmatmul.msk.f32.gmra.mxu2 %vm131_vm0, %v4347_v16  ;;  %3475 = vmatmul.msk.f32.gmra.mxu3 %vm131_vm0, %v4347_v16 }
 0x166   :  { %v513_v10 = vpop.f32.mrf.mxu2  ;;  %v614_v35 = vpop.f32.mrf.mxu3 }
 0x167   :  { %v4869_v5 = vadd.f32 %v513_v10, %v308_v7  ;;  %v4871_v11 = vadd.f32 %v614_v35, %v409_v58  ;;  %v311_v30 = vpop.f32.mrf.mxu0  ;;  %v412_v12 = vpop.f32.mrf.mxu1 }
 0x169   :  { %7120 = vst [vmem:[#allocation27_spill] sm:$0xff] %v4869_v5 }
 0x16a   :  { %7121 = vst [vmem:[#allocation28_spill] sm:$0xff] %v4871_v11  ;;  %3368 = vmatmul.msk.f32.gmra.mxu0 %vm131_vm0, %v4347_v16  ;;  %3396 = vmatmul.msk.f32.gmra.mxu1 %vm131_vm0, %v4347_v16  ;;  %v3496_v11 = vld [vmem:[%s7078_s1 + $0x330] sm:$0xff]  ;;  %v3497_v16 = vld [vmem:[%s7078_s1 + $0x338] sm:$0xff] }
 0x16b   :  { %3448 = vmatmul.msk.f32.gmra.mxu2 %vm131_vm0, %v4366_v21  ;;  %3476 = vmatmul.msk.f32.gmra.mxu3 %vm131_vm0, %v4366_v21 }
 0x16c   :  { %1235 = vmatpush.msra.mxu0 %v3496_v11  ;;  %1336 = vmatpush.msra.mxu1 %v3497_v16 }
 0x16e   :  { %v516_v15 = vpop.f32.mrf.mxu2  ;;  %v617_v56 = vpop.f32.mrf.mxu3 }
 0x16f   :  { %v4881_v7 = vadd.f32 %v516_v15, %v311_v30  ;;  %v4883_v58 = vadd.f32 %v617_v56, %v412_v12  ;;  %v314_v10 = vpop.f32.mrf.mxu0  ;;  %v415_v35 = vpop.f32.mrf.mxu1 }
 0x171   :  { %7122 = vst [vmem:[#allocation29_spill] sm:$0xff] %v4881_v7 }
 0x172   :  { %7123 = vst [vmem:[#allocation30_spill] sm:$0xff] %v4883_v58  ;;  %3369 = vmatmul.msk.f32.gmra.mxu0 %vm131_vm0, %v4366_v21  ;;  %3397 = vmatmul.msk.f32.gmra.mxu1 %vm131_vm0, %v4366_v21 }
 0x173   :  { %3449 = vmatmul.msk.f32.gmra.mxu2 %vm131_vm0, %v4383_v28  ;;  %3477 = vmatmul.msk.f32.gmra.mxu3 %vm131_vm0, %v4383_v28 }
 0x176   :  { %v519_v56 = vpop.f32.mrf.mxu2  ;;  %v620_v30 = vpop.f32.mrf.mxu3 }
 0x177   :  { %v4899_v12 = vadd.f32 %v519_v56, %v314_v10  ;;  %v4901_v15 = vadd.f32 %v620_v30, %v415_v35  ;;  %v668_v11 = vpop.f32.mrf.mxu0  ;;  %v769_v16 = vpop.f32.mrf.mxu1 }
 0x178   :  { %v853_v21 = vadd.f32 %v668_v11, %v4376_v24  ;;  %v854_v10 = vadd.f32 %v769_v16, %v4378_v25  ;;  %v3494_v24 = vld [vmem:[%s7078_s1 + $0x320] sm:$0xff]  ;;  %v3495_v25 = vld [vmem:[%s7078_s1 + $0x328] sm:$0xff] }
 0x179   :  { %7124 = vst [vmem:[#allocation31_spill] sm:$0xff] %v4899_v12  ;;  %1236 = vmatpush.msra.mxu0 %v3494_v24  ;;  %1337 = vmatpush.msra.mxu1 %v3495_v25 }
 0x17a   :  { %7125 = vst [vmem:[#allocation32_spill] sm:$0xff] %v4901_v15  ;;  %3370 = vmatmul.msk.f32.gmra.mxu0 %vm131_vm0, %v4383_v28  ;;  %3398 = vmatmul.msk.f32.gmra.mxu1 %vm131_vm0, %v4383_v28 }
 0x17b   :  { %3450 = vmatmul.msk.f32.gmra.mxu2 %vm131_vm0, %v4406_v37  ;;  %3478 = vmatmul.msk.f32.gmra.mxu3 %vm131_vm0, %v4406_v37 }
 0x17e   :  { %v954_v35 = vpop.f32.mrf.mxu2  ;;  %v1055_v56 = vpop.f32.mrf.mxu3 }
 0x17f   :  { %v4913_v30 = vadd.f32 %v954_v35, %v853_v21  ;;  %v4915_v15 = vadd.f32 %v1055_v56, %v854_v10  ;;  %v671_v12 = vpop.f32.mrf.mxu0  ;;  %v772_v58 = vpop.f32.mrf.mxu1 }
 0x180   :  { %v855_v28 = vadd.f32 %v671_v12, %v4399_v33 }
 0x182   :  { %3371 = vmatmul.msk.f32.gmra.mxu0 %vm131_vm0, %v4406_v37  ;;  %3399 = vmatmul.msk.f32.gmra.mxu1 %vm131_vm0, %v4406_v37  ;;  %v856_v37 = vadd.f32 %v772_v58, %v4401_v34 }
 0x183   :  { %3451 = vmatmul.msk.f32.gmra.mxu2 %vm131_vm0, %v4423_v44  ;;  %3479 = vmatmul.msk.f32.gmra.mxu3 %vm131_vm0, %v4423_v44 }
 0x186   :  { %v957_v11 = vpop.f32.mrf.mxu2  ;;  %v1058_v16 = vpop.f32.mrf.mxu3 }
 0x187   :  { %v4933_v21 = vadd.f32 %v957_v11, %v855_v28  ;;  %v4935_v10 = vadd.f32 %v1058_v16, %v856_v37  ;;  %v674_v35 = vpop.f32.mrf.mxu0  ;;  %v775_v56 = vpop.f32.mrf.mxu1 }
 0x188   :  { %v857_v33 = vadd.f32 %v674_v35, %v4416_v40  ;;  %v858_v34 = vadd.f32 %v775_v56, %v4418_v41 }
 0x18a   :  { %3372 = vmatmul.msk.f32.gmra.mxu0 %vm131_vm0, %v4423_v44  ;;  %3400 = vmatmul.msk.f32.gmra.mxu1 %vm131_vm0, %v4423_v44 }
 0x18b   :  { %3452 = vmatmul.msk.f32.gmra.mxu2 %vm131_vm0, %v4440_v51  ;;  %3480 = vmatmul.msk.f32.gmra.mxu3 %vm131_vm0, %v4440_v51 }
 0x18e   :  { %v960_v58 = vpop.f32.mrf.mxu2  ;;  %v1061_v12 = vpop.f32.mrf.mxu3 }
 0x18f   :  { %v4947_v24 = vadd.f32 %v960_v58, %v857_v33  ;;  %v4949_v25 = vadd.f32 %v1061_v12, %v858_v34  ;;  %v677_v28 = vpop.f32.mrf.mxu0  ;;  %v778_v37 = vpop.f32.mrf.mxu1  ;;  %v3490_v12 = vld [vmem:[%s7078_s1 + $0x300] sm:$0xff] }
 0x190   :  { %v859_v40 = vadd.f32 %v677_v28, %v4433_v47  ;;  %v860_v41 = vadd.f32 %v778_v37, %v4435_v48  ;;  %v3493_v47 = vld [vmem:[%s7078_s1 + $0x318] sm:$0xff]  ;;  %v3491_v28 = vld [vmem:[%s7078_s1 + $0x308] sm:$0xff] }
 0x191   :  { %1338 = vmatpush.msra.mxu1 %v3493_v47  ;;  %v5073_v47 = vld [vmem:[%s7079_s0 + $0xf0] sm:$0xff] }
 0x192   :  { %3373 = vmatmul.msk.f32.gmra.mxu0 %vm131_vm0, %v4440_v51  ;;  %3401 = vmatmul.msk.f32.gmra.mxu1 %vm131_vm0, %v4440_v51  ;;  %v3492_v51 = vld [vmem:[%s7078_s1 + $0x310] sm:$0xff] }
 0x193   :  { %3453 = vmatmul.msk.f32.gmra.mxu2 %vm131_vm0, %v4463_v3  ;;  %3481 = vmatmul.msk.f32.gmra.mxu3 %vm131_vm0, %v4463_v3 }
 0x194   :  { %1237 = vmatpush.msra.mxu0 %v3492_v51  ;;  %1339 = vmatpush.msra.mxu1 %v3491_v28 }
 0x196   :  { %v963_v44 = vpop.f32.mrf.mxu2  ;;  %v1064_v11 = vpop.f32.mrf.mxu3  ;;  %1238 = vmatpush.msra.mxu0 %v3490_v12  ;;  %v1642_v12 = vld [vmem:[%s7080_s3 + $0x78] sm:$0xff] }
 0x197   :  { %v4961_v16 = vadd.f32 %v963_v44, %v859_v40  ;;  %v4963_v35 = vadd.f32 %v1064_v11, %v860_v41  ;;  %v4965_v56 = vpop.f32.mrf.mxu0  ;;  %v4967_v33 = vpop.f32.mrf.mxu1  ;;  %v5056_v11 = vld [vmem:[%s7079_s0 + $0xe8] sm:$0xff]  ;;  %1691 = vmatpush.msra.mxu2 %v1642_v12  ;;  %v3857_v12 = vld [vmem:[%s7079_s0 + $0x20] sm:$0xff] }
 0x199   :  { %1692 = vmatpush.msra.mxu2 %v1641_v32  ;;  %v1640_v32 = vld [vmem:[%s7080_s3 + $0x68] sm:$0xff] }
 0x19a   :  { %3374 = vmatmul.msk.f32.gmra.mxu0 %vm131_vm0, %v4463_v3  ;;  %3402 = vmatmul.msk.f32.gmra.mxu1 %vm131_vm0, %v4463_v3 }
 0x19b   :  { %3454 = vmatmul.msk.f32.gmra.mxu2 %vm131_vm0, %v4488_v18  ;;  %3482 = vmatmul.msk.f32.gmra.mxu3 %vm131_vm0, %v4488_v18 }
 0x19c   :  { %1693 = vmatpush.msra.mxu2 %v1640_v32  ;;  %v3861_v32 = vld [vmem:[%s7079_s0 + $0x40] sm:$0xff] }
 0x19e   :  { %1694 = vmatpush.msra.mxu2 %v1639_v54 }
 0x19f   :  { %v4983_v48 = vpop.f32.mrf.mxu0  ;;  %v4985_v34 = vpop.f32.mrf.mxu1 }
 0x1a2   :  { %3375 = vmatmul.msk.f32.gmra.mxu0 %vm131_vm0, %v4488_v18  ;;  %3403 = vmatmul.msk.f32.gmra.mxu1 %vm131_vm0, %v4488_v18 }
 0x1a3   :  { %3455 = vmatmul.msk.f32.gmra.mxu2 %vm131_vm0, %v4539_v52  ;;  %3483 = vmatmul.msk.f32.gmra.mxu3 %vm131_vm0, %v4539_v52 }
 0x1a7   :  { %v4995_v3 = vpop.f32.mrf.mxu0  ;;  %v4997_v58 = vpop.f32.mrf.mxu1 }
 0x1aa   :  { %3376 = vmatmul.msk.f32.gmra.mxu0 %vm131_vm0, %v4539_v52  ;;  %3404 = vmatmul.msk.f32.gmra.mxu1 %vm131_vm0, %v4539_v52 }
 0x1ab   :  { %3456 = vmatmul.msk.f32.gmra.mxu2 %vm131_vm0, %v4574_v23  ;;  %3484 = vmatmul.msk.f32.gmra.mxu3 %vm131_vm0, %v4574_v23 }
 0x1af   :  { %v5013_v18 = vpop.f32.mrf.mxu0  ;;  %v5015_v37 = vpop.f32.mrf.mxu1 }
 0x1b2   :  { %3377 = vmatmul.msk.f32.gmra.mxu0 %vm131_vm0, %v4574_v23  ;;  %3405 = vmatmul.msk.f32.gmra.mxu1 %vm131_vm0, %v4574_v23 }
 0x1b3   :  { %3457 = vmatmul.msk.f32.gmra.mxu2 %vm131_vm0, %v4615_v53  ;;  %3485 = vmatmul.msk.f32.gmra.mxu3 %vm131_vm0, %v4615_v53 }
 0x1b7   :  { %v5025_v52 = vpop.f32.mrf.mxu0  ;;  %v5027_v40 = vpop.f32.mrf.mxu1 }
 0x1ba   :  { %3378 = vmatmul.msk.f32.gmra.mxu0 %vm131_vm0, %v4615_v53  ;;  %3406 = vmatmul.msk.f32.gmra.mxu1 %vm131_vm0, %v4615_v53 }
 0x1bb   :  { %3458 = vmatmul.msk.f32.gmra.mxu2 %vm131_vm0, %v4632_v9  ;;  %3486 = vmatmul.msk.f32.gmra.mxu3 %vm131_vm0, %v4632_v9 }
 0x1bf   :  { %v5037_v23 = vpop.f32.mrf.mxu0  ;;  %v5039_v41 = vpop.f32.mrf.mxu1 }
 0x1c2   :  { %3379 = vmatmul.msk.f32.gmra.mxu0 %vm131_vm0, %v4632_v9  ;;  %3407 = vmatmul.msk.f32.gmra.mxu1 %vm131_vm0, %v4632_v9 }
 0x1c3   :  { %3459 = vmatmul.msk.f32.gmra.mxu2 %vm131_vm0, %v4649_v31  ;;  %3487 = vmatmul.msk.f32.gmra.mxu3 %vm131_vm0, %v4649_v31 }
 0x1c7   :  { %v5049_v53 = vpop.f32.mrf.mxu0  ;;  %v5051_v44 = vpop.f32.mrf.mxu1 }
 0x1ca   :  { %3380 = vmatmul.msk.f32.gmra.mxu0 %vm131_vm0, %v4649_v31  ;;  %3408 = vmatmul.msk.f32.gmra.mxu1 %vm131_vm0, %v4649_v31  ;;  %v1647_v31 = vld [vmem:[%s7080_s3 + $0xa0] sm:$0xff] }
 0x1cb   :  { %3460 = vmatmul.msk.f32.gmra.mxu2 %vm131_vm0, %v5056_v11  ;;  %3488 = vmatmul.msk.f32.gmra.mxu3 %vm131_vm0, %v5056_v11 }
 0x1cc   :  { %1761 = vmatpush.msra.mxu3 %v1647_v31 }
 0x1cf   :  { %v5066_v9 = vpop.f32.mrf.mxu0  ;;  %v5068_v51 = vpop.f32.mrf.mxu1 }
 0x1d2   :  { %3381 = vmatmul.msk.f32.gmra.mxu0 %vm131_vm0, %v5056_v11  ;;  %3409 = vmatmul.msk.f32.gmra.mxu1 %vm131_vm0, %v5056_v11 }
 0x1d3   :  { %3461 = vmatmul.msk.f32.gmra.mxu2 %vm131_vm0, %v5073_v47  ;;  %3489 = vmatmul.msk.f32.gmra.mxu3 %vm131_vm0, %v5073_v47 }
 0x1d7   :  { %v5089_v28 = vpop.f32.mrf.mxu0  ;;  %v5091_v7 = vpop.f32.mrf.mxu1 }
 0x1d8   :  { %7126 = vst [vmem:[#allocation33_spill] sm:$0xff] %v5089_v28 }
 0x1d9   :  { %7127 = vst [vmem:[#allocation34_spill] sm:$0xff] %v5091_v7 }
 0x1da   :  { %3514 = vmatmul.msk.f32.vlgmr.msra.gmra.mxu0 %vm131_vm0, %v3857_v12  ;;  %3542 = vmatmul.msk.f32.vlgmr.msra.gmra.mxu1 %vm131_vm0, %v3857_v12 }
 0x1df   :  { %v5098_v31 = vpop.f32.mrf.mxu0  ;;  %v5100_v5 = vpop.f32.mrf.mxu1 }
 0x1e0   :  { %7128 = vst [vmem:[#allocation35_spill] sm:$0xff] %v5098_v31 }
 0x1e1   :  { %7129 = vst [vmem:[#allocation36_spill] sm:$0xff] %v5100_v5 }
 0x1e2   :  { %3515 = vmatmul.msk.f32.gmra.mxu0 %vm131_vm0, %v3858_v57  ;;  %3543 = vmatmul.msk.f32.gmra.mxu1 %vm131_vm0, %v3858_v57 }
 0x1e7   :  { %v5110_v6 = vpop.f32.mrf.mxu0  ;;  %v5112_v12 = vpop.f32.mrf.mxu1 }
 0x1e8   :  { %7130 = vst [vmem:[#allocation37_spill] sm:$0xff] %v5110_v6 }
 0x1e9   :  { %7131 = vst [vmem:[#allocation38_spill] sm:$0xff] %v5112_v12 }
 0x1ea   :  { %3516 = vmatmul.msk.f32.gmra.mxu0 %vm131_vm0, %v3859_v2  ;;  %3544 = vmatmul.msk.f32.gmra.mxu1 %vm131_vm0, %v3859_v2 }
 0x1ef   :  { %v5122_v1 = vpop.f32.mrf.mxu0  ;;  %v5124_v57 = vpop.f32.mrf.mxu1 }
 0x1f0   :  { %7132 = vst [vmem:[#allocation39_spill] sm:$0xff] %v5122_v1  ;;  %v3871_v1 = vld [vmem:[%s7079_s0 + $0x90] sm:$0xff] }
 0x1f1   :  { %7133 = vst [vmem:[#allocation40_spill] sm:$0xff] %v5124_v57  ;;  %v1631_v57 = vld [vmem:[%s7080_s3 + $0x20] sm:$0xff] }
 0x1f2   :  { %3517 = vmatmul.msk.f32.gmra.mxu0 %vm131_vm0, %v3860_v55  ;;  %3545 = vmatmul.msk.f32.gmra.mxu1 %vm131_vm0, %v3860_v55 }
 0x1f7   :  { %v5131_v62 = vpop.f32.mrf.mxu0  ;;  %v5133_v2 = vpop.f32.mrf.mxu1 }
 0x1f8   :  { %7134 = vst [vmem:[#allocation41_spill] sm:$0xff] %v5131_v62  ;;  %v3862_v62 = vld [vmem:[%s7079_s0 + $0x48] sm:$0xff] }
 0x1f9   :  { %7135 = vst [vmem:[#allocation42_spill] sm:$0xff] %v5133_v2  ;;  %v1646_v2 = vld [vmem:[%s7080_s3 + $0x98] sm:$0xff] }
 0x1fa   :  { %3518 = vmatmul.msk.f32.gmra.mxu0 %vm131_vm0, %v3861_v32  ;;  %3546 = vmatmul.msk.f32.gmra.mxu1 %vm131_vm0, %v3861_v32 }
 0x1fb   :  { %1762 = vmatpush.msra.mxu3 %v1646_v2  ;;  %v3863_v2 = vld [vmem:[%s7079_s0 + $0x50] sm:$0xff] }
 0x1ff   :  { %v5143_v29 = vpop.f32.mrf.mxu0  ;;  %v5145_v55 = vpop.f32.mrf.mxu1 }
 0x200   :  { %7136 = vst [vmem:[#allocation43_spill] sm:$0xff] %v5143_v29 }
 0x201   :  { %7137 = vst [vmem:[#allocation44_spill] sm:$0xff] %v5145_v55  ;;  %v1638_v55 = vld [vmem:[%s7080_s3 + $0x58] sm:$0xff] }
 0x202   :  { %3519 = vmatmul.msk.f32.gmra.mxu0 %vm131_vm0, %v3862_v62  ;;  %3547 = vmatmul.msk.f32.gmra.mxu1 %vm131_vm0, %v3862_v62 }
 0x203   :  { %1695 = vmatpush.msra.mxu2 %v1638_v55 }
 0x207   :  { %v5155_v32 = vpop.f32.mrf.mxu0  ;;  %v5157_v54 = vpop.f32.mrf.mxu1 }
 0x208   :  { %7138 = vst [vmem:[#allocation45_spill] sm:$0xff] %v5155_v32 }
 0x209   :  { %7139 = vst [vmem:[#allocation46_spill] sm:$0xff] %v5157_v54  ;;  %v3864_v54 = vld [vmem:[%s7079_s0 + $0x58] sm:$0xff] }
 0x20a   :  { %3520 = vmatmul.msk.f32.gmra.mxu0 %vm131_vm0, %v3863_v2  ;;  %3548 = vmatmul.msk.f32.gmra.mxu1 %vm131_vm0, %v3863_v2  ;;  %v1637_v2 = vld [vmem:[%s7080_s3 + $0x50] sm:$0xff] }
 0x20b   :  { %1696 = vmatpush.msra.mxu2 %v1637_v2  ;;  %v1636_v2 = vld [vmem:[%s7080_s3 + $0x48] sm:$0xff] }
 0x20d   :  { %1697 = vmatpush.msra.mxu2 %v1636_v2 }
 0x20f   :  { %v5167_v29 = vpop.f32.mrf.mxu0  ;;  %v5169_v62 = vpop.f32.mrf.mxu1 }
 0x210   :  { %7140 = vst [vmem:[#allocation47_spill] sm:$0xff] %v5167_v29 }
 0x211   :  { %7141 = vst [vmem:[#allocation48_spill] sm:$0xff] %v5169_v62  ;;  %v3865_v62 = vld [vmem:[%s7079_s0 + $0x60] sm:$0xff] }
 0x212   :  { %3521 = vmatmul.msk.f32.gmra.mxu0 %vm131_vm0, %v3864_v54  ;;  %3549 = vmatmul.msk.f32.gmra.mxu1 %vm131_vm0, %v3864_v54 }
 0x217   :  { %v5176_v55 = vpop.f32.mrf.mxu0  ;;  %v5178_v32 = vpop.f32.mrf.mxu1 }
 0x218   :  { %7142 = vst [vmem:[#allocation49_spill] sm:$0xff] %v5176_v55 }
 0x219   :  { %7143 = vst [vmem:[#allocation50_spill] sm:$0xff] %v5178_v32  ;;  %v3866_v32 = vld [vmem:[%s7079_s0 + $0x68] sm:$0xff] }
 0x21a   :  { %3522 = vmatmul.msk.f32.gmra.mxu0 %vm131_vm0, %v3865_v62  ;;  %3550 = vmatmul.msk.f32.gmra.mxu1 %vm131_vm0, %v3865_v62 }
 0x21f   :  { %v5188_v29 = vpop.f32.mrf.mxu0  ;;  %v5190_v54 = vpop.f32.mrf.mxu1 }
 0x220   :  { %7144 = vst [vmem:[#allocation51_spill] sm:$0xff] %v5188_v29 }
 0x221   :  { %7145 = vst [vmem:[#allocation52_spill] sm:$0xff] %v5190_v54  ;;  %v3867_v54 = vld [vmem:[%s7079_s0 + $0x70] sm:$0xff] }
 0x222   :  { %3523 = vmatmul.msk.f32.gmra.mxu0 %vm131_vm0, %v3866_v32  ;;  %3551 = vmatmul.msk.f32.gmra.mxu1 %vm131_vm0, %v3866_v32  ;;  %v1645_v32 = vld [vmem:[%s7080_s3 + $0x90] sm:$0xff] }
 0x223   :  { %1763 = vmatpush.msra.mxu3 %v1645_v32 }
 0x227   :  { %v5200_v55 = vpop.f32.mrf.mxu0  ;;  %v5202_v62 = vpop.f32.mrf.mxu1 }
 0x228   :  { %7146 = vst [vmem:[#allocation53_spill] sm:$0xff] %v5200_v55 }
 0x229   :  { %7147 = vst [vmem:[#allocation54_spill] sm:$0xff] %v5202_v62  ;;  %v3868_v62 = vld [vmem:[%s7079_s0 + $0x78] sm:$0xff] }
 0x22a   :  { %3524 = vmatmul.msk.f32.gmra.mxu0 %vm131_vm0, %v3867_v54  ;;  %3552 = vmatmul.msk.f32.gmra.mxu1 %vm131_vm0, %v3867_v54  ;;  %v1635_v54 = vld [vmem:[%s7080_s3 + $0x40] sm:$0xff] }
 0x22b   :  { %1698 = vmatpush.msra.mxu2 %v1635_v54  ;;  %v1632_v54 = vld [vmem:[%s7080_s3 + $0x28] sm:$0xff] }
 0x22f   :  { %v5212_v29 = vpop.f32.mrf.mxu0  ;;  %v5214_v2 = vpop.f32.mrf.mxu1 }
 0x230   :  { %7148 = vst [vmem:[#allocation55_spill] sm:$0xff] %v5212_v29  ;;  %v3869_v29 = vld [vmem:[%s7079_s0 + $0x80] sm:$0xff] }
 0x231   :  { %7149 = vst [vmem:[#allocation56_spill] sm:$0xff] %v5214_v2  ;;  %v1634_v2 = vld [vmem:[%s7080_s3 + $0x38] sm:$0xff] }
 0x232   :  { %3525 = vmatmul.msk.f32.gmra.mxu0 %vm131_vm0, %v3868_v62  ;;  %3553 = vmatmul.msk.f32.gmra.mxu1 %vm131_vm0, %v3868_v62  ;;  %v1633_v62 = vld [vmem:[%s7080_s3 + $0x30] sm:$0xff] }
 0x233   :  { %1699 = vmatpush.msra.mxu2 %v1634_v2  ;;  %v3870_v2 = vld [vmem:[%s7079_s0 + $0x88] sm:$0xff] }
 0x235   :  { %1700 = vmatpush.msra.mxu2 %v1633_v62  ;;  %v1629_v62 = vld [vmem:[%s7080_s3 + $0x10] sm:$0xff] }
 0x237   :  { %v5224_v55 = vpop.f32.mrf.mxu0  ;;  %v5226_v32 = vpop.f32.mrf.mxu1  ;;  %1701 = vmatpush.msra.mxu2 %v1632_v54 }
 0x238   :  { %7150 = vst [vmem:[#allocation57_spill] sm:$0xff] %v5224_v55  ;;  %v5260_v54 = vpop.f32.mrf.mxu2 }
 0x239   :  { %7151 = vst [vmem:[#allocation58_spill] sm:$0xff] %v5226_v32  ;;  %1702 = vmatpush.msra.mxu2 %v1631_v57  ;;  %v5262_v57 = vpop.f32.mrf.mxu3 }
 0x23a   :  { %3526 = vmatmul.msk.f32.gmra.mxu0 %vm131_vm0, %v3869_v29  ;;  %3554 = vmatmul.msk.f32.gmra.mxu1 %vm131_vm0, %v3869_v29  ;;  %v1630_v29 = vld [vmem:[%s7080_s3 + $0x18] sm:$0xff] }
 0x23b   :  { %1703 = vmatpush.msra.mxu2 %v1630_v29 }
 0x23d   :  { %1704 = vmatpush.msra.mxu2 %v1629_v62  ;;  %v1643_v62 = vld [vmem:[%s7080_s3 + $0x80] sm:$0xff] }
 0x23f   :  { %v5242_v32 = vpop.f32.mrf.mxu0  ;;  %v5244_v55 = vpop.f32.mrf.mxu1 }
 0x240   :  { %7152 = vst [vmem:[#allocation59_spill] sm:$0xff] %v5242_v32  ;;  %v1644_v32 = vld [vmem:[%s7080_s3 + $0x88] sm:$0xff] }
 0x241   :  { %7153 = vst [vmem:[#allocation60_spill] sm:$0xff] %v5244_v55  ;;  %v1628_v55 = vld [vmem:[%s7080_s3 + $0x8] sm:$0xff]  ;;  %1764 = vmatpush.msra.mxu3 %v1644_v32  ;;  %v5285_v32 = vpop.f32.mrf.mxu2 }
 0x242   :  { %3527 = vmatmul.msk.f32.gmra.mxu0 %vm131_vm0, %v3870_v2  ;;  %3555 = vmatmul.msk.f32.gmra.mxu1 %vm131_vm0, %v3870_v2 }
 0x243   :  { %1705 = vmatpush.msra.mxu2 %v1628_v55  ;;  %1765 = vmatpush.msra.mxu3 %v1643_v62  ;;  %v5287_v55 = vpop.f32.mrf.mxu3 }
 0x245   :  { %1706 = vmatpush.msra.mxu2 %v1627_v61  ;;  %v3872_v61 = vld [vmem:[%s7079_s0 + $0x98] sm:$0xff] }
 0x247   :  { %v5270_v2 = vpop.f32.mrf.mxu0  ;;  %v5272_v29 = vpop.f32.mrf.mxu1 }
 0x248   :  { %7154 = vst [vmem:[#allocation61_spill] sm:$0xff] %v5270_v2 }
 0x249   :  { %7155 = vst [vmem:[#allocation62_spill] sm:$0xff] %v5272_v29  ;;  %v5298_v12 = vpop.f32.mrf.mxu2 }
 0x24a   :  { %3528 = vmatmul.msk.f32.gmra.mxu0 %vm131_vm0, %v3871_v1  ;;  %3556 = vmatmul.msk.f32.gmra.mxu1 %vm131_vm0, %v3871_v1 }
 0x24b   :  { %v5300_v1 = vpop.f32.mrf.mxu3 }
 0x24f   :  { %v5289_v29 = vpop.f32.mrf.mxu0  ;;  %v5291_v2 = vpop.f32.mrf.mxu1 }
 0x250   :  { %7156 = vst [vmem:[#allocation63_spill] sm:$0xff] %v5289_v29  ;;  %v1481_v29 = vld [vmem:[%s7081_s2] sm:$0x3] }
 0x251   :  { %7157 = vst [vmem:[#allocation64_spill] sm:$0xff] %v5291_v2  ;;  %v3873_v2 = vld [vmem:[%s7079_s0 + $0xa0] sm:$0xff]  ;;  %v5311_v22 = vperm.slane %v1481_v29, 0  ;;  %v5314_v4 = vperm.slane %v1481_v29, 1  ;;  %v5320_v28 = vpop.f32.mrf.mxu2 }
 0x252   :  { %3529 = vmatmul.msk.f32.gmra.mxu0 %vm131_vm0, %v3872_v61  ;;  %3557 = vmatmul.msk.f32.gmra.mxu1 %vm131_vm0, %v3872_v61 }
 0x257   :  { %v1240_v62 = vpop.f32.mrf.mxu0  ;;  %v1341_v50 = vpop.f32.mrf.mxu1 }
 0x258   :  { %v1425_v61 = vadd.f32 %v1240_v62, %v4913_v30  ;;  %v1426_v6 = vadd.f32 %v1341_v50, %v4915_v15  ;;  %v3874_v15 = vld [vmem:[%s7079_s0 + $0xa8] sm:$0xff] }
 0x25a   :  { %3530 = vmatmul.msk.f32.gmra.mxu0 %vm131_vm0, %v3873_v2  ;;  %3558 = vmatmul.msk.f32.gmra.mxu1 %vm131_vm0, %v3873_v2  ;;  %v1487_v31 = vadd.f32 %v5311_v22, %v1425_v61  ;;  %v1488_v36 = vadd.f32 %v5314_v4, %v1426_v6  ;;  %v5322_v2 = vpop.f32.mrf.mxu3 }
 0x25c   :  { %v1543_v6 = vmax.f32 %v1487_v31, 0.0 }
 0x25f   :  { %v1243_v5 = vpop.f32.mrf.mxu0  ;;  %v1344_v38 = vpop.f32.mrf.mxu1 }
 0x260   :  { %v1427_v7 = vadd.f32 %v1243_v5, %v4933_v21  ;;  %v1428_v17 = vadd.f32 %v1344_v38, %v4935_v10  ;;  %v1544_v5 = vmax.f32 %v1488_v36, 0.0  ;;  %v5343_v36 = vpop.f32.mrf.mxu2 }
 0x262   :  { %v1489_v30 = vadd.f32 %v5311_v22, %v1427_v7  ;;  %v1490_v50 = vadd.f32 %v5314_v4, %v1428_v17  ;;  %3531 = vmatmul.msk.f32.gmra.mxu0 %vm131_vm0, %v3874_v15  ;;  %3559 = vmatmul.msk.f32.gmra.mxu1 %vm131_vm0, %v3874_v15  ;;  %v3875_v17 = vld [vmem:[%s7079_s0 + $0xb0] sm:$0xff]  ;;  %v5345_v31 = vpop.f32.mrf.mxu3 }
 0x264   :  { %v1545_v21 = vmax.f32 %v1489_v30, 0.0  ;;  %v1546_v38 = vmax.f32 %v1490_v50, 0.0 }
 0x266   :  { %v5331_v10 = vmax.f32 %v1543_v6, %v1545_v21  ;;  %v5333_v29 = vmax.f32 %v1544_v5, %v1546_v38 }
 0x267   :  { %v1246_v7 = vpop.f32.mrf.mxu0  ;;  %v1347_v62 = vpop.f32.mrf.mxu1 }
 0x268   :  { %7158 = vst [vmem:[#allocation65_spill] sm:$0xff] %v5333_v29  ;;  %1707 = vmatmul.f32.vlgmr.msra.gmra.mxu2 %v5331_v10  ;;  %3570 = vmatmul.msk.f32.vlgmr.msra.gmra.mxu3 %vm1648_vm1, %v5333_v29  ;;  %v1429_v61 = vadd.f32 %v1246_v7, %v4947_v24  ;;  %v1430_v30 = vadd.f32 %v1347_v62, %v4949_v25  ;;  %v3876_v24 = vld [vmem:[%s7079_s0 + $0xb8] sm:$0xff] }
 0x26a   :  { %3532 = vmatmul.msk.f32.gmra.mxu0 %vm131_vm0, %v3875_v17  ;;  %3560 = vmatmul.msk.f32.gmra.mxu1 %vm131_vm0, %v3875_v17  ;;  %v1491_v6 = vadd.f32 %v5311_v22, %v1429_v61  ;;  %v1492_v5 = vadd.f32 %v5314_v4, %v1430_v30  ;;  %v5360_v30 = vpop.f32.mrf.mxu2 }
 0x26c   :  { %v1547_v25 = vmax.f32 %v1491_v6, 0.0  ;;  %v1548_v7 = vmax.f32 %v1492_v5, 0.0  ;;  %v3877_v5 = vld [vmem:[%s7079_s0 + $0xc0] sm:$0xff] }
 0x26f   :  { %v1249_v50 = vpop.f32.mrf.mxu0  ;;  %v1350_v15 = vpop.f32.mrf.mxu1 }
 0x270   :  { %v1431_v21 = vadd.f32 %v1249_v50, %v4961_v16  ;;  %v1432_v38 = vadd.f32 %v1350_v15, %v4963_v35  ;;  %v5362_v16 = vpop.f32.mrf.mxu3 }
 0x272   :  { %v1493_v17 = vadd.f32 %v5311_v22, %v1431_v21  ;;  %v1494_v29 = vadd.f32 %v5314_v4, %v1432_v38  ;;  %3533 = vmatmul.msk.f32.gmra.mxu0 %vm131_vm0, %v3876_v24  ;;  %3561 = vmatmul.msk.f32.gmra.mxu1 %vm131_vm0, %v3876_v24  ;;  %v861_v38 = vadd.f32 %v4965_v56, %v4456_v59 }
 0x273   :  { %v862_v24 = vadd.f32 %v4967_v33, %v4458_v60  ;;  %v863_v59 = vadd.f32 %v4983_v48, %v4490_v19  ;;  %v864_v60 = vadd.f32 %v4985_v34, %v4492_v20 }
 0x274   :  { %v1549_v62 = vmax.f32 %v1493_v17, 0.0  ;;  %v1550_v61 = vmax.f32 %v1494_v29, 0.0  ;;  %v1147_v29 = vadd.f32 %v5260_v54, %v861_v38 }
 0x275   :  { %v1148_v6 = vadd.f32 %v5262_v57, %v862_v24  ;;  %v1149_v54 = vadd.f32 %v5285_v32, %v863_v59  ;;  %v1150_v57 = vadd.f32 %v5287_v55, %v864_v60  ;;  %v3878_v32 = vld [vmem:[%s7079_s0 + $0xc8] sm:$0xff]  ;;  %v865_v60 = vadd.f32 %v4995_v3, %v4532_v45  ;;  %v3879_v45 = vld [vmem:[%s7079_s0 + $0xd0] sm:$0xff] }
 0x276   :  { %v5364_v35 = vmax.f32 %v1548_v7, %v1550_v61  ;;  %v5366_v50 = vmax.f32 %v1547_v25, %v1549_v62  ;;  %v5388_v7 = vpop.f32.mrf.mxu2  ;;  %v868_v3 = vadd.f32 %v5015_v37, %v4569_v14  ;;  %v3880_v14 = vld [vmem:[%s7079_s0 + $0xd8] sm:$0xff] }
 0x277   :  { %v1252_v15 = vpop.f32.mrf.mxu0  ;;  %v1353_v21 = vpop.f32.mrf.mxu1 }
 0x278   :  { %1710 = vmatmul.f32.gmra.mxu2 %v5366_v50  ;;  %3571 = vmatmul.msk.f32.gmra.mxu3 %vm1648_vm1, %v5364_v35  ;;  %v1433_v56 = vadd.f32 %v1252_v15, %v1147_v29  ;;  %v1434_v33 = vadd.f32 %v1353_v21, %v1148_v6  ;;  %v5390_v62 = vpop.f32.mrf.mxu3 }
 0x27a   :  { %3534 = vmatmul.msk.f32.gmra.mxu0 %vm131_vm0, %v3877_v5  ;;  %3562 = vmatmul.msk.f32.gmra.mxu1 %vm131_vm0, %v3877_v5  ;;  %v1495_v61 = vadd.f32 %v5311_v22, %v1433_v56  ;;  %v1496_v38 = vadd.f32 %v5314_v4, %v1434_v33  ;;  %v866_v56 = vadd.f32 %v4997_v58, %v4534_v46 }
 0x27b   :  { %v1151_v33 = vadd.f32 %v5298_v12, %v865_v60  ;;  %v867_v46 = vadd.f32 %v5013_v18, %v4567_v13  ;;  %v869_v60 = vadd.f32 %v5025_v52, %v4608_v42  ;;  %v871_v42 = vadd.f32 %v5037_v23, %v4625_v63 }
 0x27c   :  { %v1551_v55 = vmax.f32 %v1495_v61, 0.0  ;;  %v1552_v15 = vmax.f32 %v1496_v38, 0.0 }
 0x27f   :  { %v1255_v17 = vpop.f32.mrf.mxu0  ;;  %v1356_v25 = vpop.f32.mrf.mxu1 }
 0x280   :  { %v1435_v19 = vadd.f32 %v1255_v17, %v1149_v54  ;;  %v1436_v48 = vadd.f32 %v1356_v25, %v1150_v57  ;;  %v1152_v54 = vadd.f32 %v5300_v1, %v866_v56  ;;  %v5414_v57 = vpop.f32.mrf.mxu2  ;;  %v5416_v17 = vpop.f32.mrf.mxu3  ;;  %v1153_v1 = vadd.f32 %v5320_v28, %v867_v46 }
 0x281   :  { %v1154_v25 = vadd.f32 %v5322_v2, %v868_v3  ;;  %v870_v56 = vadd.f32 %v5027_v40, %v4610_v43  ;;  %v872_v43 = vadd.f32 %v5039_v41, %v4627_v0 }
 0x282   :  { %v1497_v20 = vadd.f32 %v5311_v22, %v1435_v19  ;;  %v1498_v34 = vadd.f32 %v5314_v4, %v1436_v48  ;;  %3535 = vmatmul.msk.f32.gmra.mxu0 %vm131_vm0, %v3878_v32  ;;  %3563 = vmatmul.msk.f32.gmra.mxu1 %vm131_vm0, %v3878_v32 }
 0x284   :  { %v1553_v21 = vmax.f32 %v1497_v20, 0.0  ;;  %v1554_v24 = vmax.f32 %v1498_v34, 0.0 }
 0x286   :  { %v5401_v29 = vmax.f32 %v1552_v15, %v1554_v24  ;;  %v5403_v6 = vmax.f32 %v1551_v55, %v1553_v21 }
 0x287   :  { %v1258_v5 = vpop.f32.mrf.mxu0  ;;  %v1359_v59 = vpop.f32.mrf.mxu1 }
 0x288   :  { %1713 = vmatmul.f32.gmra.mxu2 %v5403_v6  ;;  %3572 = vmatmul.msk.f32.gmra.mxu3 %vm1648_vm1, %v5401_v29  ;;  %v1437_v58 = vadd.f32 %v1258_v5, %v1151_v33  ;;  %v1438_v12 = vadd.f32 %v1359_v59, %v1152_v54  ;;  %v5438_v18 = vpop.f32.mrf.mxu2  ;;  %v5440_v37 = vpop.f32.mrf.mxu3  ;;  %v1155_v33 = vadd.f32 %v5343_v36, %v869_v60 }
 0x289   :  { %v1156_v54 = vadd.f32 %v5345_v31, %v870_v56  ;;  %v1157_v36 = vadd.f32 %v5360_v30, %v871_v42  ;;  %v1158_v31 = vadd.f32 %v5362_v16, %v872_v43  ;;  %v1824_v43 = vld [vmem:[%s7082_s4 + $0x78] sm:$0xff] }
 0x28a   :  { %3536 = vmatmul.msk.f32.gmra.mxu0 %vm131_vm0, %v3879_v45  ;;  %3564 = vmatmul.msk.f32.gmra.mxu1 %vm131_vm0, %v3879_v45  ;;  %v1499_v19 = vadd.f32 %v5311_v22, %v1437_v58  ;;  %v1500_v48 = vadd.f32 %v5314_v4, %v1438_v12  ;;  %v3881_v45 = vld [vmem:[%s7079_s0 + $0xe0] sm:$0xff] }
 0x28b   :  { %1830 = vmatpush.msrb.mxu2 %v1824_v43  ;;  %v7168_v43 = vld [vmem:[#allocation6_spill] sm:$0xff] }
 0x28c   :  { %v1555_v28 = vmax.f32 %v1499_v19, 0.0  ;;  %v1556_v2 = vmax.f32 %v1500_v48, 0.0 }
 0x28f   :  { %v1261_v61 = vpop.f32.mrf.mxu0  ;;  %v1362_v38 = vpop.f32.mrf.mxu1 }
 0x290   :  { %v1439_v20 = vadd.f32 %v1261_v61, %v1153_v1  ;;  %v1440_v34 = vadd.f32 %v1362_v38, %v1154_v25  ;;  %v5466_v46 = vpop.f32.mrf.mxu2  ;;  %v5468_v3 = vpop.f32.mrf.mxu3 }
 0x292   :  { %v1501_v32 = vadd.f32 %v5311_v22, %v1439_v20  ;;  %v1502_v13 = vadd.f32 %v5314_v4, %v1440_v34  ;;  %3537 = vmatmul.msk.f32.gmra.mxu0 %vm131_vm0, %v3880_v14  ;;  %3565 = vmatmul.msk.f32.gmra.mxu1 %vm131_vm0, %v3880_v14 }
 0x294   :  { %v1557_v55 = vmax.f32 %v1501_v32, 0.0  ;;  %v1558_v15 = vmax.f32 %v1502_v13, 0.0  ;;  %v873_v32 = vadd.f32 %v5049_v53, %v4642_v26  ;;  %v874_v13 = vadd.f32 %v5051_v44, %v4644_v27 }
 0x295   :  { %v875_v26 = vadd.f32 %v5066_v9, %v4665_v39  ;;  %v876_v27 = vadd.f32 %v5068_v51, %v4667_v49 }
 0x296   :  { %v5442_v21 = vmax.f32 %v1556_v2, %v1558_v15  ;;  %v5444_v24 = vmax.f32 %v1555_v28, %v1557_v55  ;;  %v1160_v2 = vadd.f32 %v5390_v62, %v874_v13  ;;  %v1823_v13 = vld [vmem:[%s7082_s4 + $0x70] sm:$0xff] }
 0x297   :  { %v1264_v5 = vpop.f32.mrf.mxu0  ;;  %v1365_v59 = vpop.f32.mrf.mxu1  ;;  %v1161_v55 = vadd.f32 %v5414_v57, %v875_v26  ;;  %1831 = vmatpush.msrb.mxu2 %v1823_v13 }
 0x298   :  { %1716 = vmatmul.f32.gmra.mxu2 %v5444_v24  ;;  %3573 = vmatmul.msk.f32.gmra.mxu3 %vm1648_vm1, %v5442_v21  ;;  %v1441_v52 = vadd.f32 %v1264_v5, %v1155_v33  ;;  %v1442_v40 = vadd.f32 %v1365_v59, %v1156_v54  ;;  %v5486_v14 = vpop.f32.mrf.mxu2  ;;  %v5488_v28 = vpop.f32.mrf.mxu3  ;;  %v81_v5 = vld [vmem:[%s7079_s0 + $0xf8] sm:$0xff] }
 0x29a   :  { %3538 = vmatmul.msk.f32.gmra.mxu0 %vm131_vm0, %v3881_v45  ;;  %3566 = vmatmul.msk.f32.gmra.mxu1 %vm131_vm0, %v3881_v45  ;;  %v1503_v1 = vadd.f32 %v5311_v22, %v1441_v52  ;;  %v1504_v25 = vadd.f32 %v5314_v4, %v1442_v40  ;;  %v1829_v52 = vld [vmem:[%s7082_s4 + $0xa0] sm:$0xff] }
 0x29b   :  { %1900 = vmatpush.msrb.mxu3 %v1829_v52  ;;  %v7169_v52 = vld [vmem:[#allocation38_spill] sm:$0xff] }
 0x29c   :  { %v1559_v30 = vmax.f32 %v1503_v1, 0.0  ;;  %v1560_v16 = vmax.f32 %v1504_v25, 0.0  ;;  %v7161_v1 = vld [vmem:[#allocation34_spill] sm:$0xff] }
 0x29f   :  { %v1267_v58 = vpop.f32.mrf.mxu0  ;;  %v1368_v12 = vpop.f32.mrf.mxu1 }
 0x2a0   :  { %v1443_v63 = vadd.f32 %v1267_v58, %v1157_v36  ;;  %v1444_v23 = vadd.f32 %v1368_v12, %v1158_v31  ;;  %v5510_v60 = vpop.f32.mrf.mxu2  ;;  %v5512_v49 = vpop.f32.mrf.mxu3  ;;  %v7159_v31 = vld [vmem:[#allocation33_spill] sm:$0xff]  ;;  %v7160_v12 = vld [vmem:[#allocation2_spill] sm:$0xff] }
 0x2a1   :  { %v877_v58 = vadd.f32 %v7159_v31, %v4677_v8  ;;  %v878_v25 = vadd.f32 %v7161_v1, %v7160_v12  ;;  %v7171_v12 = vld [vmem:[#allocation39_spill] sm:$0xff] }
 0x2a2   :  { %v1505_v0 = vadd.f32 %v5311_v22, %v1443_v63  ;;  %v1506_v41 = vadd.f32 %v5314_v4, %v1444_v23  ;;  %3539 = vmatmul.msk.f32.gmra.mxu0 %vm131_vm0, %v5056_v11  ;;  %3567 = vmatmul.msk.f32.gmra.mxu1 %vm131_vm0, %v5056_v11  ;;  %v1159_v11 = vadd.f32 %v5388_v7, %v873_v32 }
 0x2a3   :  { %v1162_v7 = vadd.f32 %v5416_v17, %v876_v27  ;;  %v1163_v63 = vadd.f32 %v5438_v18, %v877_v58  ;;  %v1164_v23 = vadd.f32 %v5440_v37, %v878_v25  ;;  %v1822_v18 = vld [vmem:[%s7082_s4 + $0x68] sm:$0xff]  ;;  %v7172_v25 = vld [vmem:[#allocation8_spill] sm:$0xff] }
 0x2a4   :  { %v1561_v61 = vmax.f32 %v1505_v0, 0.0  ;;  %v1562_v38 = vmax.f32 %v1506_v41, 0.0  ;;  %v7162_v0 = vld [vmem:[#allocation3_spill] sm:$0xff]  ;;  %1832 = vmatpush.msrb.mxu2 %v1822_v18 }
 0x2a5   :  { %v7163_v41 = vld [vmem:[#allocation35_spill] sm:$0xff] }
 0x2a6   :  { %v5478_v19 = vmax.f32 %v1560_v16, %v1562_v38  ;;  %v5480_v48 = vmax.f32 %v1559_v30, %v1561_v61  ;;  %v879_v30 = vadd.f32 %v7163_v41, %v7162_v0  ;;  %v7164_v16 = vld [vmem:[#allocation4_spill] sm:$0xff]  ;;  %v7170_v58 = vld [vmem:[#allocation7_spill] sm:$0xff] }
 0x2a7   :  { %v1270_v20 = vpop.f32.mrf.mxu0  ;;  %v1371_v34 = vpop.f32.mrf.mxu1  ;;  %v7165_v61 = vld [vmem:[#allocation36_spill] sm:$0xff]  ;;  %v883_v1 = vadd.f32 %v7171_v12, %v7170_v58 }
 0x2a8   :  { %1719 = vmatmul.f32.gmra.mxu2 %v5480_v48  ;;  %3574 = vmatmul.msk.f32.gmra.mxu3 %vm1648_vm1, %v5478_v19  ;;  %v1445_v53 = vadd.f32 %v1270_v20, %v1159_v11  ;;  %v1446_v44 = vadd.f32 %v1371_v34, %v1160_v2  ;;  %v880_v38 = vadd.f32 %v7165_v61, %v7164_v16  ;;  %v5541_v20 = vpop.f32.mrf.mxu2  ;;  %v5543_v8 = vpop.f32.mrf.mxu3  ;;  %v1820_v16 = vld [vmem:[%s7082_s4 + $0x58] sm:$0xff]  ;;  %v7180_v12 = vld [vmem:[#allocation12_spill] sm:$0xff] }
 0x2a9   :  { %v1165_v37 = vadd.f32 %v5466_v46, %v879_v30  ;;  %v1828_v30 = vld [vmem:[%s7082_s4 + $0x98] sm:$0xff] }
 0x2aa   :  { %3540 = vmatmul.msk.f32.gmra.mxu0 %vm131_vm0, %v5073_v47  ;;  %3568 = vmatmul.msk.f32.gmra.mxu1 %vm131_vm0, %v5073_v47  ;;  %v1507_v47 = vadd.f32 %v5311_v22, %v1445_v53  ;;  %v1508_v59 = vadd.f32 %v5314_v4, %v1446_v44  ;;  %v1166_v11 = vadd.f32 %v5468_v3, %v880_v38 }
 0x2ab   :  { %1901 = vmatpush.msrb.mxu3 %v1828_v30 }
 0x2ac   :  { %v1563_v17 = vmax.f32 %v1507_v47, 0.0  ;;  %v1564_v56 = vmax.f32 %v1508_v59, 0.0 }
 0x2af   :  { %v1273_v15 = vpop.f32.mrf.mxu0  ;;  %v1374_v62 = vpop.f32.mrf.mxu1 }
 0x2b0   :  { %v1447_v39 = vadd.f32 %v1273_v15, %v1161_v55  ;;  %v1448_v9 = vadd.f32 %v1374_v62, %v1162_v7  ;;  %v5557_v46 = vpop.f32.mrf.mxu2  ;;  %v5559_v3 = vpop.f32.mrf.mxu3 }
 0x2b2   :  { %v1509_v51 = vadd.f32 %v5311_v22, %v1447_v39  ;;  %v1510_v57 = vadd.f32 %v5314_v4, %v1448_v9  ;;  %3541 = vmatmul.msk.f32.gmra.mxu0 %vm131_vm0, %v81_v5  ;;  %3569 = vmatmul.msk.f32.gmra.mxu1 %vm131_vm0, %v81_v5 }
 0x2b4   :  { %v1565_v33 = vmax.f32 %v1509_v51, 0.0  ;;  %v1566_v54 = vmax.f32 %v1510_v57, 0.0  ;;  %v1821_v51 = vld [vmem:[%s7082_s4 + $0x60] sm:$0xff] }
 0x2b5   :  { %1833 = vmatpush.msrb.mxu2 %v1821_v51  ;;  %v7175_v51 = vld [vmem:[#allocation41_spill] sm:$0xff] }
 0x2b6   :  { %v5518_v45 = vmax.f32 %v1564_v56, %v1566_v54  ;;  %v5520_v42 = vmax.f32 %v1563_v17, %v1565_v33  ;;  %v7166_v56 = vld [vmem:[#allocation5_spill] sm:$0xff] }
 0x2b7   :  { %v1276_v40 = vpop.f32.mrf.mxu0  ;;  %v1377_v36 = vpop.f32.mrf.mxu1  ;;  %v7167_v33 = vld [vmem:[#allocation37_spill] sm:$0xff]  ;;  %1834 = vmatpush.msrb.mxu2 %v1820_v16 }
 0x2b8   :  { %1722 = vmatmul.f32.gmra.mxu2 %v5520_v42  ;;  %3575 = vmatmul.msk.f32.gmra.mxu3 %vm1648_vm1, %v5518_v45  ;;  %v1449_v34 = vadd.f32 %v1276_v40, %v1163_v63  ;;  %v1450_v32 = vadd.f32 %v1377_v36, %v1164_v23  ;;  %v881_v54 = vadd.f32 %v7167_v33, %v7166_v56  ;;  %v7173_v63 = vld [vmem:[#allocation40_spill] sm:$0xff]  ;;  %v7177_v56 = vld [vmem:[#allocation42_spill] sm:$0xff] }
 0x2b9   :  { %v882_v40 = vadd.f32 %v7169_v52, %v7168_v43  ;;  %v884_v23 = vadd.f32 %v7173_v63, %v7172_v25 }
 0x2ba   :  { %v1511_v27 = vadd.f32 %v5311_v22, %v1449_v34  ;;  %v1512_v53 = vadd.f32 %v5314_v4, %v1450_v32  ;;  %v1167_v36 = vadd.f32 %v5486_v14, %v881_v54  ;;  %v1169_v14 = vadd.f32 %v5510_v60, %v883_v1  ;;  %v5589_v34 = vpop.f32.mrf.mxu2  ;;  %v5591_v32 = vpop.f32.mrf.mxu3  ;;  %v7181_v1 = vld [vmem:[#allocation44_spill] sm:$0xff] }
 0x2bb   :  { %v1168_v31 = vadd.f32 %v5488_v28, %v882_v40  ;;  %v1170_v28 = vadd.f32 %v5512_v49, %v884_v23  ;;  %v888_v25 = vadd.f32 %v7181_v1, %v7180_v12 }
 0x2bc   :  { %v1567_v62 = vmax.f32 %v1511_v27, 0.0  ;;  %v1568_v5 = vmax.f32 %v1512_v53, 0.0 }
 0x2bf   :  { %v1279_v2 = vpop.f32.mrf.mxu0  ;;  %v1380_v26 = vpop.f32.mrf.mxu1 }
 0x2c0   :  { %v1451_v44 = vadd.f32 %v1279_v2, %v1165_v37  ;;  %v1452_v55 = vadd.f32 %v1380_v26, %v1166_v11 }
 0x2c2   :  { %v1513_v7 = vadd.f32 %v5311_v22, %v1451_v44  ;;  %v1514_v15 = vadd.f32 %v5314_v4, %v1452_v55  ;;  %v1011_v52 = vpop.f32.mrf.mxu2  ;;  %v1112_v40 = vpop.f32.mrf.mxu3 }
 0x2c4   :  { %v1569_v47 = vmax.f32 %v1513_v7, 0.0  ;;  %v1570_v59 = vmax.f32 %v1514_v15, 0.0  ;;  %v3618_v7 = vld [vmem:[%s7083_s5 + $0x150] sm:$0xf]  ;;  %v3619_v15 = vld [vmem:[%s7083_s5 + $0x158] sm:$0xf] }
 0x2c5   :  { %3620 = vmatpush.msk.msrb.mxu0 %vm2038_vm2, %v3618_v7  ;;  %3631 = vmatpush.msk.msrb.mxu1 %vm2038_vm2, %v3619_v15  ;;  %v3617_v7 = vld [vmem:[%s7083_s5 + $0x148] sm:$0xff] }
 0x2c6   :  { %v5561_v39 = vmax.f32 %v1568_v5, %v1570_v59  ;;  %v5563_v9 = vmax.f32 %v1567_v62, %v1569_v47  ;;  %v1819_v62 = vld [vmem:[%s7082_s4 + $0x50] sm:$0xff]  ;;  %v7174_v59 = vld [vmem:[#allocation9_spill] sm:$0xff] }
 0x2c7   :  { %v1282_v57 = vpop.f32.mrf.mxu0  ;;  %v1383_v17 = vpop.f32.mrf.mxu1  ;;  %1835 = vmatpush.msrb.mxu2 %v1819_v62  ;;  %2098 = vmatpush.msrb.mxu1 %v3617_v7  ;;  %v7190_v7 = vld [vmem:[#allocation17_spill] sm:$0xff] }
 0x2c8   :  { %1725 = vmatmul.f32.gmra.mxu2 %v5563_v9  ;;  %3576 = vmatmul.msk.f32.gmra.mxu3 %vm1648_vm1, %v5561_v39  ;;  %v1453_v0 = vadd.f32 %v1282_v57, %v1167_v36  ;;  %v1454_v41 = vadd.f32 %v1383_v17, %v1168_v31  ;;  %v885_v57 = vadd.f32 %v7175_v51, %v7174_v59  ;;  %v7176_v17 = vld [vmem:[#allocation10_spill] sm:$0xff]  ;;  %v7178_v36 = vld [vmem:[#allocation11_spill] sm:$0xff] }
 0x2c9   :  { %v886_v33 = vadd.f32 %v7177_v56, %v7176_v17  ;;  %v7179_v31 = vld [vmem:[#allocation43_spill] sm:$0xff]  ;;  %v7184_v51 = vld [vmem:[#allocation14_spill] sm:$0xff] }
 0x2ca   :  { %v1515_v13 = vadd.f32 %v5311_v22, %v1453_v0  ;;  %v1516_v18 = vadd.f32 %v5314_v4, %v1454_v41  ;;  %v1171_v54 = vadd.f32 %v5541_v20, %v885_v57  ;;  %v887_v58 = vadd.f32 %v7179_v31, %v7178_v36  ;;  %v1818_v0 = vld [vmem:[%s7082_s4 + $0x48] sm:$0xff]  ;;  %v1827_v20 = vld [vmem:[%s7082_s4 + $0x90] sm:$0xff]  ;;  %v7185_v57 = vld [vmem:[#allocation46_spill] sm:$0xff] }
 0x2cb   :  { %v1172_v43 = vadd.f32 %v5543_v8, %v886_v33  ;;  %1836 = vmatpush.msrb.mxu2 %v1818_v0  ;;  %1902 = vmatpush.msrb.mxu3 %v1827_v20  ;;  %v1174_v41 = vadd.f32 %v5559_v3, %v888_v25  ;;  %v890_v17 = vadd.f32 %v7185_v57, %v7184_v51  ;;  %v7188_v31 = vld [vmem:[#allocation16_spill] sm:$0xff] }
 0x2cc   :  { %v1571_v27 = vmax.f32 %v1515_v13, 0.0  ;;  %v1572_v60 = vmax.f32 %v1516_v18, 0.0  ;;  %v1173_v8 = vadd.f32 %v5557_v46, %v887_v58  ;;  %v7189_v58 = vld [vmem:[#allocation48_spill] sm:$0xff] }
 0x2cd   :  { %v1176_v33 = vadd.f32 %v5591_v32, %v890_v17  ;;  %v892_v12 = vadd.f32 %v7189_v58, %v7188_v31  ;;  %v7197_v31 = vld [vmem:[#allocation52_spill] sm:$0xff] }
 0x2cf   :  { %v1285_v61 = vpop.f32.mrf.mxu0  ;;  %v1386_v38 = vpop.f32.mrf.mxu1  ;;  %v1178_v0 = vadd.f32 %v1112_v40, %v892_v12 }
 0x2d0   :  { %v1455_v37 = vadd.f32 %v1285_v61, %v1169_v14  ;;  %v1456_v11 = vadd.f32 %v1386_v38, %v1170_v28 }
 0x2d2   :  { %v1517_v2 = vadd.f32 %v5311_v22, %v1455_v37  ;;  %v1518_v26 = vadd.f32 %v5314_v4, %v1456_v11  ;;  %v1014_v37 = vpop.f32.mrf.mxu2  ;;  %v1115_v11 = vpop.f32.mrf.mxu3 }
 0x2d4   :  { %v1573_v53 = vmax.f32 %v1517_v2, 0.0  ;;  %v1574_v49 = vmax.f32 %v1518_v26, 0.0 }
 0x2d6   :  { %v5597_v44 = vmax.f32 %v1572_v60, %v1574_v49  ;;  %v5599_v55 = vmax.f32 %v1571_v27, %v1573_v53  ;;  %v1817_v53 = vld [vmem:[%s7082_s4 + $0x40] sm:$0xff] }
 0x2d7   :  { %v1288_v5 = vpop.f32.mrf.mxu0  ;;  %v1389_v47 = vpop.f32.mrf.mxu1  ;;  %v3616_v49 = vld [vmem:[%s7083_s5 + $0x140] sm:$0xff]  ;;  %1837 = vmatpush.msrb.mxu2 %v1817_v53 }
 0x2d8   :  { %1728 = vmatmul.f32.gmra.mxu2 %v5599_v55  ;;  %3577 = vmatmul.msk.f32.gmra.mxu3 %vm1648_vm1, %v5597_v44  ;;  %v1457_v63 = vadd.f32 %v1288_v5, %v1171_v54  ;;  %v1458_v23 = vadd.f32 %v1389_v47, %v1172_v43  ;;  %v7182_v5 = vld [vmem:[#allocation13_spill] sm:$0xff]  ;;  %v7186_v54 = vld [vmem:[#allocation15_spill] sm:$0xff] }
 0x2d9   :  { %2051 = vmatpush.msrb.mxu0 %v3616_v49  ;;  %v7183_v47 = vld [vmem:[#allocation45_spill] sm:$0xff]  ;;  %v7187_v43 = vld [vmem:[#allocation47_spill] sm:$0xff] }
 0x2da   :  { %v1519_v14 = vadd.f32 %v5311_v22, %v1457_v63  ;;  %v1520_v28 = vadd.f32 %v5314_v4, %v1458_v23  ;;  %v889_v59 = vadd.f32 %v7183_v47, %v7182_v5  ;;  %v891_v36 = vadd.f32 %v7187_v43, %v7186_v54  ;;  %v1816_v63 = vld [vmem:[%s7082_s4 + $0x38] sm:$0xff]  ;;  %v1017_v20 = vpop.f32.mrf.mxu2  ;;  %v7192_v5 = vld [vmem:[#allocation18_spill] sm:$0xff]  ;;  %v7195_v54 = vld [vmem:[#allocation51_spill] sm:$0xff] }
 0x2db   :  { %1838 = vmatpush.msrb.mxu2 %v1816_v63  ;;  %v7193_v47 = vld [vmem:[#allocation50_spill] sm:$0xff]  ;;  %v3615_v63 = vld [vmem:[%s7083_s5 + $0x138] sm:$0xff] }
 0x2dc   :  { %v1575_v2 = vmax.f32 %v1519_v14, 0.0  ;;  %v1576_v26 = vmax.f32 %v1520_v28, 0.0  ;;  %v1175_v56 = vadd.f32 %v5589_v34, %v889_v59  ;;  %v1177_v23 = vadd.f32 %v1011_v52, %v891_v36  ;;  %v7196_v36 = vld [vmem:[#allocation20_spill] sm:$0xff]  ;;  %2099 = vmatpush.msrb.mxu1 %v3615_v63  ;;  %v1825_v63 = vld [vmem:[%s7082_s4 + $0x80] sm:$0xff] }
 0x2dd   :  { %v894_v59 = vadd.f32 %v7193_v47, %v7192_v5  ;;  %v896_v58 = vadd.f32 %v7197_v31, %v7196_v36  ;;  %v7201_v5 = vld [vmem:[#allocation54_spill] sm:$0xff]  ;;  %v7205_v36 = vld [vmem:[#allocation56_spill] sm:$0xff] }
 0x2df   :  { %v1291_v30 = vpop.f32.mrf.mxu0  ;;  %v1392_v16 = vpop.f32.mrf.mxu1 }
 0x2e0   :  { %v1459_v61 = vadd.f32 %v1291_v30, %v1173_v8  ;;  %v1460_v38 = vadd.f32 %v1392_v16, %v1174_v41  ;;  %v1118_v8 = vpop.f32.mrf.mxu3 }
 0x2e2   :  { %v1521_v13 = vadd.f32 %v5311_v22, %v1459_v61  ;;  %v1522_v18 = vadd.f32 %v5314_v4, %v1460_v38  ;;  %v1020_v51 = vpop.f32.mrf.mxu2 }
 0x2e4   :  { %v1577_v27 = vmax.f32 %v1521_v13, 0.0  ;;  %v1578_v46 = vmax.f32 %v1522_v18, 0.0 }
 0x2e6   :  { %v5637_v60 = vmax.f32 %v1576_v26, %v1578_v46  ;;  %v5639_v3 = vmax.f32 %v1575_v2, %v1577_v27  ;;  %v1815_v26 = vld [vmem:[%s7082_s4 + $0x30] sm:$0xff]  ;;  %v1826_v27 = vld [vmem:[%s7082_s4 + $0x88] sm:$0xff] }
 0x2e7   :  { %v1294_v15 = vpop.f32.mrf.mxu0  ;;  %v1395_v62 = vpop.f32.mrf.mxu1  ;;  %v1814_v46 = vld [vmem:[%s7082_s4 + $0x28] sm:$0xff]  ;;  %1839 = vmatpush.msrb.mxu2 %v1815_v26  ;;  %1903 = vmatpush.msrb.mxu3 %v1826_v27  ;;  %v1812_v27 = vld [vmem:[%s7082_s4 + $0x18] sm:$0xff] }
 0x2e8   :  { %1731 = vmatmul.f32.gmra.mxu2 %v5639_v3  ;;  %3578 = vmatmul.msk.f32.gmra.mxu3 %vm1648_vm1, %v5637_v60  ;;  %v1461_v1 = vadd.f32 %v1294_v15, %v1175_v56  ;;  %v1462_v25 = vadd.f32 %v1395_v62, %v1176_v33  ;;  %v7191_v15 = vld [vmem:[#allocation49_spill] sm:$0xff]  ;;  %v1121_v57 = vpop.f32.mrf.mxu3  ;;  %v1180_v56 = vadd.f32 %v1115_v11, %v894_v59  ;;  %v7194_v33 = vld [vmem:[#allocation19_spill] sm:$0xff] }
 0x2e9   :  { %v893_v62 = vadd.f32 %v7191_v15, %v7190_v7  ;;  %1840 = vmatpush.msrb.mxu2 %v1814_v46  ;;  %v895_v43 = vadd.f32 %v7195_v54, %v7194_v33  ;;  %v7199_v7 = vld [vmem:[#allocation53_spill] sm:$0xff]  ;;  %v7203_v33 = vld [vmem:[#allocation55_spill] sm:$0xff]  ;;  %1904 = vmatpush.msrb.mxu3 %v1825_v63 }
 0x2ea   :  { %v1523_v32 = vadd.f32 %v5311_v22, %v1461_v1  ;;  %v1524_v30 = vadd.f32 %v5314_v4, %v1462_v25  ;;  %v3614_v25 = vld [vmem:[%s7083_s5 + $0x130] sm:$0xff] }
 0x2eb   :  { %v1179_v17 = vadd.f32 %v1014_v37, %v893_v62  ;;  %v1813_v37 = vld [vmem:[%s7082_s4 + $0x20] sm:$0xff]  ;;  %2052 = vmatpush.msrb.mxu0 %v3614_v25  ;;  %v1181_v11 = vadd.f32 %v1017_v20, %v895_v43  ;;  %v7204_v43 = vld [vmem:[#allocation24_spill] sm:$0xff] }
 0x2ec   :  { %v1579_v38 = vmax.f32 %v1523_v32, 0.0  ;;  %v1580_v13 = vmax.f32 %v1524_v30, 0.0  ;;  %1841 = vmatpush.msrb.mxu2 %v1813_v37  ;;  %v7200_v62 = vld [vmem:[#allocation22_spill] sm:$0xff]  ;;  %v900_v31 = vadd.f32 %v7205_v36, %v7204_v43  ;;  %v1811_v37 = vld [vmem:[%s7082_s4 + $0x10] sm:$0xff]  ;;  %v7210_v43 = vld [vmem:[#allocation27_spill] sm:$0xff] }
 0x2ed   :  { %v898_v47 = vadd.f32 %v7201_v5, %v7200_v62  ;;  %v7207_v62 = vld [vmem:[#allocation57_spill] sm:$0xff]  ;;  %v7211_v36 = vld [vmem:[#allocation59_spill] sm:$0xff] }
 0x2ee   :  { %1842 = vmatpush.msrb.mxu2 %v1812_v27 }
 0x2ef   :  { %v1297_v34 = vpop.f32.mrf.mxu0  ;;  %v1398_v41 = vpop.f32.mrf.mxu1 }
 0x2f0   :  { %v1463_v16 = vadd.f32 %v1297_v34, %v1177_v23  ;;  %v1464_v14 = vadd.f32 %v1398_v41, %v1178_v0  ;;  %v1182_v23 = vadd.f32 %v1118_v8, %v896_v58  ;;  %1843 = vmatpush.msrb.mxu2 %v1811_v37 }
 0x2f2   :  { %v1525_v28 = vadd.f32 %v5311_v22, %v1463_v16  ;;  %v1526_v61 = vadd.f32 %v5314_v4, %v1464_v14  ;;  %v1023_v14 = vpop.f32.mrf.mxu2 }
 0x2f4   :  { %v1581_v18 = vmax.f32 %v1525_v28, 0.0  ;;  %v1582_v2 = vmax.f32 %v1526_v61, 0.0  ;;  %v1124_v28 = vpop.f32.mrf.mxu3 }
 0x2f6   :  { %v5670_v52 = vmax.f32 %v1580_v13, %v1582_v2  ;;  %v5672_v40 = vmax.f32 %v1579_v38, %v1581_v18 }
 0x2f7   :  { %v1300_v53 = vpop.f32.mrf.mxu0  ;;  %v1401_v49 = vpop.f32.mrf.mxu1 }
 0x2f8   :  { %1734 = vmatmul.f32.gmra.mxu2 %v5672_v40  ;;  %3579 = vmatmul.msk.f32.gmra.mxu3 %vm1648_vm1, %v5670_v52  ;;  %v1465_v12 = vadd.f32 %v1300_v53, %v1179_v17  ;;  %v1466_v1 = vadd.f32 %v1401_v49, %v1180_v56  ;;  %v7198_v49 = vld [vmem:[#allocation21_spill] sm:$0xff]  ;;  %v1184_v17 = vadd.f32 %v1121_v57, %v898_v47  ;;  %v7202_v56 = vld [vmem:[#allocation23_spill] sm:$0xff]  ;;  %v7208_v47 = vld [vmem:[#allocation26_spill] sm:$0xff] }
 0x2f9   :  { %v897_v15 = vadd.f32 %v7199_v7, %v7198_v49  ;;  %v899_v54 = vadd.f32 %v7203_v33, %v7202_v56  ;;  %v3613_v57 = vld [vmem:[%s7083_s5 + $0x128] sm:$0xff]  ;;  %v1809_v56 = vld [vmem:[%s7082_s4] sm:$0xff] }
 0x2fa   :  { %v1527_v41 = vadd.f32 %v5311_v22, %v1465_v12  ;;  %v1528_v32 = vadd.f32 %v5314_v4, %v1466_v1  ;;  %v1026_v58 = vpop.f32.mrf.mxu2  ;;  %2100 = vmatpush.msrb.mxu1 %v3613_v57 }
 0x2fb   :  { %v1183_v59 = vadd.f32 %v1020_v51, %v897_v15  ;;  %v3612_v51 = vld [vmem:[%s7083_s5 + $0x120] sm:$0xff]  ;;  %v7206_v15 = vld [vmem:[#allocation25_spill] sm:$0xff] }
 0x2fc   :  { %v1583_v13 = vmax.f32 %v1527_v41, 0.0  ;;  %v1584_v18 = vmax.f32 %v1528_v32, 0.0  ;;  %v1127_v12 = vpop.f32.mrf.mxu3  ;;  %2053 = vmatpush.msrb.mxu0 %v3612_v51  ;;  %v901_v5 = vadd.f32 %v7207_v62, %v7206_v15  ;;  %v7214_v15 = vld [vmem:[#allocation29_spill] sm:$0xff] }
 0x2fd   :  { %v7215_v62 = vld [vmem:[#allocation61_spill] sm:$0xff] }
 0x2fe   :  { %v1187_v33 = vadd.f32 %v1026_v58, %v901_v5  ;;  %v3610_v58 = vld [vmem:[%s7083_s5 + $0x110] sm:$0xff]  ;;  %v905_v5 = vadd.f32 %v7215_v62, %v7214_v15 }
 0x2ff   :  { %v1303_v0 = vpop.f32.mrf.mxu0  ;;  %v1404_v34 = vpop.f32.mrf.mxu1  ;;  %2054 = vmatpush.msrb.mxu0 %v3610_v58 }
 0x300   :  { %v1467_v30 = vadd.f32 %v1303_v0, %v1181_v11  ;;  %v1468_v16 = vadd.f32 %v1404_v34, %v1182_v23  ;;  %v1185_v11 = vadd.f32 %v1023_v14, %v899_v54  ;;  %v1186_v23 = vadd.f32 %v1124_v28, %v900_v31 }
 0x301   :  { %v903_v31 = vadd.f32 %v7211_v36, %v7210_v43  ;;  %v7218_v36 = vld [vmem:[#allocation31_spill] sm:$0xff] }
 0x302   :  { %v1529_v61 = vadd.f32 %v5311_v22, %v1467_v30  ;;  %v1530_v38 = vadd.f32 %v5314_v4, %v1468_v16  ;;  %v1029_v14 = vpop.f32.mrf.mxu2 }
 0x303   :  { %v1189_v57 = vadd.f32 %v1029_v14, %v903_v31  ;;  %v7219_v31 = vld [vmem:[#allocation63_spill] sm:$0xff] }
 0x304   :  { %v1585_v2 = vmax.f32 %v1529_v61, 0.0  ;;  %v1586_v20 = vmax.f32 %v1530_v38, 0.0  ;;  %v1130_v28 = vpop.f32.mrf.mxu3 }
 0x306   :  { %v5707_v8 = vmax.f32 %v1584_v18, %v1586_v20  ;;  %v5709_v26 = vmax.f32 %v1583_v13, %v1585_v2 }
 0x307   :  { %v1306_v46 = vpop.f32.mrf.mxu0  ;;  %v1407_v53 = vpop.f32.mrf.mxu1 }
 0x308   :  { %1737 = vmatmul.f32.gmra.mxu2 %v5709_v26  ;;  %3580 = vmatmul.msk.f32.gmra.mxu3 %vm1648_vm1, %v5707_v8  ;;  %v1469_v1 = vadd.f32 %v1306_v46, %v1183_v59  ;;  %v1470_v25 = vadd.f32 %v1407_v53, %v1184_v17  ;;  %v1810_v53 = vld [vmem:[%s7082_s4 + $0x8] sm:$0xff]  ;;  %v7209_v59 = vld [vmem:[#allocation58_spill] sm:$0xff] }
 0x309   :  { %1844 = vmatpush.msrb.mxu2 %v1810_v53  ;;  %v902_v17 = vadd.f32 %v7209_v59, %v7208_v47  ;;  %v7216_v47 = vld [vmem:[#allocation30_spill] sm:$0xff] }
 0x30a   :  { %v1531_v41 = vadd.f32 %v5311_v22, %v1469_v1  ;;  %v1532_v32 = vadd.f32 %v5314_v4, %v1470_v25  ;;  %v7212_v1 = vld [vmem:[#allocation28_spill] sm:$0xff]  ;;  %v7217_v59 = vld [vmem:[#allocation62_spill] sm:$0xff] }
 0x30b   :  { %1845 = vmatpush.msrb.mxu2 %v1809_v56  ;;  %v1188_v54 = vadd.f32 %v1127_v12, %v902_v17  ;;  %v7213_v25 = vld [vmem:[#allocation60_spill] sm:$0xff]  ;;  %v3611_v12 = vld [vmem:[%s7083_s5 + $0x118] sm:$0xff]  ;;  %v906_v17 = vadd.f32 %v7217_v59, %v7216_v47 }
 0x30c   :  { %v1587_v13 = vmax.f32 %v1531_v41, 0.0  ;;  %v1588_v18 = vmax.f32 %v1532_v32, 0.0  ;;  %v904_v63 = vadd.f32 %v7213_v25, %v7212_v1  ;;  %2101 = vmatpush.msrb.mxu1 %v3611_v12  ;;  %v907_v1 = vadd.f32 %v7219_v31, %v7218_v36  ;;  %v7220_v25 = vld [vmem:[#allocation32_spill] sm:$0xff]  ;;  %v3608_v12 = vld [vmem:[%s7083_s5 + $0x100] sm:$0xff]  ;;  %v1977_v36 = vld [vmem:[%s7083_s5 + $0x78] sm:$0xff] }
 0x30d   :  { %2055 = vmatpush.msrb.mxu0 %v3608_v12  ;;  %v1963_v12 = vld [vmem:[%s7083_s5 + $0x8] sm:$0xff] }
 0x30f   :  { %v1309_v0 = vpop.f32.mrf.mxu0  ;;  %v1410_v34 = vpop.f32.mrf.mxu1 }
 0x310   :  { %v1471_v30 = vadd.f32 %v1309_v0, %v1185_v11  ;;  %v1472_v16 = vadd.f32 %v1410_v34, %v1186_v23  ;;  %v1190_v11 = vadd.f32 %v1130_v28, %v904_v63  ;;  %v7221_v63 = vld [vmem:[#allocation64_spill] sm:$0xff] }
 0x312   :  { %v1533_v61 = vadd.f32 %v5311_v22, %v1471_v30  ;;  %v1534_v38 = vadd.f32 %v5314_v4, %v1472_v16  ;;  %v1032_v16 = vpop.f32.mrf.mxu2 }
 0x313   :  { %v1191_v56 = vadd.f32 %v1032_v16, %v905_v5  ;;  %v3609_v16 = vld [vmem:[%s7083_s5 + $0x108] sm:$0xff] }
 0x314   :  { %v1589_v2 = vmax.f32 %v1533_v61, 0.0  ;;  %v1590_v20 = vmax.f32 %v1534_v38, 0.0  ;;  %v1133_v61 = vpop.f32.mrf.mxu3  ;;  %2102 = vmatpush.msrb.mxu1 %v3609_v16 }
 0x316   :  { %v5741_v27 = vmax.f32 %v1588_v18, %v1590_v20  ;;  %v5743_v46 = vmax.f32 %v1587_v13, %v1589_v2 }
 0x317   :  { %v1312_v49 = vpop.f32.mrf.mxu0  ;;  %v1413_v7 = vpop.f32.mrf.mxu1 }
 0x318   :  { %1740 = vmatmul.f32.gmra.mxu2 %v5743_v46  ;;  %3581 = vmatmul.msk.f32.gmra.mxu3 %vm1648_vm1, %v5741_v27  ;;  %v1473_v37 = vadd.f32 %v1312_v49, %v1187_v33  ;;  %v1474_v51 = vadd.f32 %v1413_v7, %v1188_v54  ;;  %v1192_v33 = vadd.f32 %v1133_v61, %v906_v17  ;;  %v1980_v17 = vld [vmem:[%s7083_s5 + $0x90] sm:$0xff] }
 0x31a   :  { %v1535_v34 = vadd.f32 %v5311_v22, %v1473_v37  ;;  %v1536_v41 = vadd.f32 %v5314_v4, %v1474_v51  ;;  %v1035_v54 = vpop.f32.mrf.mxu2  ;;  %v908_v37 = vadd.f32 %v7221_v63, %v7220_v25 }
 0x31c   :  { %v1591_v18 = vmax.f32 %v1535_v34, 0.0  ;;  %v1592_v2 = vmax.f32 %v1536_v41, 0.0  ;;  %v1136_v43 = vpop.f32.mrf.mxu3 }
 0x31f   :  { %v1315_v23 = vpop.f32.mrf.mxu0  ;;  %v1416_v0 = vpop.f32.mrf.mxu1 }
 0x320   :  { %v1475_v32 = vadd.f32 %v1315_v23, %v1189_v57  ;;  %v1476_v30 = vadd.f32 %v1416_v0, %v1190_v11  ;;  %v1193_v11 = vadd.f32 %v1035_v54, %v907_v1  ;;  %v1194_v23 = vadd.f32 %v1136_v43, %v908_v37  ;;  %v1979_v54 = vld [vmem:[%s7083_s5 + $0x88] sm:$0xff]  ;;  %v1976_v43 = vld [vmem:[%s7083_s5 + $0x70] sm:$0xff] }
 0x321   :  { %v1972_v37 = vld [vmem:[%s7083_s5 + $0x50] sm:$0xff] }
 0x322   :  { %v1537_v38 = vadd.f32 %v5311_v22, %v1475_v32  ;;  %v1538_v13 = vadd.f32 %v5314_v4, %v1476_v30 }
 0x324   :  { %v1593_v20 = vmax.f32 %v1537_v38, 0.0  ;;  %v1594_v14 = vmax.f32 %v1538_v13, 0.0 }
 0x326   :  { %v5772_v28 = vmax.f32 %v1592_v2, %v1594_v14  ;;  %v5774_v53 = vmax.f32 %v1591_v18, %v1593_v20 }
 0x327   :  { %v1318_v49 = vpop.f32.mrf.mxu0  ;;  %v1419_v7 = vpop.f32.mrf.mxu1 }
 0x328   :  { %1743 = vmatmul.f32.gmra.mxu2 %v5774_v53  ;;  %3582 = vmatmul.msk.f32.gmra.mxu3 %vm1648_vm1, %v5772_v28  ;;  %v1477_v51 = vadd.f32 %v1318_v49, %v1191_v56  ;;  %v1478_v57 = vadd.f32 %v1419_v7, %v1192_v33  ;;  %v7222_v7 = vld [vmem:[#allocation65_spill] sm:$0xff]  ;;  %v1978_v33 = vld [vmem:[%s7083_s5 + $0x80] sm:$0xff] }
 0x329   :  { %v1981_v56 = vld [vmem:[%s7083_s5 + $0x98] sm:$0xff] }
 0x32a   :  { %v1539_v41 = vadd.f32 %v5311_v22, %v1477_v51  ;;  %v1540_v32 = vadd.f32 %v5314_v4, %v1478_v57  ;;  %v1973_v51 = vld [vmem:[%s7083_s5 + $0x58] sm:$0xff]  ;;  %v1970_v57 = vld [vmem:[%s7083_s5 + $0x40] sm:$0xff] }
 0x32c   :  { %v1595_v13 = vmax.f32 %v1539_v41, 0.0  ;;  %v1596_v18 = vmax.f32 %v1540_v32, 0.0  ;;  %v1964_v32 = vld [vmem:[%s7083_s5 + $0x10] sm:$0xff] }
 0x32f   :  { %v1321_v0 = vpop.f32.mrf.mxu0  ;;  %v1422_v34 = vpop.f32.mrf.mxu1 }
 0x330   :  { %v1479_v30 = vadd.f32 %v1321_v0, %v1193_v11  ;;  %v1480_v58 = vadd.f32 %v1422_v34, %v1194_v23  ;;  %v1971_v11 = vld [vmem:[%s7083_s5 + $0x48] sm:$0xff]  ;;  %v1968_v23 = vld [vmem:[%s7083_s5 + $0x30] sm:$0xff]  ;;  %v1969_v0 = vld [vmem:[%s7083_s5 + $0x38] sm:$0xff] }
 0x332   :  { %v1541_v61 = vadd.f32 %v5311_v22, %v1479_v30  ;;  %v1542_v38 = vadd.f32 %v5314_v4, %v1480_v58  ;;  %v3606_v4 = vld [vmem:[%s7083_s5 + $0xf0] sm:$0xff]  ;;  %v3607_v22 = vld [vmem:[%s7083_s5 + $0xf8] sm:$0xff]  ;;  %v1962_v58 = vld [vmem:[%s7083_s5] sm:$0xff] }
 0x333   :  { %2056 = vmatpush.msrb.mxu0 %v3606_v4  ;;  %2103 = vmatpush.msrb.mxu1 %v3607_v22  ;;  %v1965_v30 = vld [vmem:[%s7083_s5 + $0x18] sm:$0xff]  ;;  %v3680_v4 = vld [vmem:[%s7083_s5 + $0x1e0] sm:$0xff]  ;;  %v3681_v22 = vld [vmem:[%s7083_s5 + $0x1e8] sm:$0xff] }
 0x334   :  { %v1597_v2 = vmax.f32 %v1541_v61, 0.0  ;;  %v1598_v20 = vmax.f32 %v1542_v38, 0.0  ;;  %v3684_v38 = vld [vmem:[%s7083_s5 + $0x200] sm:$0xf] }
 0x336   :  { %v5797_v14 = vmax.f32 %v1596_v18, %v1598_v20  ;;  %v5799_v49 = vmax.f32 %v1595_v13, %v1597_v2  ;;  %v3685_v13 = vld [vmem:[%s7083_s5 + $0x208] sm:$0xf]  ;;  %v3682_v20 = vld [vmem:[%s7083_s5 + $0x1f0] sm:$0xff] }
 0x338   :  { %1746 = vmatmul.f32.gmra.mxu2 %v5799_v49  ;;  %3583 = vmatmul.msk.f32.gmra.mxu3 %vm1648_vm1, %v5797_v14 }
 0x340   :  { %1846 = vmatmul.f32.vlgmr.msrb.gmra.mxu2 %v5331_v10  ;;  %3584 = vmatmul.msk.f32.vlgmr.msrb.gmra.mxu3 %vm1648_vm1, %v7222_v7  ;;  %v5819_v10 = vpop.f32.mrf.mxu2 }
 0x348   :  { %1849 = vmatmul.f32.gmra.mxu2 %v5366_v50  ;;  %3585 = vmatmul.msk.f32.gmra.mxu3 %vm1648_vm1, %v5364_v35  ;;  %v5821_v50 = vpop.f32.mrf.mxu3  ;;  %v5826_v35 = vpop.f32.mrf.mxu2 }
 0x350   :  { %1852 = vmatmul.f32.gmra.mxu2 %v5403_v6  ;;  %3586 = vmatmul.msk.f32.gmra.mxu3 %vm1648_vm1, %v5401_v29  ;;  %v5828_v15 = vpop.f32.mrf.mxu3  ;;  %v3604_v6 = vld [vmem:[%s7083_s5 + $0xe0] sm:$0xff]  ;;  %v3605_v29 = vld [vmem:[%s7083_s5 + $0xe8] sm:$0xff] }
 0x351   :  { %2057 = vmatpush.msrb.mxu0 %v3604_v6  ;;  %2104 = vmatpush.msrb.mxu1 %v3605_v29 }
 0x358   :  { %1855 = vmatmul.f32.gmra.mxu2 %v5444_v24  ;;  %3587 = vmatmul.msk.f32.gmra.mxu3 %vm1648_vm1, %v5442_v21  ;;  %v5839_v21 = vpop.f32.mrf.mxu2  ;;  %v5841_v24 = vpop.f32.mrf.mxu3 }
 0x360   :  { %1858 = vmatmul.f32.gmra.mxu2 %v5480_v48  ;;  %3588 = vmatmul.msk.f32.gmra.mxu3 %vm1648_vm1, %v5478_v19  ;;  %v5846_v62 = vpop.f32.mrf.mxu2  ;;  %v5848_v5 = vpop.f32.mrf.mxu3  ;;  %v3602_v19 = vld [vmem:[%s7083_s5 + $0xd0] sm:$0xff]  ;;  %v3603_v48 = vld [vmem:[%s7083_s5 + $0xd8] sm:$0xff] }
 0x361   :  { %2058 = vmatpush.msrb.mxu0 %v3602_v19  ;;  %2105 = vmatpush.msrb.mxu1 %v3603_v48  ;;  %v1768_v19 = vadd.f32 %v5821_v50, %v5819_v10  ;;  %v1771_v10 = vadd.f32 %v5828_v15, %v5826_v35 }
 0x368   :  { %1861 = vmatmul.f32.gmra.mxu2 %v5520_v42  ;;  %3589 = vmatmul.msk.f32.gmra.mxu3 %vm1648_vm1, %v5518_v45  ;;  %v5859_v45 = vpop.f32.mrf.mxu2  ;;  %v5861_v42 = vpop.f32.mrf.mxu3 }
 0x370   :  { %1864 = vmatmul.f32.gmra.mxu2 %v5563_v9  ;;  %3590 = vmatmul.msk.f32.gmra.mxu3 %vm1648_vm1, %v5561_v39  ;;  %v5866_v39 = vpop.f32.mrf.mxu2  ;;  %v5868_v9 = vpop.f32.mrf.mxu3 }
 0x378   :  { %1867 = vmatmul.f32.gmra.mxu2 %v5599_v55  ;;  %3591 = vmatmul.msk.f32.gmra.mxu3 %vm1648_vm1, %v5597_v44  ;;  %v5873_v47 = vpop.f32.mrf.mxu2  ;;  %v5875_v59 = vpop.f32.mrf.mxu3  ;;  %v3600_v44 = vld [vmem:[%s7083_s5 + $0xc0] sm:$0xff]  ;;  %v3601_v55 = vld [vmem:[%s7083_s5 + $0xc8] sm:$0xff] }
 0x379   :  { %2059 = vmatpush.msrb.mxu0 %v3600_v44  ;;  %2106 = vmatpush.msrb.mxu1 %v3601_v55  ;;  %v3678_v55 = vld [vmem:[%s7083_s5 + $0x1d0] sm:$0xff] }
 0x380   :  { %1870 = vmatmul.f32.gmra.mxu2 %v5639_v3  ;;  %3592 = vmatmul.msk.f32.gmra.mxu3 %vm1648_vm1, %v5637_v60  ;;  %v1982_v60 = vld [vmem:[%s7083_s5 + $0xa0] sm:$0xf]  ;;  %v1983_v3 = vld [vmem:[%s7083_s5 + $0xa8] sm:$0xf] }
 0x381   :  { %3642 = vmatpush.msk.msra.mxu2 %vm2038_vm2, %v1982_v60  ;;  %3653 = vmatpush.msk.msra.mxu3 %vm2038_vm2, %v1983_v3  ;;  %v3679_v60 = vld [vmem:[%s7083_s5 + $0x1d8] sm:$0xff] }
 0x383   :  { %2154 = vmatpush.msra.mxu2 %v1980_v17  ;;  %2201 = vmatpush.msra.mxu3 %v1981_v56 }
 0x385   :  { %2155 = vmatpush.msra.mxu2 %v1978_v33  ;;  %2202 = vmatpush.msra.mxu3 %v1979_v54  ;;  %v3676_v33 = vld [vmem:[%s7083_s5 + $0x1c0] sm:$0xff]  ;;  %v3677_v54 = vld [vmem:[%s7083_s5 + $0x1c8] sm:$0xff] }
 0x387   :  { %2156 = vmatpush.msra.mxu2 %v1976_v43  ;;  %2203 = vmatpush.msra.mxu3 %v1977_v36  ;;  %v1774_v43 = vadd.f32 %v5841_v24, %v5839_v21 }
 0x388   :  { %1873 = vmatmul.f32.gmra.mxu2 %v5672_v40  ;;  %3593 = vmatmul.msk.f32.gmra.mxu3 %vm1648_vm1, %v5670_v52  ;;  %v5894_v52 = vpop.f32.mrf.mxu2  ;;  %v5896_v40 = vpop.f32.mrf.mxu3 }
 0x390   :  { %1876 = vmatmul.f32.gmra.mxu2 %v5709_v26  ;;  %3594 = vmatmul.msk.f32.gmra.mxu3 %vm1648_vm1, %v5707_v8  ;;  %v5919_v31 = vpop.f32.mrf.mxu2  ;;  %v5921_v1 = vpop.f32.mrf.mxu3  ;;  %v1974_v26 = vld [vmem:[%s7083_s5 + $0x60] sm:$0xff]  ;;  %v1975_v8 = vld [vmem:[%s7083_s5 + $0x68] sm:$0xff] }
 0x391   :  { %2157 = vmatpush.msra.mxu2 %v1974_v26  ;;  %2204 = vmatpush.msra.mxu3 %v1975_v8  ;;  %v3674_v8 = vld [vmem:[%s7083_s5 + $0x1b0] sm:$0xff] }
 0x393   :  { %2158 = vmatpush.msra.mxu2 %v1972_v37  ;;  %2205 = vmatpush.msra.mxu3 %v1973_v51 }
 0x395   :  { %2159 = vmatpush.msra.mxu2 %v1970_v57  ;;  %2206 = vmatpush.msra.mxu3 %v1971_v11  ;;  %v3672_v57 = vld [vmem:[%s7083_s5 + $0x1a0] sm:$0xff]  ;;  %v3673_v11 = vld [vmem:[%s7083_s5 + $0x1a8] sm:$0xff] }
 0x397   :  { %2160 = vmatpush.msra.mxu2 %v1968_v23  ;;  %2207 = vmatpush.msra.mxu3 %v1969_v0  ;;  %v3728_v23 = vld [vmem:[%s7083_s5 + $0x2b0] sm:$0xf]  ;;  %v3729_v0 = vld [vmem:[%s7083_s5 + $0x2b8] sm:$0xf] }
 0x398   :  { %1879 = vmatmul.f32.gmra.mxu2 %v5743_v46  ;;  %3595 = vmatmul.msk.f32.gmra.mxu3 %vm1648_vm1, %v5741_v27  ;;  %v5926_v25 = vpop.f32.mrf.mxu2  ;;  %v5928_v63 = vpop.f32.mrf.mxu3  ;;  %v3598_v46 = vld [vmem:[%s7083_s5 + $0xb0] sm:$0xff]  ;;  %v3599_v27 = vld [vmem:[%s7083_s5 + $0xb8] sm:$0xff] }
 0x399   :  { %2060 = vmatpush.msrb.mxu0 %v3598_v46  ;;  %2107 = vmatpush.msrb.mxu1 %v3599_v27  ;;  %v3675_v46 = vld [vmem:[%s7083_s5 + $0x1b8] sm:$0xff]  ;;  %v1777_v27 = vadd.f32 %v5848_v5, %v5846_v62 }
 0x39b   :  { %3686 = vmatpush.msk.msra.mxu0 %vm2038_vm2, %v3684_v38  ;;  %3697 = vmatpush.msk.msra.mxu1 %vm2038_vm2, %v3685_v13  ;;  %v3725_v38 = vld [vmem:[%s7083_s5 + $0x298] sm:$0xff]  ;;  %v3722_v13 = vld [vmem:[%s7083_s5 + $0x280] sm:$0xff] }
 0x39d   :  { %2280 = vmatpush.msra.mxu0 %v3682_v20  ;;  %v3723_v20 = vld [vmem:[%s7083_s5 + $0x288] sm:$0xff] }
 0x39f   :  { %2281 = vmatpush.msra.mxu0 %v3680_v4 }
 0x3a0   :  { %1882 = vmatmul.f32.gmra.mxu2 %v5774_v53  ;;  %3596 = vmatmul.msk.f32.gmra.mxu3 %vm1648_vm1, %v5772_v28  ;;  %v5963_v34 = vpop.f32.mrf.mxu2  ;;  %v5965_v41 = vpop.f32.mrf.mxu3  ;;  %v1966_v28 = vld [vmem:[%s7083_s5 + $0x20] sm:$0xff]  ;;  %v1967_v53 = vld [vmem:[%s7083_s5 + $0x28] sm:$0xff] }
 0x3a1   :  { %2161 = vmatpush.msra.mxu2 %v1966_v28  ;;  %2208 = vmatpush.msra.mxu3 %v1967_v53  ;;  %v1780_v28 = vadd.f32 %v5861_v42, %v5859_v45  ;;  %v3671_v45 = vld [vmem:[%s7083_s5 + $0x198] sm:$0xff]  ;;  %v3724_v42 = vld [vmem:[%s7083_s5 + $0x290] sm:$0xff] }
 0x3a2   :  { %2282 = vmatpush.msra.mxu0 %v3678_v55  ;;  %v3669_v55 = vld [vmem:[%s7083_s5 + $0x188] sm:$0xff] }
 0x3a3   :  { %2162 = vmatpush.msra.mxu2 %v1964_v32  ;;  %2209 = vmatpush.msra.mxu3 %v1965_v30  ;;  %v3726_v32 = vld [vmem:[%s7083_s5 + $0x2a0] sm:$0xff]  ;;  %v3727_v30 = vld [vmem:[%s7083_s5 + $0x2a8] sm:$0xff] }
 0x3a4   :  { %2283 = vmatpush.msra.mxu0 %v3676_v33  ;;  %v3714_v33 = vld [vmem:[%s7083_s5 + $0x240] sm:$0xff] }
 0x3a5   :  { %2163 = vmatpush.msra.mxu2 %v1962_v58  ;;  %2210 = vmatpush.msra.mxu3 %v1963_v12  ;;  %v3670_v12 = vld [vmem:[%s7083_s5 + $0x190] sm:$0xff] }
 0x3a6   :  { %2284 = vmatpush.msra.mxu0 %v3674_v8  ;;  %v3713_v8 = vld [vmem:[%s7083_s5 + $0x238] sm:$0xff] }
 0x3a7   :  { %3730 = vmatpush.msk.msrb.mxu2 %vm2038_vm2, %v3728_v23  ;;  %3741 = vmatpush.msk.msrb.mxu3 %vm2038_vm2, %v3729_v0 }
 0x3a8   :  { %1885 = vmatmul.f32.gmra.mxu2 %v5799_v49  ;;  %3597 = vmatmul.msk.f32.gmra.mxu3 %vm1648_vm1, %v5797_v14  ;;  %v5988_v16 = vpop.f32.mrf.mxu2  ;;  %v5990_v61 = vpop.f32.mrf.mxu3  ;;  %v3683_v14 = vld [vmem:[%s7083_s5 + $0x1f8] sm:$0xff] }
 0x3a9   :  { %2327 = vmatpush.msra.mxu1 %v3683_v14  ;;  %2285 = vmatpush.msra.mxu0 %v3672_v57  ;;  %v3709_v57 = vld [vmem:[%s7083_s5 + $0x218] sm:$0xff] }
 0x3aa   :  { %2426 = vmatpush.msrb.mxu2 %v3726_v32  ;;  %2473 = vmatpush.msrb.mxu3 %v3727_v30  ;;  %v3770_v30 = vld [vmem:[%s7083_s5 + $0x350] sm:$0xff] }
 0x3ab   :  { %2328 = vmatpush.msra.mxu1 %v3681_v22  ;;  %2286 = vmatpush.msra.mxu0 %v3670_v12  ;;  %v3720_v22 = vld [vmem:[%s7083_s5 + $0x270] sm:$0xff] }
 0x3ac   :  { %2427 = vmatpush.msrb.mxu2 %v3724_v42  ;;  %2474 = vmatpush.msrb.mxu3 %v3725_v38 }
 0x3ad   :  { %2329 = vmatpush.msra.mxu1 %v3679_v60  ;;  %v3716_v60 = vld [vmem:[%s7083_s5 + $0x250] sm:$0xff] }
 0x3ae   :  { %2428 = vmatpush.msrb.mxu2 %v3722_v13  ;;  %2475 = vmatpush.msrb.mxu3 %v3723_v20  ;;  %v3768_v13 = vld [vmem:[%s7083_s5 + $0x340] sm:$0xff]  ;;  %v3769_v20 = vld [vmem:[%s7083_s5 + $0x348] sm:$0xff] }
 0x3af   :  { %2330 = vmatpush.msra.mxu1 %v3677_v54  ;;  %v3715_v54 = vld [vmem:[%s7083_s5 + $0x248] sm:$0xff] }
 0x3b0   :  { %v6000_v18 = vpop.f32.mrf.mxu2  ;;  %v6002_v2 = vpop.f32.mrf.mxu3  ;;  %2429 = vmatpush.msrb.mxu2 %v3720_v22  ;;  %v1798_v22 = vadd.f32 %v5965_v41, %v5963_v34  ;;  %v3765_v34 = vld [vmem:[%s7083_s5 + $0x328] sm:$0xff]  ;;  %v3762_v41 = vld [vmem:[%s7083_s5 + $0x310] sm:$0xff] }
 0x3b1   :  { %2331 = vmatpush.msra.mxu1 %v3675_v46  ;;  %v3664_v46 = vld [vmem:[%s7083_s5 + $0x160] sm:$0xff] }
 0x3b3   :  { %2332 = vmatpush.msra.mxu1 %v3673_v11  ;;  %v1789_v11 = vadd.f32 %v5896_v40, %v5894_v52  ;;  %v3772_v52 = vld [vmem:[%s7083_s5 + $0x360] sm:$0xf]  ;;  %v3773_v40 = vld [vmem:[%s7083_s5 + $0x368] sm:$0xf] }
 0x3b5   :  { %2333 = vmatpush.msra.mxu1 %v3671_v45  ;;  %v1795_v45 = vadd.f32 %v5928_v63, %v5926_v25  ;;  %v3766_v25 = vld [vmem:[%s7083_s5 + $0x330] sm:$0xff]  ;;  %v3767_v63 = vld [vmem:[%s7083_s5 + $0x338] sm:$0xff] }
 0x3b7   :  { %2334 = vmatpush.msra.mxu1 %v3669_v55  ;;  %v3761_v55 = vld [vmem:[%s7083_s5 + $0x308] sm:$0xff] }
 0x3bb   :  { %v6010_v49 = vpop.f32.mrf.mxu2  ;;  %v6012_v7 = vpop.f32.mrf.mxu3 }
 0x3c3   :  { %v1847_v6 = vpop.f32.mrf.mxu2  ;;  %v1906_v29 = vpop.f32.mrf.mxu3 }
 0x3c4   :  { %v1907_v48 = vadd.f32 %v1906_v29, %v1847_v6  ;;  %v3721_v6 = vld [vmem:[%s7083_s5 + $0x278] sm:$0xff]  ;;  %v1783_v29 = vadd.f32 %v5868_v9, %v5866_v39  ;;  %v3718_v39 = vld [vmem:[%s7083_s5 + $0x260] sm:$0xff]  ;;  %v3719_v9 = vld [vmem:[%s7083_s5 + $0x268] sm:$0xff] }
 0x3c5   :  { %2476 = vmatpush.msrb.mxu3 %v3721_v6  ;;  %2430 = vmatpush.msrb.mxu2 %v3718_v39 }
 0x3c6   :  { %v1948_v44 = vmax.f32 %v1768_v19, %v1907_v48 }
 0x3c7   :  { %2477 = vmatpush.msrb.mxu3 %v3719_v9  ;;  %2431 = vmatpush.msrb.mxu2 %v3716_v60  ;;  %v3759_v60 = vld [vmem:[%s7083_s5 + $0x2f8] sm:$0xff] }
 0x3c8   :  { %3643 = vmatmul.msk.f32.vlgmr.msra.gmra.mxu2 %vm2007_vm3, %v1948_v44  ;;  %3654 = vmatmul.msk.f32.vlgmr.msra.gmra.mxu3 %vm2007_vm3, %v1948_v44  ;;  %v3668_v44 = vld [vmem:[%s7083_s5 + $0x180] sm:$0xff] }
 0x3c9   :  { %2287 = vmatpush.msra.mxu0 %v3668_v44  ;;  %2432 = vmatpush.msrb.mxu2 %v3714_v33  ;;  %v3763_v44 = vld [vmem:[%s7083_s5 + $0x318] sm:$0xff] }
 0x3ca   :  { %v3755_v33 = vld [vmem:[%s7083_s5 + $0x2d8] sm:$0xff] }
 0x3cb   :  { %v1850_v3 = vpop.f32.mrf.mxu2  ;;  %v1909_v17 = vpop.f32.mrf.mxu3 }
 0x3cc   :  { %v1910_v50 = vadd.f32 %v1909_v17, %v1850_v3  ;;  %v3717_v3 = vld [vmem:[%s7083_s5 + $0x258] sm:$0xff]  ;;  %v3666_v17 = vld [vmem:[%s7083_s5 + $0x170] sm:$0xff] }
 0x3cd   :  { %2288 = vmatpush.msra.mxu0 %v3666_v17  ;;  %2478 = vmatpush.msrb.mxu3 %v3717_v3 }
 0x3ce   :  { %v1949_v56 = vmax.f32 %v1771_v10, %v1910_v50  ;;  %v3667_v10 = vld [vmem:[%s7083_s5 + $0x178] sm:$0xff] }
 0x3cf   :  { %2335 = vmatpush.msra.mxu1 %v3667_v10  ;;  %2479 = vmatpush.msrb.mxu3 %v3715_v54  ;;  %v3756_v10 = vld [vmem:[%s7083_s5 + $0x2e0] sm:$0xff] }
 0x3d0   :  { %3621 = vmatmul.msk.f32.vlgmr.msrb.gmra.mxu0 %vm2007_vm3, %v1949_v56  ;;  %3632 = vmatmul.msk.f32.vlgmr.msrb.gmra.mxu1 %vm2007_vm3, %v1949_v56 }
 0x3d1   :  { %3644 = vmatmul.msk.f32.gmra.mxu2 %vm2007_vm3, %v1949_v56  ;;  %3655 = vmatmul.msk.f32.gmra.mxu3 %vm2007_vm3, %v1949_v56 }
 0x3d2   :  { %2480 = vmatpush.msrb.mxu3 %v3713_v8  ;;  %2289 = vmatpush.msra.mxu0 %v3664_v46 }
 0x3d3   :  { %v1853_v35 = vpop.f32.mrf.mxu2  ;;  %v1912_v15 = vpop.f32.mrf.mxu3 }
 0x3d4   :  { %v1913_v36 = vadd.f32 %v1912_v15, %v1853_v35  ;;  %v1786_v35 = vadd.f32 %v5875_v59, %v5873_v47  ;;  %v3710_v47 = vld [vmem:[%s7083_s5 + $0x220] sm:$0xff]  ;;  %v3711_v59 = vld [vmem:[%s7083_s5 + $0x228] sm:$0xff]  ;;  %3774 = vmatpush.msk.msrb.mxu0 %vm2038_vm2, %v3772_v52 }
 0x3d5   :  { %2481 = vmatpush.msrb.mxu3 %v3711_v59 }
 0x3d6   :  { %v6044_v26 = vmax.f32 %v1774_v43, %v1913_v36  ;;  %v3712_v36 = vld [vmem:[%s7083_s5 + $0x230] sm:$0xff]  ;;  %2572 = vmatpush.msrb.mxu0 %v3770_v30 }
 0x3d7   :  { %2433 = vmatpush.msrb.mxu2 %v3712_v36  ;;  %2482 = vmatpush.msrb.mxu3 %v3709_v57  ;;  %v3753_v36 = vld [vmem:[%s7083_s5 + $0x2c8] sm:$0xff] }
 0x3d8   :  { %3622 = vmatmul.msk.f32.gmra.mxu0 %vm2007_vm3, %v6044_v26  ;;  %3633 = vmatmul.msk.f32.gmra.mxu1 %vm2007_vm3, %v6044_v26 }
 0x3d9   :  { %3645 = vmatmul.msk.f32.gmra.mxu2 %vm2007_vm3, %v6044_v26  ;;  %3656 = vmatmul.msk.f32.gmra.mxu3 %vm2007_vm3, %v6044_v26 }
 0x3da   :  { %2434 = vmatpush.msrb.mxu2 %v3710_v47  ;;  %2573 = vmatpush.msrb.mxu0 %v3768_v13 }
 0x3db   :  { %v1856_v21 = vpop.f32.mrf.mxu2  ;;  %v1915_v24 = vpop.f32.mrf.mxu3 }
 0x3dc   :  { %v1916_v37 = vadd.f32 %v1915_v24, %v1856_v21  ;;  %v3665_v21 = vld [vmem:[%s7083_s5 + $0x168] sm:$0xff]  ;;  %2574 = vmatpush.msrb.mxu0 %v3766_v25 }
 0x3dd   :  { %2336 = vmatpush.msra.mxu1 %v3665_v21 }
 0x3de   :  { %v6062_v51 = vmax.f32 %v1777_v27, %v1916_v37  ;;  %v3708_v37 = vld [vmem:[%s7083_s5 + $0x210] sm:$0xff] }
 0x3df   :  { %2435 = vmatpush.msrb.mxu2 %v3708_v37  ;;  %3785 = vmatpush.msk.msrb.mxu1 %vm2038_vm2, %v3773_v40  ;;  %v1801_v37 = vadd.f32 %v5990_v61, %v5988_v16  ;;  %v1804_v40 = vadd.f32 %v6002_v2, %v6000_v18 }
 0x3e0   :  { %3623 = vmatmul.msk.f32.gmra.mxu0 %vm2007_vm3, %v6062_v51  ;;  %3634 = vmatmul.msk.f32.gmra.mxu1 %vm2007_vm3, %v6062_v51 }
 0x3e1   :  { %3646 = vmatmul.msk.f32.gmra.mxu2 %vm2007_vm3, %v6062_v51  ;;  %3657 = vmatmul.msk.f32.gmra.mxu3 %vm2007_vm3, %v6062_v51 }
 0x3e3   :  { %v1859_v62 = vpop.f32.mrf.mxu2  ;;  %v1918_v5 = vpop.f32.mrf.mxu3 }
 0x3e4   :  { %v1919_v53 = vadd.f32 %v1918_v5, %v1859_v62 }
 0x3e6   :  { %v6094_v58 = vmax.f32 %v1780_v28, %v1919_v53  ;;  %v1792_v28 = vadd.f32 %v5921_v1, %v5919_v31  ;;  %v3771_v31 = vld [vmem:[%s7083_s5 + $0x358] sm:$0xff] }
 0x3e7   :  { %2619 = vmatpush.msrb.mxu1 %v3771_v31 }
 0x3e8   :  { %3624 = vmatmul.msk.f32.gmra.mxu0 %vm2007_vm3, %v6094_v58  ;;  %3635 = vmatmul.msk.f32.gmra.mxu1 %vm2007_vm3, %v6094_v58 }
 0x3e9   :  { %3647 = vmatmul.msk.f32.gmra.mxu2 %vm2007_vm3, %v6094_v58  ;;  %3658 = vmatmul.msk.f32.gmra.mxu3 %vm2007_vm3, %v6094_v58 }
 0x3ea   :  { %2620 = vmatpush.msrb.mxu1 %v3769_v20 }
 0x3eb   :  { %v1862_v14 = vpop.f32.mrf.mxu2  ;;  %v1921_v4 = vpop.f32.mrf.mxu3 }
 0x3ec   :  { %v1922_v19 = vadd.f32 %v1921_v4, %v1862_v14  ;;  %2621 = vmatpush.msrb.mxu1 %v3767_v63 }
 0x3ee   :  { %v6130_v48 = vmax.f32 %v1783_v29, %v1922_v19  ;;  %v3764_v19 = vld [vmem:[%s7083_s5 + $0x320] sm:$0xff]  ;;  %2622 = vmatpush.msrb.mxu1 %v3765_v34 }
 0x3ef   :  { %2575 = vmatpush.msrb.mxu0 %v3764_v19 }
 0x3f0   :  { %3625 = vmatmul.msk.f32.gmra.mxu0 %vm2007_vm3, %v6130_v48  ;;  %3636 = vmatmul.msk.f32.gmra.mxu1 %vm2007_vm3, %v6130_v48 }
 0x3f1   :  { %3648 = vmatmul.msk.f32.gmra.mxu2 %vm2007_vm3, %v6130_v48  ;;  %3659 = vmatmul.msk.f32.gmra.mxu3 %vm2007_vm3, %v6130_v48 }
 0x3f2   :  { %2576 = vmatpush.msrb.mxu0 %v3762_v41  ;;  %2623 = vmatpush.msrb.mxu1 %v3763_v44 }
 0x3f3   :  { %v1865_v50 = vpop.f32.mrf.mxu2  ;;  %v1924_v56 = vpop.f32.mrf.mxu3 }
 0x3f4   :  { %v1925_v15 = vadd.f32 %v1924_v56, %v1865_v50  ;;  %2624 = vmatpush.msrb.mxu1 %v3761_v55  ;;  %v3757_v50 = vld [vmem:[%s7083_s5 + $0x2e8] sm:$0xff]  ;;  %v3754_v56 = vld [vmem:[%s7083_s5 + $0x2d0] sm:$0xff] }
 0x3f6   :  { %v6172_v43 = vmax.f32 %v1786_v35, %v1925_v15  ;;  %2625 = vmatpush.msrb.mxu1 %v3759_v60  ;;  %v3752_v15 = vld [vmem:[%s7083_s5 + $0x2c0] sm:$0xff] }
 0x3f8   :  { %3626 = vmatmul.msk.f32.gmra.mxu0 %vm2007_vm3, %v6172_v43  ;;  %3637 = vmatmul.msk.f32.gmra.mxu1 %vm2007_vm3, %v6172_v43 }
 0x3f9   :  { %3649 = vmatmul.msk.f32.gmra.mxu2 %vm2007_vm3, %v6172_v43  ;;  %3660 = vmatmul.msk.f32.gmra.mxu3 %vm2007_vm3, %v6172_v43 }
 0x3fa   :  { %2626 = vmatpush.msrb.mxu1 %v3757_v50 }
 0x3fb   :  { %v1868_v24 = vpop.f32.mrf.mxu2  ;;  %v1927_v27 = vpop.f32.mrf.mxu3 }
 0x3fc   :  { %v1928_v62 = vadd.f32 %v1927_v27, %v1868_v24  ;;  %2627 = vmatpush.msrb.mxu1 %v3755_v33  ;;  %v2751_v33 = vld [vmem:[%s7084_s7 + $0x78] sm:$0xff] }
 0x3fd   :  { %2772 = vmatpush.msra.mxu2 %v2751_v33  ;;  %v2742_v33 = vld [vmem:[%s7084_s7 + $0x30] sm:$0xff] }
 0x3fe   :  { %v6208_v5 = vmax.f32 %v1789_v11, %v1928_v62  ;;  %2628 = vmatpush.msrb.mxu1 %v3753_v36  ;;  %v1807_v36 = vadd.f32 %v6012_v7, %v6010_v49 }
 0x400   :  { %3627 = vmatmul.msk.f32.gmra.mxu0 %vm2007_vm3, %v6208_v5  ;;  %3638 = vmatmul.msk.f32.gmra.mxu1 %vm2007_vm3, %v6208_v5 }
 0x401   :  { %3650 = vmatmul.msk.f32.gmra.mxu2 %vm2007_vm3, %v6208_v5  ;;  %3661 = vmatmul.msk.f32.gmra.mxu3 %vm2007_vm3, %v6208_v5 }
 0x403   :  { %v1871_v23 = vpop.f32.mrf.mxu2  ;;  %v1930_v0 = vpop.f32.mrf.mxu3 }
 0x404   :  { %v1931_v53 = vadd.f32 %v1930_v0, %v1871_v23 }
 0x406   :  { %v6228_v32 = vmax.f32 %v1792_v28, %v1931_v53 }
 0x408   :  { %3628 = vmatmul.msk.f32.gmra.mxu0 %vm2007_vm3, %v6228_v32  ;;  %3639 = vmatmul.msk.f32.gmra.mxu1 %vm2007_vm3, %v6228_v32 }
 0x409   :  { %3651 = vmatmul.msk.f32.gmra.mxu2 %vm2007_vm3, %v6228_v32  ;;  %3662 = vmatmul.msk.f32.gmra.mxu3 %vm2007_vm3, %v6228_v32 }
 0x40b   :  { %v1874_v1 = vpop.f32.mrf.mxu2  ;;  %v1933_v12 = vpop.f32.mrf.mxu3 }
 0x40c   :  { %v1934_v42 = vadd.f32 %v1933_v12, %v1874_v1 }
 0x40e   :  { %v6246_v38 = vmax.f32 %v1795_v45, %v1934_v42 }
 0x410   :  { %3629 = vmatmul.msk.f32.gmra.mxu0 %vm2007_vm3, %v6246_v38  ;;  %3640 = vmatmul.msk.f32.gmra.mxu1 %vm2007_vm3, %v6246_v38 }
 0x411   :  { %3652 = vmatmul.msk.f32.gmra.mxu2 %vm2007_vm3, %v6246_v38  ;;  %3663 = vmatmul.msk.f32.gmra.mxu3 %vm2007_vm3, %v6246_v38 }
 0x413   :  { %v1877_v14 = vpop.f32.mrf.mxu2  ;;  %v1936_v4 = vpop.f32.mrf.mxu3 }
 0x414   :  { %v1937_v6 = vadd.f32 %v1936_v4, %v1877_v14 }
 0x416   :  { %v6270_v29 = vmax.f32 %v1798_v22, %v1937_v6 }
 0x418   :  { %3630 = vmatmul.msk.f32.gmra.mxu0 %vm2007_vm3, %v6270_v29  ;;  %3641 = vmatmul.msk.f32.gmra.mxu1 %vm2007_vm3, %v6270_v29 }
 0x419   :  { %3731 = vmatmul.msk.f32.vlgmr.msrb.gmra.mxu2 %vm2007_vm3, %v6062_v51  ;;  %3742 = vmatmul.msk.f32.vlgmr.msrb.gmra.mxu3 %vm2007_vm3, %v6062_v51 }
 0x41b   :  { %v1880_v39 = vpop.f32.mrf.mxu2  ;;  %v1939_v9 = vpop.f32.mrf.mxu3 }
 0x41c   :  { %v1940_v21 = vadd.f32 %v1939_v9, %v1880_v39 }
 0x41e   :  { %v6400_v62 = vmax.f32 %v1801_v37, %v1940_v21  ;;  %v2750_v21 = vld [vmem:[%s7084_s7 + $0x70] sm:$0xff] }
 0x41f   :  { %2773 = vmatpush.msra.mxu2 %v2750_v21 }
 0x420   :  { %3687 = vmatmul.msk.f32.vlgmr.msra.gmra.mxu0 %vm2007_vm3, %v6044_v26  ;;  %3698 = vmatmul.msk.f32.vlgmr.msra.gmra.mxu1 %vm2007_vm3, %v6044_v26  ;;  %v3760_v26 = vld [vmem:[%s7083_s5 + $0x300] sm:$0xff] }
 0x421   :  { %3732 = vmatmul.msk.f32.gmra.mxu2 %vm2007_vm3, %v6094_v58  ;;  %3743 = vmatmul.msk.f32.gmra.mxu3 %vm2007_vm3, %v6094_v58 }
 0x422   :  { %2577 = vmatpush.msrb.mxu0 %v3760_v26 }
 0x423   :  { %v1883_v3 = vpop.f32.mrf.mxu2  ;;  %v1942_v17 = vpop.f32.mrf.mxu3 }
 0x424   :  { %v1943_v52 = vadd.f32 %v1942_v17, %v1883_v3 }
 0x426   :  { %v6420_v28 = vmax.f32 %v1804_v40, %v1943_v52  ;;  %v2749_v40 = vld [vmem:[%s7084_s7 + $0x68] sm:$0xff] }
 0x427   :  { %2774 = vmatpush.msra.mxu2 %v2749_v40 }
 0x428   :  { %3688 = vmatmul.msk.f32.gmra.mxu0 %vm2007_vm3, %v6062_v51  ;;  %3699 = vmatmul.msk.f32.gmra.mxu1 %vm2007_vm3, %v6062_v51  ;;  %v3758_v51 = vld [vmem:[%s7083_s5 + $0x2f0] sm:$0xff] }
 0x429   :  { %3733 = vmatmul.msk.f32.gmra.mxu2 %vm2007_vm3, %v6130_v48  ;;  %3744 = vmatmul.msk.f32.gmra.mxu3 %vm2007_vm3, %v6130_v48 }
 0x42a   :  { %2578 = vmatpush.msrb.mxu0 %v3758_v51 }
 0x42b   :  { %v6356_v54 = vpop.f32.mrf.mxu2  ;;  %v6358_v35 = vpop.f32.mrf.mxu3 }
 0x42c   :  { %2579 = vmatpush.msrb.mxu0 %v3756_v10 }
 0x42e   :  { %2580 = vmatpush.msrb.mxu0 %v3754_v56 }
 0x430   :  { %3689 = vmatmul.msk.f32.gmra.mxu0 %vm2007_vm3, %v6094_v58  ;;  %3700 = vmatmul.msk.f32.gmra.mxu1 %vm2007_vm3, %v6094_v58 }
 0x431   :  { %3734 = vmatmul.msk.f32.gmra.mxu2 %vm2007_vm3, %v6172_v43  ;;  %3745 = vmatmul.msk.f32.gmra.mxu3 %vm2007_vm3, %v6172_v43 }
 0x432   :  { %2581 = vmatpush.msrb.mxu0 %v3752_v15  ;;  %v1946_v15 = vadd.f32 %v6358_v35, %v6356_v54  ;;  %v2748_v54 = vld [vmem:[%s7084_s7 + $0x60] sm:$0xff]  ;;  %v2747_v35 = vld [vmem:[%s7084_s7 + $0x58] sm:$0xff] }
 0x433   :  { %2775 = vmatpush.msra.mxu2 %v2748_v54  ;;  %v2739_v54 = vld [vmem:[%s7084_s7 + $0x18] sm:$0xff] }
 0x434   :  { %v1961_v52 = vmax.f32 %v1807_v36, %v1946_v15 }
 0x435   :  { %2776 = vmatpush.msra.mxu2 %v2747_v35 }
 0x438   :  { %3690 = vmatmul.msk.f32.gmra.mxu0 %vm2007_vm3, %v6130_v48  ;;  %3701 = vmatmul.msk.f32.gmra.mxu1 %vm2007_vm3, %v6130_v48 }
 0x439   :  { %3735 = vmatmul.msk.f32.gmra.mxu2 %vm2007_vm3, %v6208_v5  ;;  %3746 = vmatmul.msk.f32.gmra.mxu3 %vm2007_vm3, %v6208_v5 }
 0x440   :  { %3691 = vmatmul.msk.f32.gmra.mxu0 %vm2007_vm3, %v6172_v43  ;;  %3702 = vmatmul.msk.f32.gmra.mxu1 %vm2007_vm3, %v6172_v43 }
 0x441   :  { %3736 = vmatmul.msk.f32.gmra.mxu2 %vm2007_vm3, %v6228_v32  ;;  %3747 = vmatmul.msk.f32.gmra.mxu3 %vm2007_vm3, %v6228_v32 }
 0x448   :  { %3692 = vmatmul.msk.f32.gmra.mxu0 %vm2007_vm3, %v6208_v5  ;;  %3703 = vmatmul.msk.f32.gmra.mxu1 %vm2007_vm3, %v6208_v5 }
 0x449   :  { %3737 = vmatmul.msk.f32.gmra.mxu2 %vm2007_vm3, %v6246_v38  ;;  %3748 = vmatmul.msk.f32.gmra.mxu3 %vm2007_vm3, %v6246_v38 }
 0x44b   :  { %v6374_v8 = vpop.f32.mrf.mxu2  ;;  %v6376_v47 = vpop.f32.mrf.mxu3 }
 0x44d   :  { %v6378_v59 = vpop.f32.mrf.mxu0  ;;  %v6380_v46 = vpop.f32.mrf.mxu1 }
 0x450   :  { %3693 = vmatmul.msk.f32.gmra.mxu0 %vm2007_vm3, %v6228_v32  ;;  %3704 = vmatmul.msk.f32.gmra.mxu1 %vm2007_vm3, %v6228_v32 }
 0x451   :  { %3738 = vmatmul.msk.f32.gmra.mxu2 %vm2007_vm3, %v6270_v29  ;;  %3749 = vmatmul.msk.f32.gmra.mxu3 %vm2007_vm3, %v6270_v29 }
 0x454   :  { %v6390_v24 = vpop.f32.mrf.mxu2  ;;  %v6392_v27 = vpop.f32.mrf.mxu3 }
 0x455   :  { %v6396_v57 = vpop.f32.mrf.mxu0  ;;  %v6398_v11 = vpop.f32.mrf.mxu1 }
 0x458   :  { %3694 = vmatmul.msk.f32.gmra.mxu0 %vm2007_vm3, %v6246_v38  ;;  %3705 = vmatmul.msk.f32.gmra.mxu1 %vm2007_vm3, %v6246_v38 }
 0x459   :  { %3739 = vmatmul.msk.f32.gmra.mxu2 %vm2007_vm3, %v6400_v62  ;;  %3750 = vmatmul.msk.f32.gmra.mxu3 %vm2007_vm3, %v6400_v62 }
 0x45c   :  { %v6410_v16 = vpop.f32.mrf.mxu2  ;;  %v6412_v61 = vpop.f32.mrf.mxu3 }
 0x45d   :  { %v6416_v23 = vpop.f32.mrf.mxu0  ;;  %v6418_v0 = vpop.f32.mrf.mxu1 }
 0x460   :  { %3695 = vmatmul.msk.f32.gmra.mxu0 %vm2007_vm3, %v6270_v29  ;;  %3706 = vmatmul.msk.f32.gmra.mxu1 %vm2007_vm3, %v6270_v29 }
 0x461   :  { %3740 = vmatmul.msk.f32.gmra.mxu2 %vm2007_vm3, %v6420_v28  ;;  %3751 = vmatmul.msk.f32.gmra.mxu3 %vm2007_vm3, %v6420_v28 }
 0x464   :  { %v6430_v53 = vpop.f32.mrf.mxu2  ;;  %v6432_v18 = vpop.f32.mrf.mxu3 }
 0x465   :  { %v6434_v2 = vpop.f32.mrf.mxu0  ;;  %v6436_v30 = vpop.f32.mrf.mxu1 }
 0x468   :  { %3696 = vmatmul.msk.f32.gmra.mxu0 %vm2007_vm3, %v6400_v62  ;;  %3707 = vmatmul.msk.f32.gmra.mxu1 %vm2007_vm3, %v6400_v62 }
 0x46c   :  { %v6442_v31 = vpop.f32.mrf.mxu2  ;;  %v6444_v1 = vpop.f32.mrf.mxu3 }
 0x46d   :  { %v6446_v12 = vpop.f32.mrf.mxu0  ;;  %v6448_v45 = vpop.f32.mrf.mxu1 }
 0x470   :  { %3775 = vmatmul.msk.f32.vlgmr.msrb.gmra.mxu0 %vm2007_vm3, %v6094_v58  ;;  %3786 = vmatmul.msk.f32.vlgmr.msrb.gmra.mxu1 %vm2007_vm3, %v6094_v58 }
 0x474   :  { %v6454_v42 = vpop.f32.mrf.mxu2  ;;  %v6456_v13 = vpop.f32.mrf.mxu3 }
 0x475   :  { %v6458_v20 = vpop.f32.mrf.mxu0  ;;  %v6460_v25 = vpop.f32.mrf.mxu1 }
 0x478   :  { %3776 = vmatmul.msk.f32.gmra.mxu0 %vm2007_vm3, %v6130_v48  ;;  %3787 = vmatmul.msk.f32.gmra.mxu1 %vm2007_vm3, %v6130_v48 }
 0x47c   :  { %v6466_v63 = vpop.f32.mrf.mxu2  ;;  %v6468_v14 = vpop.f32.mrf.mxu3 }
 0x47d   :  { %v6470_v4 = vpop.f32.mrf.mxu0  ;;  %v6472_v58 = vpop.f32.mrf.mxu1 }
 0x480   :  { %3777 = vmatmul.msk.f32.gmra.mxu0 %vm2007_vm3, %v6172_v43  ;;  %3788 = vmatmul.msk.f32.gmra.mxu1 %vm2007_vm3, %v6172_v43 }
 0x484   :  { %v6478_v22 = vpop.f32.mrf.mxu2  ;;  %v6480_v6 = vpop.f32.mrf.mxu3 }
 0x485   :  { %v6482_v19 = vpop.f32.mrf.mxu0  ;;  %v6484_v48 = vpop.f32.mrf.mxu1 }
 0x486   :  { %v2234_v15 = vadd.f32 %v6480_v6, %v6484_v48  ;;  %v2738_v6 = vld [vmem:[%s7084_s7 + $0x10] sm:$0xff]  ;;  %v2753_v48 = vld [vmem:[%s7084_s7 + $0x88] sm:$0xff] }
 0x488   :  { %3778 = vmatmul.msk.f32.gmra.mxu0 %vm2007_vm3, %v6208_v5  ;;  %3789 = vmatmul.msk.f32.gmra.mxu1 %vm2007_vm3, %v6208_v5 }
 0x48c   :  { %v2189_v34 = vpop.f32.mrf.mxu2  ;;  %v2236_v41 = vpop.f32.mrf.mxu3 }
 0x48d   :  { %v2086_v44 = vpop.f32.mrf.mxu0  ;;  %v2133_v26 = vpop.f32.mrf.mxu1 }
 0x48e   :  { %v6490_v55 = vadd.f32 %v2189_v34, %v2086_v44  ;;  %v6492_v43 = vadd.f32 %v2236_v41, %v2133_v26  ;;  %v2746_v44 = vld [vmem:[%s7084_s7 + $0x50] sm:$0xff]  ;;  %v2745_v26 = vld [vmem:[%s7084_s7 + $0x48] sm:$0xff] }
 0x48f   :  { %2777 = vmatpush.msra.mxu2 %v2746_v44  ;;  %v2737_v44 = vld [vmem:[%s7084_s7 + $0x8] sm:$0xff] }
 0x490   :  { %3779 = vmatmul.msk.f32.gmra.mxu0 %vm2007_vm3, %v6228_v32  ;;  %3790 = vmatmul.msk.f32.gmra.mxu1 %vm2007_vm3, %v6228_v32 }
 0x491   :  { %2778 = vmatpush.msra.mxu2 %v2745_v26 }
 0x494   :  { %v2192_v39 = vpop.f32.mrf.mxu2  ;;  %v2239_v9 = vpop.f32.mrf.mxu3 }
 0x495   :  { %v2089_v51 = vpop.f32.mrf.mxu0  ;;  %v2136_v60 = vpop.f32.mrf.mxu1 }
 0x496   :  { %v6498_v3 = vadd.f32 %v2192_v39, %v2089_v51  ;;  %v6500_v5 = vadd.f32 %v2239_v9, %v2136_v60  ;;  %v2744_v51 = vld [vmem:[%s7084_s7 + $0x40] sm:$0xff]  ;;  %v2743_v60 = vld [vmem:[%s7084_s7 + $0x38] sm:$0xff] }
 0x497   :  { %2779 = vmatpush.msra.mxu2 %v2744_v51 }
 0x498   :  { %3780 = vmatmul.msk.f32.gmra.mxu0 %vm2007_vm3, %v6246_v38  ;;  %3791 = vmatmul.msk.f32.gmra.mxu1 %vm2007_vm3, %v6246_v38 }
 0x499   :  { %2780 = vmatpush.msra.mxu2 %v2743_v60  ;;  %v2736_v60 = vld [vmem:[%s7084_s7] sm:$0xff] }
 0x49b   :  { %2781 = vmatpush.msra.mxu2 %v2742_v33  ;;  %v2752_v33 = vld [vmem:[%s7084_s7 + $0x80] sm:$0xff] }
 0x49c   :  { %v2437_v35 = vpop.f32.mrf.mxu2 }
 0x49d   :  { %v6506_v17 = vpop.f32.mrf.mxu0  ;;  %v6508_v10 = vpop.f32.mrf.mxu1 }
 0x4a0   :  { %3781 = vmatmul.msk.f32.gmra.mxu0 %vm2007_vm3, %v6270_v29  ;;  %3792 = vmatmul.msk.f32.gmra.mxu1 %vm2007_vm3, %v6270_v29  ;;  %v2755_v29 = vld [vmem:[%s7084_s7 + $0x98] sm:$0xff] }
 0x4a1   :  { %2816 = vmatpush.msra.mxu3 %v2755_v29  ;;  %v2741_v29 = vld [vmem:[%s7084_s7 + $0x28] sm:$0xff] }
 0x4a2   :  { %2782 = vmatpush.msra.mxu2 %v2741_v29 }
 0x4a5   :  { %v6514_v32 = vpop.f32.mrf.mxu0  ;;  %v6516_v50 = vpop.f32.mrf.mxu1 }
 0x4a8   :  { %3782 = vmatmul.msk.f32.gmra.mxu0 %vm2007_vm3, %v6400_v62  ;;  %3793 = vmatmul.msk.f32.gmra.mxu1 %vm2007_vm3, %v6400_v62 }
 0x4ad   :  { %v6522_v38 = vpop.f32.mrf.mxu0  ;;  %v6524_v56 = vpop.f32.mrf.mxu1 }
 0x4b0   :  { %3783 = vmatmul.msk.f32.gmra.mxu0 %vm2007_vm3, %v6420_v28  ;;  %3794 = vmatmul.msk.f32.gmra.mxu1 %vm2007_vm3, %v6420_v28  ;;  %v2754_v28 = vld [vmem:[%s7084_s7 + $0x90] sm:$0xff] }
 0x4b1   :  { %2817 = vmatpush.msra.mxu3 %v2754_v28  ;;  %v2484_v28 = vpop.f32.mrf.mxu3 }
 0x4b3   :  { %2818 = vmatpush.msra.mxu3 %v2753_v48 }
 0x4b5   :  { %v6543_v37 = vpop.f32.mrf.mxu0  ;;  %v6545_v62 = vpop.f32.mrf.mxu1  ;;  %2819 = vmatpush.msra.mxu3 %v2752_v33 }
 0x4b8   :  { %3784 = vmatmul.msk.f32.gmra.mxu0 %vm2007_vm3, %v1961_v52  ;;  %3795 = vmatmul.msk.f32.gmra.mxu1 %vm2007_vm3, %v1961_v52  ;;  %v2740_v52 = vld [vmem:[%s7084_s7 + $0x20] sm:$0xff] }
 0x4b9   :  { %2783 = vmatpush.msra.mxu2 %v2740_v52  ;;  %v2487_v52 = vpop.f32.mrf.mxu3 }
 0x4bb   :  { %2784 = vmatpush.msra.mxu2 %v2739_v54 }
 0x4bd   :  { %v6552_v49 = vpop.f32.mrf.mxu0  ;;  %v6554_v7 = vpop.f32.mrf.mxu1  ;;  %2785 = vmatpush.msra.mxu2 %v2738_v6 }
 0x4bf   :  { %2786 = vmatpush.msra.mxu2 %v2737_v44 }
 0x4c1   :  { %2787 = vmatpush.msra.mxu2 %v2736_v60  ;;  %v2490_v60 = vpop.f32.mrf.mxu3 }
 0x4c5   :  { %v6565_v34 = vpop.f32.mrf.mxu0  ;;  %v6567_v41 = vpop.f32.mrf.mxu1 }
 0x4cd   :  { %v6575_v39 = vpop.f32.mrf.mxu0  ;;  %v6577_v9 = vpop.f32.mrf.mxu1 }
 0x4d5   :  { %v6593_v36 = vpop.f32.mrf.mxu0  ;;  %v2359_v21 = vpop.f32.mrf.mxu1 }
 0x4d6   :  { %v6598_v40 = vadd.f32 %v2359_v21, %v2234_v15  ;;  %v2440_v21 = vpop.f32.mrf.mxu2 }
 0x4d8   :  { %7223 = vst [vmem:[#allocation33_spill] sm:$0xff] %v6598_v40  ;;  %v2166_v40 = vadd.f32 %v6374_v8, %v6378_v59  ;;  %v2680_v8 = vld [vmem:[%s7085_s6] sm:$0x3] }
 0x4dd   :  { %v2315_v26 = vpop.f32.mrf.mxu0  ;;  %v2362_v51 = vpop.f32.mrf.mxu1 }
 0x4de   :  { %v6619_v29 = vadd.f32 %v2315_v26, %v6490_v55  ;;  %v6622_v15 = vadd.f32 %v2362_v51, %v6492_v43  ;;  %v2213_v55 = vadd.f32 %v6376_v47, %v6380_v46  ;;  %v2368_v43 = vadd.f32 %v6506_v17, %v2166_v40  ;;  %v2443_v51 = vpop.f32.mrf.mxu2 }
 0x4df   :  { %v6645_v40 = vperm.slane %v2680_v8, 0 }
 0x4e0   :  { %7224 = vst [vmem:[#allocation2_spill] sm:$0xff] %v6622_v15  ;;  %v2369_v26 = vadd.f32 %v6508_v10, %v2213_v55  ;;  %v2514_v46 = vadd.f32 %v2437_v35, %v2368_v43 }
 0x4e2   :  { %v2515_v17 = vadd.f32 %v2484_v28, %v2369_v26 }
 0x4e5   :  { %v2318_v54 = vpop.f32.mrf.mxu0  ;;  %v2365_v6 = vpop.f32.mrf.mxu1 }
 0x4e6   :  { %v6625_v48 = vadd.f32 %v2318_v54, %v6498_v3  ;;  %v6628_v44 = vadd.f32 %v2365_v6, %v6500_v5  ;;  %v2169_v3 = vadd.f32 %v6390_v24, %v6396_v57  ;;  %v2216_v5 = vadd.f32 %v6392_v27, %v6398_v11  ;;  %v2446_v11 = vpop.f32.mrf.mxu2 }
 0x4e7   :  { %v6647_v6 = vperm.slane %v2680_v8, 1 }
 0x4e8   :  { %7225 = vst [vmem:[#allocation34_spill] sm:$0xff] %v6625_v48  ;;  %v2370_v47 = vadd.f32 %v6514_v32, %v2169_v3  ;;  %v2371_v59 = vadd.f32 %v6516_v50, %v2216_v5 }
 0x4e9   :  { %7226 = vst [vmem:[#allocation3_spill] sm:$0xff] %v6628_v44  ;;  %v2493_v44 = vpop.f32.mrf.mxu3 }
 0x4ea   :  { %v2516_v24 = vadd.f32 %v2440_v21, %v2370_v47  ;;  %v2517_v57 = vadd.f32 %v2487_v52, %v2371_v59  ;;  %v2219_v21 = vadd.f32 %v6412_v61, %v6418_v0  ;;  %v2222_v61 = vadd.f32 %v6432_v18, %v6436_v30  ;;  %v2855_v18 = vld [vmem:[%s7086_s8 + $0x98] sm:$0xff] }
 0x4eb   :  { %2900 = vmatpush.msrb.mxu3 %v2855_v18 }
 0x4ec   :  { %v2373_v8 = vadd.f32 %v6524_v56, %v2219_v21  ;;  %v2375_v0 = vadd.f32 %v6545_v62, %v2222_v61  ;;  %v2849_v62 = vld [vmem:[%s7086_s8 + $0x68] sm:$0xff] }
 0x4ed   :  { %v2583_v33 = vpop.f32.mrf.mxu0  ;;  %v2630_v15 = vpop.f32.mrf.mxu1 }
 0x4ee   :  { %v2660_v10 = vadd.f32 %v2583_v33, %v2514_v46  ;;  %v2661_v54 = vadd.f32 %v2630_v15, %v2515_v17  ;;  %v2172_v15 = vadd.f32 %v6410_v16, %v6416_v23  ;;  %v2175_v16 = vadd.f32 %v6430_v53, %v6434_v2  ;;  %v2851_v53 = vld [vmem:[%s7086_s8 + $0x78] sm:$0xff]  ;;  %v2850_v2 = vld [vmem:[%s7086_s8 + $0x70] sm:$0xff] }
 0x4ef   :  { %2856 = vmatpush.msrb.mxu2 %v2851_v53 }
 0x4f0   :  { %v2686_v48 = vadd.f32 %v6645_v40, %v2660_v10  ;;  %v2687_v32 = vadd.f32 %v6647_v6, %v2661_v54  ;;  %v2372_v5 = vadd.f32 %v6522_v38, %v2172_v15  ;;  %v2374_v23 = vadd.f32 %v6543_v37, %v2175_v16  ;;  %v2449_v38 = vpop.f32.mrf.mxu2 }
 0x4f1   :  { %v2496_v56 = vpop.f32.mrf.mxu3  ;;  %v2519_v10 = vadd.f32 %v2490_v60, %v2373_v8  ;;  %v2521_v37 = vadd.f32 %v2493_v44, %v2375_v0  ;;  %2857 = vmatpush.msrb.mxu2 %v2850_v2  ;;  %v2178_v44 = vadd.f32 %v6442_v31, %v6446_v12  ;;  %v2848_v31 = vld [vmem:[%s7086_s8 + $0x60] sm:$0xff]  ;;  %v2854_v12 = vld [vmem:[%s7086_s8 + $0x90] sm:$0xff] }
 0x4f2   :  { %v2706_v52 = vmax.f32 %v2686_v48, 0.0  ;;  %v2707_v43 = vmax.f32 %v2687_v32, 0.0  ;;  %v2518_v48 = vadd.f32 %v2443_v51, %v2372_v5  ;;  %v2520_v30 = vadd.f32 %v2446_v11, %v2374_v23  ;;  %2901 = vmatpush.msrb.mxu3 %v2854_v12  ;;  %v7227_v12 = vld [vmem:[#allocation33_spill] sm:$0xff] }
 0x4f3   :  { %2858 = vmatpush.msrb.mxu2 %v2849_v62  ;;  %v2225_v11 = vadd.f32 %v6444_v1, %v6448_v45  ;;  %v2847_v1 = vld [vmem:[%s7086_s8 + $0x58] sm:$0xff] }
 0x4f5   :  { %v2586_v55 = vpop.f32.mrf.mxu0  ;;  %v2633_v27 = vpop.f32.mrf.mxu1  ;;  %2859 = vmatpush.msrb.mxu2 %v2848_v31  ;;  %v2837_v31 = vld [vmem:[%s7086_s8 + $0x8] sm:$0xff] }
 0x4f6   :  { %v2662_v3 = vadd.f32 %v2586_v55, %v2516_v24  ;;  %v2663_v50 = vadd.f32 %v2633_v27, %v2517_v57 }
 0x4f7   :  { %2860 = vmatpush.msrb.mxu2 %v2847_v1 }
 0x4f8   :  { %v2688_v35 = vadd.f32 %v6645_v40, %v2662_v3  ;;  %v2689_v28 = vadd.f32 %v6647_v6, %v2663_v50 }
 0x4fa   :  { %v2708_v26 = vmax.f32 %v2688_v35, 0.0  ;;  %v2709_v33 = vmax.f32 %v2689_v28, 0.0  ;;  %v2452_v35 = vpop.f32.mrf.mxu2  ;;  %v2499_v28 = vpop.f32.mrf.mxu3 }
 0x4fc   :  { %v6659_v47 = vmax.f32 %v2706_v52, %v2708_v26  ;;  %v6661_v59 = vmax.f32 %v2707_v43, %v2709_v33  ;;  %v2376_v26 = vadd.f32 %v6552_v49, %v2178_v44  ;;  %v2377_v33 = vadd.f32 %v6554_v7, %v2225_v11  ;;  %v2852_v11 = vld [vmem:[%s7086_s8 + $0x80] sm:$0xff] }
 0x4fd   :  { %v2589_v46 = vpop.f32.mrf.mxu0  ;;  %v2636_v17 = vpop.f32.mrf.mxu1  ;;  %v2181_v7 = vadd.f32 %v6454_v42, %v6458_v20 }
 0x4fe   :  { %2788 = vmatmul.f32.vlgmr.msra.gmra.mxu2 %v6659_v47  ;;  %3796 = vmatmul.msk.f32.vlgmr.msra.gmra.mxu3 %vm2756_vm4, %v6661_v59  ;;  %v2664_v54 = vadd.f32 %v2589_v46, %v2518_v48  ;;  %v2665_v24 = vadd.f32 %v2636_v17, %v2519_v10  ;;  %v2228_v46 = vadd.f32 %v6456_v13, %v6460_v25  ;;  %v2846_v17 = vld [vmem:[%s7086_s8 + $0x50] sm:$0xff]  ;;  %v2845_v13 = vld [vmem:[%s7086_s8 + $0x48] sm:$0xff]  ;;  %v2844_v25 = vld [vmem:[%s7086_s8 + $0x40] sm:$0xff] }
 0x4ff   :  { %v2378_v16 = vadd.f32 %v6565_v34, %v2181_v7  ;;  %v2522_v23 = vadd.f32 %v2449_v38, %v2376_v26  ;;  %v2523_v0 = vadd.f32 %v2496_v56, %v2377_v33  ;;  %2861 = vmatpush.msrb.mxu2 %v2846_v17  ;;  %v2853_v34 = vld [vmem:[%s7086_s8 + $0x88] sm:$0xff]  ;;  %v2843_v10 = vld [vmem:[%s7086_s8 + $0x38] sm:$0xff] }
 0x500   :  { %v2690_v57 = vadd.f32 %v6645_v40, %v2664_v54  ;;  %v2691_v55 = vadd.f32 %v6647_v6, %v2665_v24  ;;  %v2379_v61 = vadd.f32 %v6567_v41, %v2228_v46  ;;  %2902 = vmatpush.msrb.mxu3 %v2853_v34 }
 0x501   :  { %2862 = vmatpush.msrb.mxu2 %v2845_v13  ;;  %v2524_v38 = vadd.f32 %v2452_v35, %v2378_v16 }
 0x502   :  { %v2710_v15 = vmax.f32 %v2690_v57, 0.0  ;;  %v2711_v21 = vmax.f32 %v2691_v55, 0.0  ;;  %v2455_v48 = vpop.f32.mrf.mxu2  ;;  %v2502_v41 = vpop.f32.mrf.mxu3  ;;  %v2525_v56 = vadd.f32 %v2499_v28, %v2379_v61  ;;  %v2842_v57 = vld [vmem:[%s7086_s8 + $0x30] sm:$0xff]  ;;  %2903 = vmatpush.msrb.mxu3 %v2852_v11 }
 0x503   :  { %2863 = vmatpush.msrb.mxu2 %v2844_v25 }
 0x505   :  { %v2592_v51 = vpop.f32.mrf.mxu0  ;;  %v2639_v60 = vpop.f32.mrf.mxu1  ;;  %2864 = vmatpush.msrb.mxu2 %v2843_v10 }
 0x506   :  { %v2666_v27 = vadd.f32 %v2592_v51, %v2520_v30  ;;  %v2667_v32 = vadd.f32 %v2639_v60, %v2521_v37  ;;  %v2184_v51 = vadd.f32 %v6466_v63, %v6470_v4  ;;  %v2231_v60 = vadd.f32 %v6468_v14, %v6472_v58  ;;  %v2840_v58 = vld [vmem:[%s7086_s8 + $0x20] sm:$0xff] }
 0x507   :  { %2865 = vmatpush.msrb.mxu2 %v2842_v57 }
 0x508   :  { %v2692_v3 = vadd.f32 %v6645_v40, %v2666_v27  ;;  %v2693_v50 = vadd.f32 %v6647_v6, %v2667_v32  ;;  %v2380_v44 = vadd.f32 %v6575_v39, %v2184_v51  ;;  %v2381_v63 = vadd.f32 %v6577_v9, %v2231_v60  ;;  %v2839_v9 = vld [vmem:[%s7086_s8 + $0x18] sm:$0xff]  ;;  %v7229_v60 = vld [vmem:[#allocation34_spill] sm:$0xff] }
 0x509   :  { %v2187_v39 = vadd.f32 %v6478_v22, %v6482_v19  ;;  %v2838_v22 = vld [vmem:[%s7086_s8 + $0x10] sm:$0xff] }
 0x50a   :  { %v2712_v52 = vmax.f32 %v2692_v3, 0.0  ;;  %v2713_v43 = vmax.f32 %v2693_v50, 0.0  ;;  %v2841_v50 = vld [vmem:[%s7086_s8 + $0x28] sm:$0xff]  ;;  %v2527_v26 = vadd.f32 %v2502_v41, %v2381_v63 }
 0x50b   :  { %2866 = vmatpush.msrb.mxu2 %v2841_v50 }
 0x50c   :  { %v6694_v5 = vmax.f32 %v2711_v21, %v2713_v43  ;;  %v6696_v8 = vmax.f32 %v2710_v15, %v2712_v52  ;;  %v2458_v15 = vpop.f32.mrf.mxu2  ;;  %v2505_v21 = vpop.f32.mrf.mxu3  ;;  %v2382_v52 = vadd.f32 %v6593_v36, %v2187_v39  ;;  %v2526_v43 = vadd.f32 %v2455_v48, %v2380_v44  ;;  %v2836_v36 = vld [vmem:[%s7086_s8] sm:$0xff] }
 0x50d   :  { %v2595_v45 = vpop.f32.mrf.mxu0  ;;  %v2642_v49 = vpop.f32.mrf.mxu1  ;;  %2867 = vmatpush.msrb.mxu2 %v2840_v58 }
 0x50e   :  { %2791 = vmatmul.f32.gmra.mxu2 %v6696_v8  ;;  %3797 = vmatmul.msk.f32.gmra.mxu3 %vm2756_vm4, %v6694_v5  ;;  %v2668_v42 = vadd.f32 %v2595_v45, %v2522_v23  ;;  %v2669_v20 = vadd.f32 %v2642_v49, %v2523_v0  ;;  %v2528_v1 = vadd.f32 %v2458_v15, %v2382_v52  ;;  %v3810_v15 = vld [vmem:[%s7087_s9 + $0x70] sm:$0xff]  ;;  %v3826_v52 = vld [vmem:[%s7087_s9 + $0xe0] sm:$0xff] }
 0x50f   :  { %2868 = vmatpush.msrb.mxu2 %v2839_v9  ;;  %v2529_v45 = vadd.f32 %v2505_v21, %v7227_v12  ;;  %v2932_v21 = vld [vmem:[%s7087_s9 + $0x38] sm:$0xff]  ;;  %v3824_v12 = vld [vmem:[%s7087_s9 + $0xd0] sm:$0xff] }
 0x510   :  { %v2694_v53 = vadd.f32 %v6645_v40, %v2668_v42  ;;  %v2695_v18 = vadd.f32 %v6647_v6, %v2669_v20 }
 0x511   :  { %2869 = vmatpush.msrb.mxu2 %v2838_v22  ;;  %v2931_v22 = vld [vmem:[%s7087_s9 + $0x30] sm:$0xff] }
 0x512   :  { %v2714_v55 = vmax.f32 %v2694_v53, 0.0  ;;  %v2715_v27 = vmax.f32 %v2695_v18, 0.0 }
 0x513   :  { %2870 = vmatpush.msrb.mxu2 %v2837_v31  ;;  %v2929_v31 = vld [vmem:[%s7087_s9 + $0x20] sm:$0xff] }
 0x514   :  { %v2461_v42 = vpop.f32.mrf.mxu2  ;;  %v2508_v20 = vpop.f32.mrf.mxu3 }
 0x515   :  { %v2598_v54 = vpop.f32.mrf.mxu0  ;;  %v2645_v24 = vpop.f32.mrf.mxu1  ;;  %2871 = vmatpush.msrb.mxu2 %v2836_v36 }
 0x516   :  { %v2670_v2 = vadd.f32 %v2598_v54, %v2524_v38  ;;  %v2671_v30 = vadd.f32 %v2645_v24, %v2525_v56  ;;  %v2530_v38 = vadd.f32 %v2461_v42, %v6619_v29  ;;  %v7228_v56 = vld [vmem:[#allocation2_spill] sm:$0xff] }
 0x517   :  { %v2531_v10 = vadd.f32 %v2508_v20, %v7228_v56  ;;  %v3807_v20 = vld [vmem:[%s7087_s9 + $0x58] sm:$0xff] }
 0x518   :  { %v2696_v37 = vadd.f32 %v6645_v40, %v2670_v2  ;;  %v2697_v62 = vadd.f32 %v6647_v6, %v2671_v30 }
 0x51a   :  { %v2716_v32 = vmax.f32 %v2696_v37, 0.0  ;;  %v2717_v3 = vmax.f32 %v2697_v62, 0.0 }
 0x51c   :  { %v6747_v4 = vmax.f32 %v2715_v27, %v2717_v3  ;;  %v6749_v14 = vmax.f32 %v2714_v55, %v2716_v32  ;;  %v2464_v62 = vpop.f32.mrf.mxu2  ;;  %v2511_v51 = vpop.f32.mrf.mxu3  ;;  %v7230_v55 = vld [vmem:[#allocation3_spill] sm:$0xff] }
 0x51d   :  { %v2601_v35 = vpop.f32.mrf.mxu0  ;;  %v2648_v28 = vpop.f32.mrf.mxu1  ;;  %v2532_v57 = vadd.f32 %v2464_v62, %v7229_v60  ;;  %v2533_v29 = vadd.f32 %v2511_v51, %v7230_v55  ;;  %v3832_v62 = vld [vmem:[%s7087_s9 + $0x108] sm:$0xff]  ;;  %v3847_v51 = vld [vmem:[%s7087_s9 + $0x178] sm:$0xff]  ;;  %v3831_v55 = vld [vmem:[%s7087_s9 + $0x100] sm:$0xff] }
 0x51e   :  { %2794 = vmatmul.f32.gmra.mxu2 %v6749_v14  ;;  %3798 = vmatmul.msk.f32.gmra.mxu3 %vm2756_vm4, %v6747_v4  ;;  %v2672_v19 = vadd.f32 %v2601_v35, %v2526_v43  ;;  %v2673_v33 = vadd.f32 %v2648_v28, %v2527_v26 }
 0x520   :  { %v2698_v46 = vadd.f32 %v6645_v40, %v2672_v19  ;;  %v2699_v17 = vadd.f32 %v6647_v6, %v2673_v33  ;;  %v2930_v19 = vld [vmem:[%s7087_s9 + $0x28] sm:$0xff]  ;;  %v3825_v33 = vld [vmem:[%s7087_s9 + $0xd8] sm:$0xff] }
 0x522   :  { %v2718_v13 = vmax.f32 %v2698_v46, 0.0  ;;  %v2719_v25 = vmax.f32 %v2699_v17, 0.0  ;;  %v2926_v46 = vld [vmem:[%s7087_s9 + $0x8] sm:$0xff] }
 0x523   :  { %v3823_v17 = vld [vmem:[%s7087_s9 + $0xc8] sm:$0xff] }
 0x525   :  { %v2604_v49 = vpop.f32.mrf.mxu0  ;;  %v2651_v7 = vpop.f32.mrf.mxu1 }
 0x526   :  { %v2674_v16 = vadd.f32 %v2604_v49, %v2528_v1  ;;  %v2675_v61 = vadd.f32 %v2651_v7, %v2529_v45  ;;  %v3809_v1 = vld [vmem:[%s7087_s9 + $0x68] sm:$0xff]  ;;  %v2928_v45 = vld [vmem:[%s7087_s9 + $0x18] sm:$0xff]  ;;  %v2927_v7 = vld [vmem:[%s7087_s9 + $0x10] sm:$0xff] }
 0x528   :  { %v2700_v23 = vadd.f32 %v6645_v40, %v2674_v16  ;;  %v2701_v0 = vadd.f32 %v6647_v6, %v2675_v61  ;;  %v2925_v16 = vld [vmem:[%s7087_s9] sm:$0xff] }
 0x529   :  { %v3808_v61 = vld [vmem:[%s7087_s9 + $0x60] sm:$0xff] }
 0x52a   :  { %v2720_v34 = vmax.f32 %v2700_v23, 0.0  ;;  %v2721_v48 = vmax.f32 %v2701_v0, 0.0  ;;  %v3822_v23 = vld [vmem:[%s7087_s9 + $0xc0] sm:$0xff] }
 0x52c   :  { %v2733_v41 = vmax.f32 %v2719_v25, %v2721_v48  ;;  %v2732_v54 = vmax.f32 %v2718_v13, %v2720_v34  ;;  %v3838_v13 = vld [vmem:[%s7087_s9 + $0x138] sm:$0xff]  ;;  %v3806_v34 = vld [vmem:[%s7087_s9 + $0x50] sm:$0xff] }
 0x52d   :  { %v2607_v24 = vpop.f32.mrf.mxu0  ;;  %v2654_v53 = vpop.f32.mrf.mxu1  ;;  %v3821_v25 = vld [vmem:[%s7087_s9 + $0xb8] sm:$0xff]  ;;  %v3837_v48 = vld [vmem:[%s7087_s9 + $0x130] sm:$0xff] }
 0x52e   :  { %v2676_v18 = vadd.f32 %v2607_v24, %v2530_v38  ;;  %v2677_v2 = vadd.f32 %v2654_v53, %v2531_v10  ;;  %2797 = vmatmul.f32.gmra.mxu2 %v2732_v54  ;;  %3799 = vmatmul.msk.f32.gmra.mxu3 %vm2756_vm4, %v2733_v41  ;;  %v3820_v38 = vld [vmem:[%s7087_s9 + $0xb0] sm:$0xff]  ;;  %v3819_v24 = vld [vmem:[%s7087_s9 + $0xa8] sm:$0xff]  ;;  %v3834_v53 = vld [vmem:[%s7087_s9 + $0x118] sm:$0xff] }
 0x530   :  { %v2702_v30 = vadd.f32 %v6645_v40, %v2676_v18  ;;  %v2703_v37 = vadd.f32 %v6647_v6, %v2677_v2  ;;  %v3849_v18 = vld [vmem:[%s7087_s9 + $0x188] sm:$0xff]  ;;  %v3818_v2 = vld [vmem:[%s7087_s9 + $0xa0] sm:$0xff] }
 0x532   :  { %v2722_v58 = vmax.f32 %v2702_v30, 0.0  ;;  %v2723_v11 = vmax.f32 %v2703_v37, 0.0  ;;  %v3833_v30 = vld [vmem:[%s7087_s9 + $0x110] sm:$0xff]  ;;  %v3848_v37 = vld [vmem:[%s7087_s9 + $0x180] sm:$0xff] }
 0x535   :  { %v2610_v27 = vpop.f32.mrf.mxu0  ;;  %v2657_v32 = vpop.f32.mrf.mxu1 }
 0x536   :  { %v2678_v3 = vadd.f32 %v2610_v27, %v2532_v57  ;;  %v2679_v50 = vadd.f32 %v2657_v32, %v2533_v29  ;;  %v3846_v29 = vld [vmem:[%s7087_s9 + $0x170] sm:$0xff]  ;;  %v3830_v27 = vld [vmem:[%s7087_s9 + $0xf8] sm:$0xff]  ;;  %v3845_v32 = vld [vmem:[%s7087_s9 + $0x168] sm:$0xff] }
 0x538   :  { %v2704_v44 = vadd.f32 %v6645_v40, %v2678_v3  ;;  %v2705_v63 = vadd.f32 %v6647_v6, %v2679_v50  ;;  %v3815_v40 = vld [vmem:[%s7087_s9 + $0x98] sm:$0xff]  ;;  %v3814_v6 = vld [vmem:[%s7087_s9 + $0x90] sm:$0xff]  ;;  %v3844_v50 = vld [vmem:[%s7087_s9 + $0x160] sm:$0xff] }
 0x539   :  { %2956 = vmatpush.msra.mxu0 %v3815_v40  ;;  %v3829_v3 = vld [vmem:[%s7087_s9 + $0xf0] sm:$0xff]  ;;  %v3840_v40 = vld [vmem:[%s7087_s9 + $0x140] sm:$0xff] }
 0x53a   :  { %v2724_v35 = vmax.f32 %v2704_v44, 0.0  ;;  %v2725_v28 = vmax.f32 %v2705_v63, 0.0  ;;  %v3843_v44 = vld [vmem:[%s7087_s9 + $0x158] sm:$0xff] }
 0x53b   :  { %2957 = vmatpush.msra.mxu0 %v3814_v6  ;;  %v3118_v6 = vld [vmem:[%s7088_s11 + $0x70] sm:$0xff] }
 0x53c   :  { %v2735_v39 = vmax.f32 %v2723_v11, %v2725_v28  ;;  %v2734_v9 = vmax.f32 %v2722_v58, %v2724_v35  ;;  %v3842_v11 = vld [vmem:[%s7087_s9 + $0x150] sm:$0xff]  ;;  %3128 = vmatpush.msra.mxu1 %v3118_v6 }
 0x53e   :  { %2800 = vmatmul.f32.gmra.mxu2 %v2734_v9  ;;  %3800 = vmatmul.msk.f32.gmra.mxu3 %vm2756_vm4, %v2735_v39 }
 0x546   :  { %2872 = vmatmul.f32.vlgmr.msrb.gmra.mxu2 %v6659_v47  ;;  %3801 = vmatmul.msk.f32.vlgmr.msrb.gmra.mxu3 %vm2756_vm4, %v6661_v59  ;;  %v3813_v47 = vld [vmem:[%s7087_s9 + $0x88] sm:$0xff]  ;;  %v3812_v59 = vld [vmem:[%s7087_s9 + $0x80] sm:$0xff] }
 0x547   :  { %2958 = vmatpush.msra.mxu0 %v3813_v47  ;;  %v3117_v47 = vld [vmem:[%s7088_s11 + $0x68] sm:$0xff] }
 0x548   :  { %3129 = vmatpush.msra.mxu1 %v3117_v47 }
 0x549   :  { %2959 = vmatpush.msra.mxu0 %v3812_v59  ;;  %v3116_v59 = vld [vmem:[%s7088_s11 + $0x60] sm:$0xff] }
 0x54a   :  { %3130 = vmatpush.msra.mxu1 %v3116_v59 }
 0x54e   :  { %2875 = vmatmul.f32.gmra.mxu2 %v6696_v8  ;;  %3802 = vmatmul.msk.f32.gmra.mxu3 %vm2756_vm4, %v6694_v5  ;;  %v3811_v5 = vld [vmem:[%s7087_s9 + $0x78] sm:$0xff]  ;;  %v2934_v8 = vld [vmem:[%s7087_s9 + $0x48] sm:$0xff] }
 0x54f   :  { %2960 = vmatpush.msra.mxu0 %v3811_v5  ;;  %2979 = vmatpush.msra.mxu3 %v2934_v8 }
 0x551   :  { %2961 = vmatpush.msra.mxu0 %v3810_v15  ;;  %v3115_v15 = vld [vmem:[%s7088_s11 + $0x58] sm:$0xff] }
 0x552   :  { %3131 = vmatpush.msra.mxu1 %v3115_v15 }
 0x553   :  { %2962 = vmatpush.msra.mxu0 %v3809_v1  ;;  %v3111_v1 = vld [vmem:[%s7088_s11 + $0x38] sm:$0xff] }
 0x555   :  { %2963 = vmatpush.msra.mxu0 %v3808_v61 }
 0x556   :  { %2878 = vmatmul.f32.gmra.mxu2 %v6749_v14  ;;  %3803 = vmatmul.msk.f32.gmra.mxu3 %vm2756_vm4, %v6747_v4  ;;  %v2933_v4 = vld [vmem:[%s7087_s9 + $0x40] sm:$0xff]  ;;  %v3827_v14 = vld [vmem:[%s7087_s9 + $0xe8] sm:$0xff] }
 0x557   :  { %3013 = vmatpush.msra.mxu2 %v3827_v14  ;;  %2980 = vmatpush.msra.mxu3 %v2933_v4 }
 0x558   :  { %2964 = vmatpush.msra.mxu0 %v3807_v20  ;;  %v3109_v20 = vld [vmem:[%s7088_s11 + $0x28] sm:$0xff] }
 0x559   :  { %3014 = vmatpush.msra.mxu2 %v3826_v52  ;;  %2981 = vmatpush.msra.mxu3 %v2932_v21  ;;  %v3114_v52 = vld [vmem:[%s7088_s11 + $0x50] sm:$0xff] }
 0x55a   :  { %2965 = vmatpush.msra.mxu0 %v3806_v34  ;;  %3132 = vmatpush.msra.mxu1 %v3114_v52  ;;  %v3106_v34 = vld [vmem:[%s7088_s11 + $0x10] sm:$0xff] }
 0x55b   :  { %2982 = vmatpush.msra.mxu3 %v2931_v22  ;;  %3015 = vmatpush.msra.mxu2 %v3825_v33 }
 0x55c   :  { %3083 = vmatpush.msrb.mxu0 %v3849_v18  ;;  %v3152_v18 = vld [vmem:[%s7091_s13 + $0x20] sm:$0xff] }
 0x55d   :  { %2983 = vmatpush.msra.mxu3 %v2930_v19  ;;  %3016 = vmatpush.msra.mxu2 %v3824_v12 }
 0x55e   :  { %2881 = vmatmul.f32.gmra.mxu2 %v2732_v54  ;;  %3804 = vmatmul.msk.f32.gmra.mxu3 %vm2756_vm4, %v2733_v41  ;;  %v3836_v41 = vld [vmem:[%s7087_s9 + $0x128] sm:$0xff]  ;;  %v3835_v54 = vld [vmem:[%s7087_s9 + $0x120] sm:$0xff] }
 0x55f   :  { %2984 = vmatpush.msra.mxu3 %v2929_v31  ;;  %3017 = vmatpush.msra.mxu2 %v3823_v17 }
 0x560   :  { %3084 = vmatpush.msrb.mxu0 %v3848_v37 }
 0x561   :  { %2985 = vmatpush.msra.mxu3 %v2928_v45  ;;  %3018 = vmatpush.msra.mxu2 %v3822_v23  ;;  %v3110_v45 = vld [vmem:[%s7088_s11 + $0x30] sm:$0xff] }
 0x562   :  { %3085 = vmatpush.msrb.mxu0 %v3847_v51 }
 0x563   :  { %2986 = vmatpush.msra.mxu3 %v2927_v7  ;;  %3019 = vmatpush.msra.mxu2 %v3821_v25  ;;  %v3107_v25 = vld [vmem:[%s7088_s11 + $0x18] sm:$0xff] }
 0x564   :  { %3086 = vmatpush.msrb.mxu0 %v3846_v29  ;;  %v3854_v29 = vld [vmem:[%s7089_s10] ss:$0 sm:$0xff] }
 0x565   :  { %2987 = vmatpush.msra.mxu3 %v2926_v46  ;;  %3020 = vmatpush.msra.mxu2 %v3820_v38  ;;  %v3158_v38 = vld [vmem:[%s7091_s13 + $0x50] sm:$0xf] }
 0x566   :  { %2884 = vmatmul.f32.gmra.mxu2 %v2734_v9  ;;  %3805 = vmatmul.msk.f32.gmra.mxu3 %vm2756_vm4, %v2735_v39  ;;  %v3841_v39 = vld [vmem:[%s7087_s9 + $0x148] sm:$0xff] }
 0x567   :  { %2988 = vmatpush.msra.mxu3 %v2925_v16  ;;  %3021 = vmatpush.msra.mxu2 %v3819_v24  ;;  %v3154_v24 = vld [vmem:[%s7091_s13 + $0x30] sm:$0xff] }
 0x568   :  { %3087 = vmatpush.msrb.mxu0 %v3845_v32 }
 0x569   :  { %3048 = vmatpush.msrb.mxu3 %v3838_v13  ;;  %3022 = vmatpush.msra.mxu2 %v3818_v2  ;;  %v3108_v13 = vld [vmem:[%s7088_s11 + $0x20] sm:$0xff]  ;;  %v3151_v2 = vld [vmem:[%s7091_s13 + $0x18] sm:$0xff] }
 0x56a   :  { %3088 = vmatpush.msrb.mxu0 %v3844_v50 }
 0x56b   :  { %3049 = vmatpush.msrb.mxu3 %v3837_v48  ;;  %v3105_v48 = vld [vmem:[%s7088_s11 + $0x8] sm:$0xff]  ;;  %3852 = vmatpush.msk.msrb.mxu2 %vm2038_vm2, %v3158_v38 }
 0x56c   :  { %3089 = vmatpush.msrb.mxu0 %v3843_v44  ;;  %v3150_v44 = vld [vmem:[%s7091_s13 + $0x10] sm:$0xff] }
 0x56d   :  { %3050 = vmatpush.msrb.mxu3 %v3836_v41  ;;  %v3104_v41 = vld [vmem:[%s7088_s11] sm:$0xff] }
 0x56e   :  { %3090 = vmatpush.msrb.mxu0 %v3842_v11  ;;  %v3855_v11 = vld [vmem:[%s7090_s12] ss:$0 sm:$0xff] }
 0x56f   :  { %3051 = vmatpush.msrb.mxu3 %v3835_v54  ;;  %v3155_v54 = vld [vmem:[%s7091_s13 + $0x38] sm:$0xff] }
 0x570   :  { %3091 = vmatpush.msrb.mxu0 %v3841_v39 }
 0x571   :  { %3052 = vmatpush.msrb.mxu3 %v3834_v53  ;;  %v3153_v53 = vld [vmem:[%s7091_s13 + $0x28] sm:$0xff] }
 0x572   :  { %3092 = vmatpush.msrb.mxu0 %v3840_v40 }
 0x573   :  { %3053 = vmatpush.msrb.mxu3 %v3833_v30 }
 0x575   :  { %3054 = vmatpush.msrb.mxu3 %v3832_v62 }
 0x577   :  { %3055 = vmatpush.msrb.mxu3 %v3831_v55 }
 0x579   :  { %3056 = vmatpush.msrb.mxu3 %v3830_v27 }
 0x57b   :  { %3057 = vmatpush.msrb.mxu3 %v3829_v3 }
 0x581   :  { %v6834_v43 = vpop.f32.mrf.mxu2  ;;  %v6836_v26 = vpop.f32.mrf.mxu3 }
 0x582   :  { %v2822_v35 = vadd.f32 %v6836_v26, %v6834_v43  ;;  %v3113_v43 = vld [vmem:[%s7088_s11 + $0x48] sm:$0xff]  ;;  %v3112_v26 = vld [vmem:[%s7088_s11 + $0x40] sm:$0xff] }
 0x583   :  { %3133 = vmatpush.msra.mxu1 %v3113_v43 }
 0x585   :  { %3134 = vmatpush.msra.mxu1 %v3112_v26 }
 0x587   :  { %3135 = vmatpush.msra.mxu1 %v3111_v1 }
 0x589   :  { %3136 = vmatpush.msra.mxu1 %v3110_v45 }
 0x58b   :  { %3137 = vmatpush.msra.mxu1 %v3109_v20 }
 0x58d   :  { %3138 = vmatpush.msra.mxu1 %v3108_v13 }
 0x58f   :  { %3139 = vmatpush.msra.mxu1 %v3107_v25 }
 0x591   :  { %v6859_v36 = vpop.f32.mrf.mxu2  ;;  %v6861_v49 = vpop.f32.mrf.mxu3  ;;  %3140 = vmatpush.msra.mxu1 %v3106_v34 }
 0x592   :  { %v2825_v4 = vadd.f32 %v6861_v49, %v6859_v36 }
 0x593   :  { %3141 = vmatpush.msra.mxu1 %v3105_v48 }
 0x595   :  { %3142 = vmatpush.msra.mxu1 %v3104_v41 }
 0x5a1   :  { %v6881_v0 = vpop.f32.mrf.mxu2  ;;  %v6883_v42 = vpop.f32.mrf.mxu3 }
 0x5a2   :  { %v2828_v33 = vadd.f32 %v6883_v42, %v6881_v0 }
 0x5b1   :  { %v6906_v56 = vpop.f32.mrf.mxu2  ;;  %v6908_v10 = vpop.f32.mrf.mxu3 }
 0x5b2   :  { %v2831_v7 = vadd.f32 %v6908_v10, %v6906_v56  ;;  %v3157_v56 = vld [vmem:[%s7091_s13 + $0x48] sm:$0xff]  ;;  %v3156_v10 = vld [vmem:[%s7091_s13 + $0x40] sm:$0xff] }
 0x5b3   :  { %3175 = vmatpush.msrb.mxu2 %v3157_v56 }
 0x5b5   :  { %3176 = vmatpush.msrb.mxu2 %v3156_v10 }
 0x5b7   :  { %3177 = vmatpush.msrb.mxu2 %v3155_v54 }
 0x5b9   :  { %3178 = vmatpush.msrb.mxu2 %v3154_v24 }
 0x5bb   :  { %3179 = vmatpush.msrb.mxu2 %v3153_v53 }
 0x5bd   :  { %3180 = vmatpush.msrb.mxu2 %v3152_v18 }
 0x5bf   :  { %3181 = vmatpush.msrb.mxu2 %v3151_v2 }
 0x5c1   :  { %v6937_v60 = vpop.f32.mrf.mxu2  ;;  %v6939_v57 = vpop.f32.mrf.mxu3  ;;  %3182 = vmatpush.msrb.mxu2 %v3150_v44 }
 0x5c2   :  { %v2834_v23 = vadd.f32 %v6939_v57, %v6937_v60 }
 0x5c9   :  { %v2873_v63 = vpop.f32.mrf.mxu2  ;;  %v2905_v58 = vpop.f32.mrf.mxu3 }
 0x5ca   :  { %v2906_v28 = vadd.f32 %v2905_v58, %v2873_v63  ;;  %v3149_v63 = vld [vmem:[%s7091_s13 + $0x8] sm:$0xff]  ;;  %v3148_v58 = vld [vmem:[%s7091_s13] sm:$0xff] }
 0x5cb   :  { %3183 = vmatpush.msrb.mxu2 %v3149_v63 }
 0x5cc   :  { %v2920_v9 = vmax.f32 %v2822_v35, %v2906_v28 }
 0x5cd   :  { %3184 = vmatpush.msrb.mxu2 %v3148_v58 }
 0x5ce   :  { %3817 = vmatmul.msk.f32.vlgmr.msra.gmra.mxu3 %vm2946_vm5, %v2920_v9  ;;  %v3856_v9 = vld [vmem:[%s7092_s14] ss:$0 sm:$0xff] }
 0x5d1   :  { %v2876_v5 = vpop.f32.mrf.mxu2  ;;  %v2908_v8 = vpop.f32.mrf.mxu3 }
 0x5d2   :  { %v2909_v14 = vadd.f32 %v2908_v8, %v2876_v5 }
 0x5d4   :  { %v2921_v21 = vmax.f32 %v2825_v4, %v2909_v14 }
 0x5d6   :  { %3816 = vmatmul.msk.f32.vlgmr.msra.gmra.mxu0 %vm2946_vm5, %v2921_v21 }
 0x5d9   :  { %v2879_v22 = vpop.f32.mrf.mxu2  ;;  %v2911_v19 = vpop.f32.mrf.mxu3 }
 0x5da   :  { %v2912_v31 = vadd.f32 %v2911_v19, %v2879_v22 }
 0x5dc   :  { %v2922_v12 = vmax.f32 %v2828_v33, %v2912_v31 }
 0x5de   :  { %3828 = vmatmul.msk.f32.vlgmr.msra.gmra.mxu2 %vm2946_vm5, %v2922_v12 }
 0x5e1   :  { %v2882_v36 = vpop.f32.mrf.mxu2  ;;  %v2914_v49 = vpop.f32.mrf.mxu3 }
 0x5e2   :  { %v2915_v46 = vadd.f32 %v2914_v49, %v2882_v36 }
 0x5e4   :  { %v2923_v17 = vmax.f32 %v2831_v7, %v2915_v46 }
 0x5e6   :  { %3839 = vmatmul.msk.f32.vlgmr.msrb.gmra.mxu3 %vm2946_vm5, %v2923_v17 }
 0x5e9   :  { %v2885_v16 = vpop.f32.mrf.mxu2  ;;  %v2917_v61 = vpop.f32.mrf.mxu3 }
 0x5ea   :  { %v2918_v0 = vadd.f32 %v2917_v61, %v2885_v16 }
 0x5ec   :  { %v2924_v42 = vmax.f32 %v2834_v23, %v2918_v0 }
 0x5ee   :  { %3850 = vmatmul.msk.f32.vlgmr.msrb.gmra.mxu0 %vm2946_vm5, %v2924_v42 }
 0x651   :  { %v2990_v30 = vpop.f32.mrf.mxu3 }
 0x653   :  { %v2967_v37 = vpop.f32.mrf.mxu0 }
 0x654   :  { %v2991_v51 = vadd.f32 %v2990_v30, %v2967_v37 }
 0x661   :  { %v3024_v62 = vpop.f32.mrf.mxu2 }
 0x662   :  { %v3027_v60 = vadd.f32 %v3024_v62, %v2991_v51 }
 0x669   :  { %v3059_v57 = vpop.f32.mrf.mxu3 }
 0x66a   :  { %v3062_v55 = vadd.f32 %v3059_v57, %v3027_v60 }
 0x66b   :  { %v3094_v27 = vpop.f32.mrf.mxu0 }
 0x66c   :  { %v3097_v32 = vadd.f32 %v3094_v27, %v3062_v55 }
 0x66e   :  { %v3102_v3 = vadd.f32 %v3854_v29, %v3097_v32 }
 0x670   :  { %v3103_v50 = vmax.f32 %v3102_v3, 0.0 }
 0x672   :  { %3851 = vmatmul.msk.f32.vlgmr.msra.gmra.mxu1 %vm3123_vm6, %v3103_v50 }
 0x6ef   :  { %v3144_v35 = vpop.f32.mrf.mxu1 }
 0x6f0   :  { %v3145_v28 = vadd.f32 %v3855_v11, %v3144_v35 }
 0x6f2   :  { %v3147_v39 = vmax.f32 %v3145_v28, 0.0 }
 0x6f4   :  { %3853 = vmatmul.msk.f32.vlgmr.msrb.gmra.mxu2 %vm2007_vm3, %v3147_v39 }
 0x777   :  { %v3186_v40 = vpop.f32.mrf.mxu2 }
 0x778   :  { %v3187_v6 = vadd.f32 %v3856_v9, %v3186_v40 }
 0x77a   :  { %3189 = vst [vmem:[%s7093_s15] sm:$0xff] %v3187_v6 }

</bundles_post_ra>
